<compile_context>
chip_gen: v5e
topology: v5e:2x2
jax: 0.10.0
libtpu: 0.0.40
codegen_flags: <defaults>
</compile_context>

<pallas_src>
import functools
import math

import jax
import jax.numpy as jnp
from jax.experimental import pallas as pl
from jax.experimental.pallas import tpu as pltpu


def _unet_blk_kernel(x_ref, b1_ref, b2_ref, s1_ref, t1_ref, s2_ref, t2_ref,
                     o_ref, xpad_ref, hpad_ref, *,
                     B_TILE, H, Kin, Kout, compute_dtype):
    """Fused (conv3x3 -> scale/shift -> ReLU) x 2 for B_TILE batch elements.

    x_ref   : (B_TILE, H, Kin)      input slab, Kin = W*C1p (lane-dense)
    b1_ref  : (3, Kin, Kout)        banded conv1 weights per ky (kx pad folded in)
    b2_ref  : (3, Kout, Kout)       banded conv2 weights per ky
    s*/t*   : (1, Kout)             per-channel folded-norm scale/shift, tiled over W
    o_ref   : (B_TILE, H, Kout)     output slab (lane-dense)
    xpad_ref: VMEM (B_TILE*(H+2), Kin)   row-padded stacked input (compute_dtype)
    hpad_ref: VMEM (B_TILE*(H+2), Kout)  row-padded stacked intermediate (VMEM only)
    """
    S = H + 2                    # per-image row stride in the padded slabs
    Mp = B_TILE * S              # padded-slab rows
    M = Mp - 2                   # matmul M (last image's 2 trailing junk rows skipped)
    f32 = jnp.float32
    prec = (jax.lax.Precision.HIGHEST
            if jnp.dtype(compute_dtype) == jnp.dtype(jnp.float32) else None)

    # ---- build the padded input slab (zero only the border rows, not the slab)
    zrow_in = jnp.zeros((1, Kin), compute_dtype)
    for b in range(B_TILE):
        base = b * S
        xpad_ref[base:base + 1, :] = zrow_in                          # top pad row
        xpad_ref[base + 1:base + 1 + H, :] = x_ref[b].astype(compute_dtype)
        xpad_ref[base + H + 1:base + H + 2, :] = zrow_in              # bottom pad row

    # ---- stage 1: conv1 as 3 fat MXU matmuls + folded norm + ReLU -----------
    acc = jnp.zeros((M, Kout), f32)
    for ky in range(3):
        acc += jnp.dot(xpad_ref[ky:ky + M, :], b1_ref[ky],
                       precision=prec, preferred_element_type=f32)
    h = jnp.maximum(acc * s1_ref[...] + t1_ref[...], 0.0)

    # Row r of `h` holds image b = r//S, row y = r%S (valid for y < H; rows with
    # y in {H, H+1} are inter-image junk).  Storing h at row offset +1 places
    # every valid row at its interior position in hpad and every junk row on a
    # pad-border row, which the small zero-row stores below then overwrite.
    hpad_ref[1:1 + M, :] = h.astype(compute_dtype)
    zrow_h = jnp.zeros((1, Kout), compute_dtype)
    for b in range(B_TILE):
        base = b * S
        hpad_ref[base:base + 1, :] = zrow_h                           # top pad row
        hpad_ref[base + H + 1:base + H + 2, :] = zrow_h               # bottom pad row

    # ---- stage 2: conv2 + folded norm + ReLU (intermediate stays in VMEM) ---
    acc2 = jnp.zeros((M, Kout), f32)
    for ky in range(3):
        acc2 += jnp.dot(hpad_ref[ky:ky + M, :], b2_ref[ky],
                        precision=prec, preferred_element_type=f32)
    y = jnp.maximum(acc2 * s2_ref[...] + t2_ref[...], 0.0)

    # Scatter the H valid rows of each image into the lane-dense output block.
    for b in range(B_TILE):
        base = b * S
        o_ref[b] = y[base:base + H, :].astype(o_ref.dtype)


def _lane_pad_channels(c, w):
    """Smallest c_pad >= c such that w * c_pad is a multiple of 128 lanes."""
    g = 128 // math.gcd(w, 128)
    return int(-(-c // g) * g)


def _band_weights(w_oihw, W, cin_p, cout_p):
    """(Cout, Cin, 3, 3) -> (3, W*cin_p, W*cout_p) block-Toeplitz matrices.

    kx padding is folded in via clipped shift matrices:
      B[ky][r*cin_p + ci, c*cout_p + co] = w[co, ci, ky, kx]  iff  r == c + kx - 1
    so the 3x3 conv of a row-padded (H+2, W*cin_p) slab is
      out[y, :] = sum_ky slab[y + ky, :] @ B[ky]            (out is (H, W*cout_p))
    with NO column padding of the activations.
    """
    Cout, Cin, KH, KW = w_oihw.shape
    w = jnp.zeros((cout_p, cin_p, KH, KW), w_oihw.dtype).at[:Cout, :Cin].set(w_oihw)
    w_t = jnp.transpose(w, (2, 3, 1, 0))                        # (ky, kx, cin_p, cout_p)
    # shift[kx][r, c] = 1 iff r == c + kx - 1 (out-of-range taps dropped = zero pad)
    shift = jnp.stack([jnp.eye(W, W, k=1 - kx, dtype=w.dtype) for kx in range(KW)])
    b = jnp.einsum('xrc,yxio->yrico', shift, w_t)               # (ky, r, cin_p, c, cout_p)
    return b.reshape(KH, W * cin_p, W * cout_p)


def _pick_b_tile(n, h):
    """Largest divisor of n with b_tile*(H+2) <= ~288 rows, preferring >=2 grid steps."""
    divs = [d for d in range(1, n + 1) if n % d == 0 and d * (h + 2) <= 288]
    if not divs:
        return 1
    multi = [d for d in divs if n // d >= 2]
    return max(multi) if multi else max(divs)


def _nchw_to_slab(x_nchw, c_pad, dtype):
    n, c, h, w = x_nchw.shape
    x = jnp.transpose(x_nchw, (0, 2, 3, 1))                     # NHWC
    if c_pad > c:
        x = jnp.pad(x, ((0, 0), (0, 0), (0, 0), (0, c_pad - c)))
    return x.reshape(n, h, w * c_pad).astype(dtype)


def _slab_to_nchw(slab, w, c):
    n, h, wcp = slab.shape
    cp = wcp // w
    x = slab.reshape(n, h, w, cp)[..., :c]
    return jnp.transpose(x, (0, 3, 1, 2))


def unet_blk_forward(x_nchw, params, *, compute_dtype=jnp.bfloat16,
                     out_dtype=jnp.float32, b_tile=None):
    """UNetBlk forward pass, NCHW in / NCHW out (PyTorch layout at the boundary).

    compute_dtype=bf16 (default on all TPU generations) keeps f32 accumulation
    and a f32 norm/ReLU epilogue.  Pass compute_dtype=jnp.float32 for a strict
    numerical mode.  out_dtype=bf16 halves HBM writeback if the consumer is bf16.
    """
    N, C1, H, W = x_nchw.shape
    C2 = params["w1"].shape[0]
    C1p = _lane_pad_channels(C1, W)       # lane-dense input slab (review opt #9)
    C2p = _lane_pad_channels(C2, W)       # lane-dense output slab
    Kin, Kout = W * C1p, W * C2p

    if b_tile is None:
        b_tile = _pick_b_tile(N, H)
    assert N % b_tile == 0, (N, b_tile)
    Mp = b_tile * (H + 2)

    x_slab = _nchw_to_slab(x_nchw, C1p, compute_dtype)

    b1 = _band_weights(params["w1"].astype(jnp.float32), W, C1p, C2p).astype(compute_dtype)
    b2 = _band_weights(params["w2"].astype(jnp.float32), W, C2p, C2p).astype(compute_dtype)

    def tile_vec(v, cp):  # (C,) -> (1, W*cp), padded channels get 0
        vp = jnp.zeros((cp,), jnp.float32).at[:v.shape[0]].set(v.astype(jnp.float32))
        return jnp.tile(vp, W).reshape(1, W * cp)

    s1, t1 = tile_vec(params["scale1"], C2p), tile_vec(params["shift1"], C2p)
    s2, t2 = tile_vec(params["scale2"], C2p), tile_vec(params["shift2"], C2p)

    # Explicit VMEM budget (review opt #6): double-buffered blocks + scratches.
    cdb = jnp.dtype(compute_dtype).itemsize
    odb = jnp.dtype(out_dtype).itemsize
    est = (2 * b_tile * H * Kin * cdb            # input blocks
           + 2 * b_tile * H * Kout * odb         # output blocks
           + 2 * 3 * Kin * Kout * cdb            # b1 (double-buffered by default)
           + 2 * 3 * Kout * Kout * cdb           # b2
           + 8 * 2 * Kout * 4                    # scale/shift vectors
           + Mp * (Kin + Kout) * cdb)            # padded scratches
    vmem_limit = int(min(100 * 2**20, max(32 * 2**20, 2 * est)))

    kernel = functools.partial(_unet_blk_kernel, B_TILE=b_tile, H=H,
                               Kin=Kin, Kout=Kout, compute_dtype=compute_dtype)

    out_slab = pl.pallas_call(
        kernel,
        out_shape=jax.ShapeDtypeStruct((N, H, Kout), out_dtype),
        grid=(N // b_tile,),
        in_specs=[
            pl.BlockSpec((b_tile, H, Kin), lambda n: (n, 0, 0)),
            # TODO(synk): at real channel counts, single-buffer these grid-invariant
            # banded weights (pipeline_mode=pl.Buffered(1)) to halve their VMEM.
            pl.BlockSpec((3, Kin, Kout), lambda n: (0, 0, 0)),
            pl.BlockSpec((3, Kout, Kout), lambda n: (0, 0, 0)),
            pl.BlockSpec((1, Kout), lambda n: (0, 0)),
            pl.BlockSpec((1, Kout), lambda n: (0, 0)),
            pl.BlockSpec((1, Kout), lambda n: (0, 0)),
            pl.BlockSpec((1, Kout), lambda n: (0, 0)),
        ],
        out_specs=pl.BlockSpec((b_tile, H, Kout), lambda n: (n, 0, 0)),
        scratch_shapes=[
            pltpu.VMEM((Mp, Kin), compute_dtype),
            pltpu.VMEM((Mp, Kout), compute_dtype),
        ],
        compiler_params=pltpu.CompilerParams(
            dimension_semantics=("parallel",),     # batch tiles can feed both v7x TCs
            vmem_limit_bytes=vmem_limit),
    )(x_slab, b1, b2, s1, t1, s2, t2)

    return _slab_to_nchw(out_slab, W, C2)


def _fold_bn(gamma, beta, mean, var, eps=1e-5):
    scale = gamma / jnp.sqrt(var + eps)
    shift = beta - mean * scale
    return scale, shift


def _reference_forward(x_nchw, params):
    """Pure-JAX reference (lax.conv, full f32 precision) for correctness checking."""
    def blk(x, w, scale, shift):
        y = jax.lax.conv_general_dilated(
            x, w, window_strides=(1, 1), padding=((1, 1), (1, 1)),
            dimension_numbers=("NCHW", "OIHW", "NCHW"),
            precision=jax.lax.Precision.HIGHEST)
        y = y * scale[None, :, None, None] + shift[None, :, None, None]
        return jnp.maximum(y, 0.0)

    h = blk(x_nchw, params["w1"], params["scale1"], params["shift1"])
    return blk(h, params["w2"], params["scale2"], params["shift2"])


if __name__ == "__main__":
    # Module config: UNetBlk(ic, oc, norm_type='batch', act_type='relu', bias=False)
    # N=8 so the auto b_tile (=4) demonstrates both batched-M matmuls and a
    # multi-step "parallel" grid.
    N, ic, oc, H, W = 8, 4, 8, 16, 16

    key = jax.random.PRNGKey(0)
    (kx, kw1, kw2, kg1, kb1, km1, kv1, kg2, kb2, km2, kv2) = jax.random.split(key, 11)

    x = jax.random.normal(kx, (N, ic, H, W), dtype=jnp.float32)

    # Conv weights (bias=False): conv1 (oc, ic, 3, 3), conv2 (oc, oc, 3, 3).
    w1 = 0.1 * jax.random.normal(kw1, (oc, ic, 3, 3), dtype=jnp.float32)
    w2 = 0.1 * jax.random.normal(kw2, (oc, oc, 3, 3), dtype=jnp.float32)

    # BatchNorm (inference) parameters, deterministic but non-trivial.
    g1 = 1.0 + 0.1 * jax.random.normal(kg1, (oc,), dtype=jnp.float32)
    b1 = 0.1 * jax.random.normal(kb1, (oc,), dtype=jnp.float32)
    m1 = 0.1 * jax.random.normal(km1, (oc,), dtype=jnp.float32)
    v1 = jnp.abs(1.0 + 0.1 * jax.random.normal(kv1, (oc,), dtype=jnp.float32))
    g2 = 1.0 + 0.1 * jax.random.normal(kg2, (oc,), dtype=jnp.float32)
    b2 = 0.1 * jax.random.normal(kb2, (oc,), dtype=jnp.float32)
    m2 = 0.1 * jax.random.normal(km2, (oc,), dtype=jnp.float32)
    v2 = jnp.abs(1.0 + 0.1 * jax.random.normal(kv2, (oc,), dtype=jnp.float32))

    s1, sh1 = _fold_bn(g1, b1, m1, v1)
    s2, sh2 = _fold_bn(g2, b2, m2, v2)
    params = {"w1": w1, "scale1": s1, "shift1": sh1,
              "w2": w2, "scale2": s2, "shift2": sh2}

    ref = _reference_forward(x, params)

    # f32 compute path: strict numerical check.
    out_f32 = jax.jit(
        functools.partial(unet_blk_forward, compute_dtype=jnp.float32))(x, params)
    out_f32 = jax.block_until_ready(out_f32)
    assert out_f32.shape == (N, oc, H, W), out_f32.shape
    assert jnp.allclose(out_f32, ref, atol=1e-3, rtol=1e-3), \
        float(jnp.max(jnp.abs(out_f32 - ref)))

    # Default path: bf16 matmul operands (f32 accumulation) on all generations.
    out = jax.jit(unet_blk_forward)(x, params)
    out = jax.block_until_ready(out)
    assert out.shape == (N, oc, H, W), out.shape
    assert jnp.allclose(out, ref, atol=5e-2, rtol=5e-2), \
        float(jnp.max(jnp.abs(out - ref)))

    print("KERNEL_OK")
</pallas_src>

<mosaic_0001>
module attributes {stable_mosaic.version = 11 : i64} {
  func.func @_unet_blk_kernel(%arg0: i32, %arg1: memref<4x16x128xf32, #tpu.memory_space<vmem>>, %arg2: memref<3x128x128xf32, #tpu.memory_space<vmem>>, %arg3: memref<3x128x128xf32, #tpu.memory_space<vmem>>, %arg4: memref<1x128xf32, #tpu.memory_space<vmem>>, %arg5: memref<1x128xf32, #tpu.memory_space<vmem>>, %arg6: memref<1x128xf32, #tpu.memory_space<vmem>>, %arg7: memref<1x128xf32, #tpu.memory_space<vmem>>, %arg8: memref<4x16x128xf32, #tpu.memory_space<vmem>>, %arg9: memref<72x128xf32, #tpu.memory_space<vmem>>, %arg10: memref<72x128xf32, #tpu.memory_space<vmem>>) attributes {dimension_semantics = [#tpu.dimension_semantics<parallel>], iteration_bounds = array<i64: 2>, scalar_prefetch = 0 : i64, scratch_operands = 2 : i64, tpu.core_type = #tpu.core_type<tc>, window_params = [{transform_indices = @transform_0, window_bounds = array<i64: 4, 16, 128>}, {pipeline_mode = #tpu.pipeline_mode<synchronous>, transform_indices = @transform_1, window_bounds = array<i64: 3, 128, 128>}, {pipeline_mode = #tpu.pipeline_mode<synchronous>, transform_indices = @transform_2, window_bounds = array<i64: 3, 128, 128>}, {pipeline_mode = #tpu.pipeline_mode<synchronous>, transform_indices = @transform_3, window_bounds = array<i64: 1, 128>}, {pipeline_mode = #tpu.pipeline_mode<synchronous>, transform_indices = @transform_4, window_bounds = array<i64: 1, 128>}, {pipeline_mode = #tpu.pipeline_mode<synchronous>, transform_indices = @transform_5, window_bounds = array<i64: 1, 128>}, {pipeline_mode = #tpu.pipeline_mode<synchronous>, transform_indices = @transform_6, window_bounds = array<i64: 1, 128>}, {transform_indices = @transform_7, window_bounds = array<i64: 4, 16, 128>}]} {
    %cst = arith.constant 0.000000e+00 : f32
    %0 = vector.broadcast %cst : f32 to vector<1x128xf32>
    %c0 = arith.constant 0 : index
    %c0_0 = arith.constant 0 : index
    %1 = vector.load %arg9[%c0, %c0_0] : memref<72x128xf32, #tpu.memory_space<vmem>>, vector<1x128xf32>
    tpu.vector_store %arg9[%c0, %c0_0], %0 {strides = array<i32>} : memref<72x128xf32, #tpu.memory_space<vmem>>, vector<1x128xf32>,
    %c0_1 = arith.constant 0 : index
    %c0_2 = arith.constant 0 : index
    %c0_3 = arith.constant 0 : index
    %2 = vector.load %arg1[%c0_1, %c0_2, %c0_3] : memref<4x16x128xf32, #tpu.memory_space<vmem>>, vector<1x16x128xf32>
    %3 = vector.shape_cast %2 : vector<1x16x128xf32> to vector<16x128xf32>
    %c1 = arith.constant 1 : index
    %c0_4 = arith.constant 0 : index
    %4 = vector.load %arg9[%c1, %c0_4] : memref<72x128xf32, #tpu.memory_space<vmem>>, vector<16x128xf32>
    tpu.vector_store %arg9[%c1, %c0_4], %3 {strides = array<i32>} : memref<72x128xf32, #tpu.memory_space<vmem>>, vector<16x128xf32>,
    %c17 = arith.constant 17 : index
    %c0_5 = arith.constant 0 : index
    %5 = vector.load %arg9[%c17, %c0_5] : memref<72x128xf32, #tpu.memory_space<vmem>>, vector<1x128xf32>
    tpu.vector_store %arg9[%c17, %c0_5], %0 {strides = array<i32>} : memref<72x128xf32, #tpu.memory_space<vmem>>, vector<1x128xf32>,
    %c18 = arith.constant 18 : index
    %c0_6 = arith.constant 0 : index
    %6 = vector.load %arg9[%c18, %c0_6] : memref<72x128xf32, #tpu.memory_space<vmem>>, vector<1x128xf32>
    tpu.vector_store %arg9[%c18, %c0_6], %0 {strides = array<i32>} : memref<72x128xf32, #tpu.memory_space<vmem>>, vector<1x128xf32>,
    %c1_7 = arith.constant 1 : index
    %c0_8 = arith.constant 0 : index
    %c0_9 = arith.constant 0 : index
    %7 = vector.load %arg1[%c1_7, %c0_8, %c0_9] : memref<4x16x128xf32, #tpu.memory_space<vmem>>, vector<1x16x128xf32>
    %8 = vector.shape_cast %7 : vector<1x16x128xf32> to vector<16x128xf32>
    %c19 = arith.constant 19 : index
    %c0_10 = arith.constant 0 : index
    %9 = vector.load %arg9[%c19, %c0_10] : memref<72x128xf32, #tpu.memory_space<vmem>>, vector<16x128xf32>
    tpu.vector_store %arg9[%c19, %c0_10], %8 {strides = array<i32>} : memref<72x128xf32, #tpu.memory_space<vmem>>, vector<16x128xf32>,
    %c35 = arith.constant 35 : index
    %c0_11 = arith.constant 0 : index
    %10 = vector.load %arg9[%c35, %c0_11] : memref<72x128xf32, #tpu.memory_space<vmem>>, vector<1x128xf32>
    tpu.vector_store %arg9[%c35, %c0_11], %0 {strides = array<i32>} : memref<72x128xf32, #tpu.memory_space<vmem>>, vector<1x128xf32>,
    %c36 = arith.constant 36 : index
    %c0_12 = arith.constant 0 : index
    %11 = vector.load %arg9[%c36, %c0_12] : memref<72x128xf32, #tpu.memory_space<vmem>>, vector<1x128xf32>
    tpu.vector_store %arg9[%c36, %c0_12], %0 {strides = array<i32>} : memref<72x128xf32, #tpu.memory_space<vmem>>, vector<1x128xf32>,
    %c2 = arith.constant 2 : index
    %c0_13 = arith.constant 0 : index
    %c0_14 = arith.constant 0 : index
    %12 = vector.load %arg1[%c2, %c0_13, %c0_14] : memref<4x16x128xf32, #tpu.memory_space<vmem>>, vector<1x16x128xf32>
    %13 = vector.shape_cast %12 : vector<1x16x128xf32> to vector<16x128xf32>
    %c37 = arith.constant 37 : index
    %c0_15 = arith.constant 0 : index
    %14 = vector.load %arg9[%c37, %c0_15] : memref<72x128xf32, #tpu.memory_space<vmem>>, vector<16x128xf32>
    tpu.vector_store %arg9[%c37, %c0_15], %13 {strides = array<i32>} : memref<72x128xf32, #tpu.memory_space<vmem>>, vector<16x128xf32>,
    %c53 = arith.constant 53 : index
    %c0_16 = arith.constant 0 : index
    %15 = vector.load %arg9[%c53, %c0_16] : memref<72x128xf32, #tpu.memory_space<vmem>>, vector<1x128xf32>
    tpu.vector_store %arg9[%c53, %c0_16], %0 {strides = array<i32>} : memref<72x128xf32, #tpu.memory_space<vmem>>, vector<1x128xf32>,
    %c54 = arith.constant 54 : index
    %c0_17 = arith.constant 0 : index
    %16 = vector.load %arg9[%c54, %c0_17] : memref<72x128xf32, #tpu.memory_space<vmem>>, vector<1x128xf32>
    tpu.vector_store %arg9[%c54, %c0_17], %0 {strides = array<i32>} : memref<72x128xf32, #tpu.memory_space<vmem>>, vector<1x128xf32>,
    %c3 = arith.constant 3 : index
    %c0_18 = arith.constant 0 : index
    %c0_19 = arith.constant 0 : index
    %17 = vector.load %arg1[%c3, %c0_18, %c0_19] : memref<4x16x128xf32, #tpu.memory_space<vmem>>, vector<1x16x128xf32>
    %18 = vector.shape_cast %17 : vector<1x16x128xf32> to vector<16x128xf32>
    %c55 = arith.constant 55 : index
    %c0_20 = arith.constant 0 : index
    %19 = vector.load %arg9[%c55, %c0_20] : memref<72x128xf32, #tpu.memory_space<vmem>>, vector<16x128xf32>
    tpu.vector_store %arg9[%c55, %c0_20], %18 {strides = array<i32>} : memref<72x128xf32, #tpu.memory_space<vmem>>, vector<16x128xf32>,
    %c71 = arith.constant 71 : index
    %c0_21 = arith.constant 0 : index
    %20 = vector.load %arg9[%c71, %c0_21] : memref<72x128xf32, #tpu.memory_space<vmem>>, vector<1x128xf32>
    tpu.vector_store %arg9[%c71, %c0_21], %0 {strides = array<i32>} : memref<72x128xf32, #tpu.memory_space<vmem>>, vector<1x128xf32>,
    %cst_22 = arith.constant 0.000000e+00 : f32
    %21 = vector.broadcast %cst_22 : f32 to vector<70x128xf32>
    %c0_23 = arith.constant 0 : index
    %c0_24 = arith.constant 0 : index
    %22 = vector.load %arg9[%c0_23, %c0_24] : memref<72x128xf32, #tpu.memory_space<vmem>>, vector<70x128xf32>
    %c0_25 = arith.constant 0 : index
    %c0_26 = arith.constant 0 : index
    %c0_27 = arith.constant 0 : index
    %23 = vector.load %arg2[%c0_25, %c0_26, %c0_27] : memref<3x128x128xf32, #tpu.memory_space<vmem>>, vector<1x128x128xf32>
    %24 = vector.shape_cast %23 : vector<1x128x128xf32> to vector<128x128xf32>
    %cst_28 = arith.constant dense<0.000000e+00> : vector<70x128xf32>
    %25 = tpu.matmul %22, %24, %cst_28 {dimension_numbers = #tpu.dot_dimension_numbers<[1], [0], [0], [1], [0, 0, 1, 1], [], []>, precision = #tpu.contract_precision<fp32>} : vector<70x128xf32>, vector<128x128xf32>, vector<70x128xf32> -> vector<70x128xf32>
    %26 = arith.addf %21, %25 : vector<70x128xf32>
    %c1_29 = arith.constant 1 : index
    %c0_30 = arith.constant 0 : index
    %27 = vector.load %arg9[%c1_29, %c0_30] : memref<72x128xf32, #tpu.memory_space<vmem>>, vector<70x128xf32>
    %c1_31 = arith.constant 1 : index
    %c0_32 = arith.constant 0 : index
    %c0_33 = arith.constant 0 : index
    %28 = vector.load %arg2[%c1_31, %c0_32, %c0_33] : memref<3x128x128xf32, #tpu.memory_space<vmem>>, vector<1x128x128xf32>
    %29 = vector.shape_cast %28 : vector<1x128x128xf32> to vector<128x128xf32>
    %cst_34 = arith.constant dense<0.000000e+00> : vector<70x128xf32>
    %30 = tpu.matmul %27, %29, %cst_34 {dimension_numbers = #tpu.dot_dimension_numbers<[1], [0], [0], [1], [0, 0, 1, 1], [], []>, precision = #tpu.contract_precision<fp32>} : vector<70x128xf32>, vector<128x128xf32>, vector<70x128xf32> -> vector<70x128xf32>
    %31 = arith.addf %26, %30 : vector<70x128xf32>
    %c2_35 = arith.constant 2 : index
    %c0_36 = arith.constant 0 : index
    %32 = vector.load %arg9[%c2_35, %c0_36] : memref<72x128xf32, #tpu.memory_space<vmem>>, vector<70x128xf32>
    %c2_37 = arith.constant 2 : index
    %c0_38 = arith.constant 0 : index
    %c0_39 = arith.constant 0 : index
    %33 = vector.load %arg2[%c2_37, %c0_38, %c0_39] : memref<3x128x128xf32, #tpu.memory_space<vmem>>, vector<1x128x128xf32>
    %34 = vector.shape_cast %33 : vector<1x128x128xf32> to vector<128x128xf32>
    %cst_40 = arith.constant dense<0.000000e+00> : vector<70x128xf32>
    %35 = tpu.matmul %32, %34, %cst_40 {dimension_numbers = #tpu.dot_dimension_numbers<[1], [0], [0], [1], [0, 0, 1, 1], [], []>, precision = #tpu.contract_precision<fp32>} : vector<70x128xf32>, vector<128x128xf32>, vector<70x128xf32> -> vector<70x128xf32>
    %36 = arith.addf %31, %35 : vector<70x128xf32>
    %c0_41 = arith.constant 0 : index
    %c0_42 = arith.constant 0 : index
    %37 = vector.load %arg4[%c0_41, %c0_42] : memref<1x128xf32, #tpu.memory_space<vmem>>, vector<1x128xf32>
    %38 = vector.broadcast %37 : vector<1x128xf32> to vector<70x128xf32>
    %39 = arith.mulf %36, %38 : vector<70x128xf32>
    %c0_43 = arith.constant 0 : index
    %c0_44 = arith.constant 0 : index
    %40 = vector.load %arg5[%c0_43, %c0_44] : memref<1x128xf32, #tpu.memory_space<vmem>>, vector<1x128xf32>
    %41 = vector.broadcast %40 : vector<1x128xf32> to vector<70x128xf32>
    %42 = arith.addf %39, %41 : vector<70x128xf32>
    %cst_45 = arith.constant 0.000000e+00 : f32
    %43 = vector.broadcast %cst_45 : f32 to vector<70x128xf32>
    %44 = arith.maximumf %42, %43 : vector<70x128xf32>
    %c1_46 = arith.constant 1 : index
    %c0_47 = arith.constant 0 : index
    %45 = vector.load %arg10[%c1_46, %c0_47] : memref<72x128xf32, #tpu.memory_space<vmem>>, vector<70x128xf32>
    tpu.vector_store %arg10[%c1_46, %c0_47], %44 {strides = array<i32>} : memref<72x128xf32, #tpu.memory_space<vmem>>, vector<70x128xf32>,
    %cst_48 = arith.constant 0.000000e+00 : f32
    %46 = vector.broadcast %cst_48 : f32 to vector<1x128xf32>
    %c0_49 = arith.constant 0 : index
    %c0_50 = arith.constant 0 : index
    %47 = vector.load %arg10[%c0_49, %c0_50] : memref<72x128xf32, #tpu.memory_space<vmem>>, vector<1x128xf32>
    tpu.vector_store %arg10[%c0_49, %c0_50], %46 {strides = array<i32>} : memref<72x128xf32, #tpu.memory_space<vmem>>, vector<1x128xf32>,
    %c17_51 = arith.constant 17 : index
    %c0_52 = arith.constant 0 : index
    %48 = vector.load %arg10[%c17_51, %c0_52] : memref<72x128xf32, #tpu.memory_space<vmem>>, vector<1x128xf32>
    tpu.vector_store %arg10[%c17_51, %c0_52], %46 {strides = array<i32>} : memref<72x128xf32, #tpu.memory_space<vmem>>, vector<1x128xf32>,
    %c18_53 = arith.constant 18 : index
    %c0_54 = arith.constant 0 : index
    %49 = vector.load %arg10[%c18_53, %c0_54] : memref<72x128xf32, #tpu.memory_space<vmem>>, vector<1x128xf32>
    tpu.vector_store %arg10[%c18_53, %c0_54], %46 {strides = array<i32>} : memref<72x128xf32, #tpu.memory_space<vmem>>, vector<1x128xf32>,
    %c35_55 = arith.constant 35 : index
    %c0_56 = arith.constant 0 : index
    %50 = vector.load %arg10[%c35_55, %c0_56] : memref<72x128xf32, #tpu.memory_space<vmem>>, vector<1x128xf32>
    tpu.vector_store %arg10[%c35_55, %c0_56], %46 {strides = array<i32>} : memref<72x128xf32, #tpu.memory_space<vmem>>, vector<1x128xf32>,
    %c36_57 = arith.constant 36 : index
    %c0_58 = arith.constant 0 : index
    %51 = vector.load %arg10[%c36_57, %c0_58] : memref<72x128xf32, #tpu.memory_space<vmem>>, vector<1x128xf32>
    tpu.vector_store %arg10[%c36_57, %c0_58], %46 {strides = array<i32>} : memref<72x128xf32, #tpu.memory_space<vmem>>, vector<1x128xf32>,
    %c53_59 = arith.constant 53 : index
    %c0_60 = arith.constant 0 : index
    %52 = vector.load %arg10[%c53_59, %c0_60] : memref<72x128xf32, #tpu.memory_space<vmem>>, vector<1x128xf32>
    tpu.vector_store %arg10[%c53_59, %c0_60], %46 {strides = array<i32>} : memref<72x128xf32, #tpu.memory_space<vmem>>, vector<1x128xf32>,
    %c54_61 = arith.constant 54 : index
    %c0_62 = arith.constant 0 : index
    %53 = vector.load %arg10[%c54_61, %c0_62] : memref<72x128xf32, #tpu.memory_space<vmem>>, vector<1x128xf32>
    tpu.vector_store %arg10[%c54_61, %c0_62], %46 {strides = array<i32>} : memref<72x128xf32, #tpu.memory_space<vmem>>, vector<1x128xf32>,
    %c71_63 = arith.constant 71 : index
    %c0_64 = arith.constant 0 : index
    %54 = vector.load %arg10[%c71_63, %c0_64] : memref<72x128xf32, #tpu.memory_space<vmem>>, vector<1x128xf32>
    tpu.vector_store %arg10[%c71_63, %c0_64], %46 {strides = array<i32>} : memref<72x128xf32, #tpu.memory_space<vmem>>, vector<1x128xf32>,
    %cst_65 = arith.constant 0.000000e+00 : f32
    %55 = vector.broadcast %cst_65 : f32 to vector<70x128xf32>
    %c0_66 = arith.constant 0 : index
    %c0_67 = arith.constant 0 : index
    %56 = vector.load %arg10[%c0_66, %c0_67] : memref<72x128xf32, #tpu.memory_space<vmem>>, vector<70x128xf32>
    %c0_68 = arith.constant 0 : index
    %c0_69 = arith.constant 0 : index
    %c0_70 = arith.constant 0 : index
    %57 = vector.load %arg3[%c0_68, %c0_69, %c0_70] : memref<3x128x128xf32, #tpu.memory_space<vmem>>, vector<1x128x128xf32>
    %58 = vector.shape_cast %57 : vector<1x128x128xf32> to vector<128x128xf32>
    %cst_71 = arith.constant dense<0.000000e+00> : vector<70x128xf32>
    %59 = tpu.matmul %56, %58, %cst_71 {dimension_numbers = #tpu.dot_dimension_numbers<[1], [0], [0], [1], [0, 0, 1, 1], [], []>, precision = #tpu.contract_precision<fp32>} : vector<70x128xf32>, vector<128x128xf32>, vector<70x128xf32> -> vector<70x128xf32>
    %60 = arith.addf %55, %59 : vector<70x128xf32>
    %c1_72 = arith.constant 1 : index
    %c0_73 = arith.constant 0 : index
    %61 = vector.load %arg10[%c1_72, %c0_73] : memref<72x128xf32, #tpu.memory_space<vmem>>, vector<70x128xf32>
    %c1_74 = arith.constant 1 : index
    %c0_75 = arith.constant 0 : index
    %c0_76 = arith.constant 0 : index
    %62 = vector.load %arg3[%c1_74, %c0_75, %c0_76] : memref<3x128x128xf32, #tpu.memory_space<vmem>>, vector<1x128x128xf32>
    %63 = vector.shape_cast %62 : vector<1x128x128xf32> to vector<128x128xf32>
    %cst_77 = arith.constant dense<0.000000e+00> : vector<70x128xf32>
    %64 = tpu.matmul %61, %63, %cst_77 {dimension_numbers = #tpu.dot_dimension_numbers<[1], [0], [0], [1], [0, 0, 1, 1], [], []>, precision = #tpu.contract_precision<fp32>} : vector<70x128xf32>, vector<128x128xf32>, vector<70x128xf32> -> vector<70x128xf32>
    %65 = arith.addf %60, %64 : vector<70x128xf32>
    %c2_78 = arith.constant 2 : index
    %c0_79 = arith.constant 0 : index
    %66 = vector.load %arg10[%c2_78, %c0_79] : memref<72x128xf32, #tpu.memory_space<vmem>>, vector<70x128xf32>
    %c2_80 = arith.constant 2 : index
    %c0_81 = arith.constant 0 : index
    %c0_82 = arith.constant 0 : index
    %67 = vector.load %arg3[%c2_80, %c0_81, %c0_82] : memref<3x128x128xf32, #tpu.memory_space<vmem>>, vector<1x128x128xf32>
    %68 = vector.shape_cast %67 : vector<1x128x128xf32> to vector<128x128xf32>
    %cst_83 = arith.constant dense<0.000000e+00> : vector<70x128xf32>
    %69 = tpu.matmul %66, %68, %cst_83 {dimension_numbers = #tpu.dot_dimension_numbers<[1], [0], [0], [1], [0, 0, 1, 1], [], []>, precision = #tpu.contract_precision<fp32>} : vector<70x128xf32>, vector<128x128xf32>, vector<70x128xf32> -> vector<70x128xf32>
    %70 = arith.addf %65, %69 : vector<70x128xf32>
    %c0_84 = arith.constant 0 : index
    %c0_85 = arith.constant 0 : index
    %71 = vector.load %arg6[%c0_84, %c0_85] : memref<1x128xf32, #tpu.memory_space<vmem>>, vector<1x128xf32>
    %72 = vector.broadcast %71 : vector<1x128xf32> to vector<70x128xf32>
    %73 = arith.mulf %70, %72 : vector<70x128xf32>
    %c0_86 = arith.constant 0 : index
    %c0_87 = arith.constant 0 : index
    %74 = vector.load %arg7[%c0_86, %c0_87] : memref<1x128xf32, #tpu.memory_space<vmem>>, vector<1x128xf32>
    %75 = vector.broadcast %74 : vector<1x128xf32> to vector<70x128xf32>
    %76 = arith.addf %73, %75 : vector<70x128xf32>
    %cst_88 = arith.constant 0.000000e+00 : f32
    %77 = vector.broadcast %cst_88 : f32 to vector<70x128xf32>
    %78 = arith.maximumf %76, %77 : vector<70x128xf32>
    %79 = vector.extract_strided_slice %78 {offsets = [0, 0], sizes = [16, 128], strides = [1, 1]} : vector<70x128xf32> to vector<16x128xf32>
    %c0_89 = arith.constant 0 : index
    %c0_90 = arith.constant 0 : index
    %c0_91 = arith.constant 0 : index
    %80 = vector.load %arg8[%c0_89, %c0_90, %c0_91] : memref<4x16x128xf32, #tpu.memory_space<vmem>>, vector<1x16x128xf32>
    %81 = vector.shape_cast %80 : vector<1x16x128xf32> to vector<16x128xf32>
    %82 = vector.shape_cast %79 : vector<16x128xf32> to vector<1x16x128xf32>
    tpu.vector_store %arg8[%c0_89, %c0_90, %c0_91], %82 {strides = array<i32>} : memref<4x16x128xf32, #tpu.memory_space<vmem>>, vector<1x16x128xf32>,
    %83 = vector.extract_strided_slice %78 {offsets = [18, 0], sizes = [16, 128], strides = [1, 1]} : vector<70x128xf32> to vector<16x128xf32>
    %c1_92 = arith.constant 1 : index
    %c0_93 = arith.constant 0 : index
    %c0_94 = arith.constant 0 : index
    %84 = vector.load %arg8[%c1_92, %c0_93, %c0_94] : memref<4x16x128xf32, #tpu.memory_space<vmem>>, vector<1x16x128xf32>
    %85 = vector.shape_cast %84 : vector<1x16x128xf32> to vector<16x128xf32>
    %86 = vector.shape_cast %83 : vector<16x128xf32> to vector<1x16x128xf32>
    tpu.vector_store %arg8[%c1_92, %c0_93, %c0_94], %86 {strides = array<i32>} : memref<4x16x128xf32, #tpu.memory_space<vmem>>, vector<1x16x128xf32>,
    %87 = vector.extract_strided_slice %78 {offsets = [36, 0], sizes = [16, 128], strides = [1, 1]} : vector<70x128xf32> to vector<16x128xf32>
    %c2_95 = arith.constant 2 : index
    %c0_96 = arith.constant 0 : index
    %c0_97 = arith.constant 0 : index
    %88 = vector.load %arg8[%c2_95, %c0_96, %c0_97] : memref<4x16x128xf32, #tpu.memory_space<vmem>>, vector<1x16x128xf32>
    %89 = vector.shape_cast %88 : vector<1x16x128xf32> to vector<16x128xf32>
    %90 = vector.shape_cast %87 : vector<16x128xf32> to vector<1x16x128xf32>
    tpu.vector_store %arg8[%c2_95, %c0_96, %c0_97], %90 {strides = array<i32>} : memref<4x16x128xf32, #tpu.memory_space<vmem>>, vector<1x16x128xf32>,
    %91 = vector.extract_strided_slice %78 {offsets = [54, 0], sizes = [16, 128], strides = [1, 1]} : vector<70x128xf32> to vector<16x128xf32>
    %c3_98 = arith.constant 3 : index
    %c0_99 = arith.constant 0 : index
    %c0_100 = arith.constant 0 : index
    %92 = vector.load %arg8[%c3_98, %c0_99, %c0_100] : memref<4x16x128xf32, #tpu.memory_space<vmem>>, vector<1x16x128xf32>
    %93 = vector.shape_cast %92 : vector<1x16x128xf32> to vector<16x128xf32>
    %94 = vector.shape_cast %91 : vector<16x128xf32> to vector<1x16x128xf32>
    tpu.vector_store %arg8[%c3_98, %c0_99, %c0_100], %94 {strides = array<i32>} : memref<4x16x128xf32, #tpu.memory_space<vmem>>, vector<1x16x128xf32>,
    return
  }
  func.func @transform_0(%arg0: i32) -> (i32, i32, i32) {
    %c0_i32 = arith.constant 0 : i32
    %c0_i32_0 = arith.constant 0 : i32
    %c0_i32_1 = arith.constant 0 : i32
    return %arg0, %c0_i32, %c0_i32_0 : i32, i32, i32
  }
  func.func @transform_1(%arg0: i32) -> (i32, i32, i32) {
    %c0_i32 = arith.constant 0 : i32
    %c0_i32_0 = arith.constant 0 : i32
    %c0_i32_1 = arith.constant 0 : i32
    %c0_i32_2 = arith.constant 0 : i32
    return %c0_i32, %c0_i32_0, %c0_i32_1 : i32, i32, i32
  }
  func.func @transform_2(%arg0: i32) -> (i32, i32, i32) {
    %c0_i32 = arith.constant 0 : i32
    %c0_i32_0 = arith.constant 0 : i32
    %c0_i32_1 = arith.constant 0 : i32
    %c0_i32_2 = arith.constant 0 : i32
    return %c0_i32, %c0_i32_0, %c0_i32_1 : i32, i32, i32
  }
  func.func @transform_3(%arg0: i32) -> (i32, i32) {
    %c0_i32 = arith.constant 0 : i32
    %c0_i32_0 = arith.constant 0 : i32
    %c0_i32_1 = arith.constant 0 : i32
    return %c0_i32, %c0_i32_0 : i32, i32
  }
  func.func @transform_4(%arg0: i32) -> (i32, i32) {
    %c0_i32 = arith.constant 0 : i32
    %c0_i32_0 = arith.constant 0 : i32
    %c0_i32_1 = arith.constant 0 : i32
    return %c0_i32, %c0_i32_0 : i32, i32
  }
  func.func @transform_5(%arg0: i32) -> (i32, i32) {
    %c0_i32 = arith.constant 0 : i32
    %c0_i32_0 = arith.constant 0 : i32
    %c0_i32_1 = arith.constant 0 : i32
    return %c0_i32, %c0_i32_0 : i32, i32
  }
  func.func @transform_6(%arg0: i32) -> (i32, i32) {
    %c0_i32 = arith.constant 0 : i32
    %c0_i32_0 = arith.constant 0 : i32
    %c0_i32_1 = arith.constant 0 : i32
    return %c0_i32, %c0_i32_0 : i32, i32
  }
  func.func @transform_7(%arg0: i32) -> (i32, i32, i32) {
    %c0_i32 = arith.constant 0 : i32
    %c0_i32_0 = arith.constant 0 : i32
    %c0_i32_1 = arith.constant 0 : i32
    return %arg0, %c0_i32, %c0_i32_0 : i32, i32, i32
  }
}

</mosaic_0001>

<bundles_post_ra>
// kernel: tile.23
= control target key start
LH: loop header
LB: loop body
LE: loop exit
PB: predicated region body
PF: predicated region fallthrough
CT: control target
= control target key end

     0   :  { %s28_s0 = inlined_call_operand.vmem [shape: f32[8], index: 0, kind: input, shape index: {}]   ;;  %s29_s1 = inlined_call_operand.vmem [shape: f32[16,8], index: 1, kind: output, shape index: {}]  }
   0x1   :  { %v4_v0 = vld [vmem:[%s28_s0] ss:$0 sm:$0xff] }
   0x2   :  { %5 = vst [vmem:[%s29_s1] sm:$0xff] %v4_v0 }
   0x3   :  { %8 = vst [vmem:[%s29_s1 + $0x8] sm:$0xff] %v4_v0 }

// kernel: tile.24
= control target key start
LH: loop header
LB: loop body
LE: loop exit
PB: predicated region body
PF: predicated region fallthrough
CT: control target
= control target key end

     0   :  { %s131_s10 = smov 120   ;;  %s132_s11 = smov 104   ;;  %vm3_vm0 = vcmask 64512   ;;  %vm9_vm1 = vcmask 1048512   ;;  %vm15_vm2 = vcmask 982912   ;;  %vm21_vm3 = vcmask 917312   ;;  %s207_s0 = inlined_call_operand.vmem [shape: f32[16,8], index: 0, kind: input, shape index: {}]   ;;  %s208_s1 = inlined_call_operand.vmem [shape: f32[1,128], index: 1, kind: output, shape index: {}]  }
   0x1   :  { %v101_v0 = vld [vmem:[%s207_s0 + $0xf] sm:$0x1]   ;;  %v103_v1 = vld [vmem:[%s207_s0 + $0xd] sm:$0x1]   ;;  %v105_v2 = vld [vmem:[%s207_s0 + $0xb] sm:$0x1]  }
   0x2   :  { %7 = vrot.lane.b32.xlu0 %v101_v0, %s131_s10  ;;  %19 = vrot.lane.b32.xlu1 %v103_v1, %s132_s11  ;;  %s133_s14 = smov 88   ;;  %v102_v3 = vld [vmem:[%s207_s0 + $0xe] sm:$0x1]   ;;  %v104_v4 = vld [vmem:[%s207_s0 + $0xc] sm:$0x1]   ;;  %s134_s19 = smov 112  }
   0x3   :  { %31 = vrot.lane.b32.xlu2 %v105_v2, %s133_s14  ;;  %s135_s20 = smov 96   ;;  %v106_v5 = vld [vmem:[%s207_s0 + $0xa] sm:$0x1]   ;;  %s136_s23 = smov 80   ;;  %v107_v6 = vld [vmem:[%s207_s0 + $0x9] sm:$0x1]  }
   0x4   :  { %v108_v7 = vld [vmem:[%s207_s0 + $0x8] sm:$0x1]   ;;  %s137_s28 = smov 72   ;;  %s138_s29 = smov 64   ;;  %v109_v8 = vld [vmem:[%s207_s0 + $0x7] sm:$0x1]  }
   0x5   :  { %s139_s3 = smov 56   ;;  %v110_v9 = vld [vmem:[%s207_s0 + $0x6] sm:$0x1]   ;;  %v111_v10 = vld [vmem:[%s207_s0 + $0x5] sm:$0x1]   ;;  %s140_s8 = smov 48  }
   0x6   :  { %s141_s9 = smov 40   ;;  %v112_v11 = vld [vmem:[%s207_s0 + $0x4] sm:$0x1]   ;;  %s142_s12 = smov 32   ;;  %v113_v12 = vld [vmem:[%s207_s0 + $0x3] sm:$0x1]  }
   0x7   :  { %v114_v13 = vld [vmem:[%s207_s0 + $0x2] sm:$0x1]   ;;  %s143_s17 = smov 24   ;;  %s144_s18 = smov 16   ;;  %v115_v14 = vld [vmem:[%s207_s0 + $0x1] sm:$0x1]  }
   0x8   :  { %s145_s21 = smov 8   ;;  %v2_v15 = vld [vmem:[%s207_s0] sm:$0x1]   ;;  %vm27_vm4 = vcmask 851712   ;;  %vm33_vm5 = vcmask 786112   ;;  %vm39_vm6 = vcmask 720512  }
   0x9   :  { %4 = vst.msk [vmem:[#allocation0] sm:$0x1] %vm3_vm0, %v2_v15   ;;  %vm45_vm7 = vcmask 654912   ;;  %vm51_vm8 = vcmask 589312   ;;  %vm57_vm9 = vcmask 523712   ;;  %vm63_vm10 = vcmask 458112  }
   0xa   :  { %13 = vrot.lane.b32.xlu0 %v102_v3, %s134_s19  ;;  %25 = vrot.lane.b32.xlu1 %v104_v4, %s135_s20  ;;  %vm69_vm11 = vcmask 392512   ;;  %vm75_vm12 = vcmask 326912   ;;  %vm81_vm13 = vcmask 261312   ;;  %vm87_vm14 = vcmask 195712  }
   0xb   :  { %37 = vrot.lane.b32.xlu2 %v106_v5, %s136_s23  ;;  %vm93_vm15 = vcmask 130112  }
  0x12   :  { %43 = vrot.lane.b32.xlu0 %v107_v6, %s137_s28  ;;  %49 = vrot.lane.b32.xlu1 %v108_v7, %s138_s29 }
  0x13   :  { %55 = vrot.lane.b32.xlu2 %v109_v8, %s139_s3 }
  0x1a   :  { %61 = vrot.lane.b32.xlu0 %v110_v9, %s140_s8  ;;  %67 = vrot.lane.b32.xlu1 %v111_v10, %s141_s9 }
  0x1b   :  { %73 = vrot.lane.b32.xlu2 %v112_v11, %s142_s12 }
  0x22   :  { %79 = vrot.lane.b32.xlu0 %v113_v12, %s143_s17  ;;  %85 = vrot.lane.b32.xlu1 %v114_v13, %s144_s18 }
  0x23   :  { %91 = vrot.lane.b32.xlu2 %v115_v14, %s145_s21 }
  0x5d   :  { %v32_v16 = vpop.permute.xlu2 %31  }
  0x65   :  { %v38_v17 = vpop.permute.xlu2 %37  }
  0x6d   :  { %v56_v18 = vpop.permute.xlu2 %55  }
  0x74   :  { %v8_v19 = vpop.permute.xlu0 %7   ;;  %v20_v20 = vpop.permute.xlu1 %19  }
  0x75   :  { %10 = vst.msk [vmem:[#allocation0] sm:$0x1] %vm9_vm1, %v8_v19   ;;  %v74_v21 = vpop.permute.xlu2 %73  }
  0x7c   :  { %v14_v22 = vpop.permute.xlu0 %13   ;;  %v26_v23 = vpop.permute.xlu1 %25  }
  0x7d   :  { %16 = vst.msk [vmem:[#allocation0] sm:$0x1] %vm15_vm2, %v14_v22   ;;  %v92_v24 = vpop.permute.xlu2 %91  }
  0x7e   :  { %22 = vst.msk [vmem:[#allocation0] sm:$0x1] %vm21_vm3, %v20_v20  }
  0x7f   :  { %28 = vst.msk [vmem:[#allocation0] sm:$0x1] %vm27_vm4, %v26_v23  }
  0x80   :  { %34 = vst.msk [vmem:[#allocation0] sm:$0x1] %vm33_vm5, %v32_v16  }
  0x81   :  { %40 = vst.msk [vmem:[#allocation0] sm:$0x1] %vm39_vm6, %v38_v17  }
  0x84   :  { %v44_v25 = vpop.permute.xlu0 %43   ;;  %v50_v26 = vpop.permute.xlu1 %49  }
  0x85   :  { %46 = vst.msk [vmem:[#allocation0] sm:$0x1] %vm45_vm7, %v44_v25  }
  0x86   :  { %52 = vst.msk [vmem:[#allocation0] sm:$0x1] %vm51_vm8, %v50_v26  }
  0x87   :  { %58 = vst.msk [vmem:[#allocation0] sm:$0x1] %vm57_vm9, %v56_v18  }
  0x8c   :  { %v62_v27 = vpop.permute.xlu0 %61   ;;  %v68_v28 = vpop.permute.xlu1 %67  }
  0x8d   :  { %64 = vst.msk [vmem:[#allocation0] sm:$0x1] %vm63_vm10, %v62_v27  }
  0x8e   :  { %70 = vst.msk [vmem:[#allocation0] sm:$0x1] %vm69_vm11, %v68_v28  }
  0x8f   :  { %76 = vst.msk [vmem:[#allocation0] sm:$0x1] %vm75_vm12, %v74_v21  }
  0x94   :  { %v80_v29 = vpop.permute.xlu0 %79   ;;  %v86_v30 = vpop.permute.xlu1 %85  }
  0x95   :  { %82 = vst.msk [vmem:[#allocation0] sm:$0x1] %vm81_vm13, %v80_v29  }
  0x96   :  { %88 = vst.msk [vmem:[#allocation0] sm:$0x1] %vm87_vm14, %v86_v30  }
  0x97   :  { %94 = vst.msk [vmem:[#allocation0] sm:$0x1] %vm93_vm15, %v92_v24  }
  0x9e   :  { %v97_v31 = vld [vmem:[#allocation0] sm:$0x1] }
  0x9f   :  { %100 = vst [vmem:[%s208_s1] sm:$0x1] %v97_v31 }

// kernel: unet_blk_forward.1
= control target key start
LH: loop header
LB: loop body
LE: loop exit
PB: predicated region body
PF: predicated region fallthrough
CT: control target
= control target key end

     0   :  { %s4335_s24 = smov 0   ;;  %s7182_s0 = inlined_call_operand.vmem [shape: f32[8,16,128], index: 0, kind: input, shape index: {}]   ;;  %s7183_s1 = inlined_call_operand.vmem [shape: f32[3,128,128], index: 1, kind: input, shape index: {}]   ;;  %s7184_s2 = inlined_call_operand.vmem [shape: f32[3,128,128], index: 2, kind: input, shape index: {}]   ;;  %s7185_s3 = inlined_call_operand.vmem [shape: f32[1,128], index: 3, kind: input, shape index: {}]   ;;  %s7186_s4 = inlined_call_operand.vmem [shape: f32[1,128], index: 4, kind: input, shape index: {}]   ;;  %s7187_s5 = inlined_call_operand.vmem [shape: f32[1,128], index: 5, kind: input, shape index: {}]   ;;  %s7188_s6 = inlined_call_operand.vmem [shape: f32[1,128], index: 6, kind: input, shape index: {}]   ;;  %s7189_s7 = inlined_call_operand.vmem [shape: f32[8,16,128], index: 7, kind: output, shape index: {}]  }
   0x1 LB: > { %s4179_s25 = sadd.s32 4294967295, %s4292_s24   ;;  %p4183_p0 = scmp.ge.s32.totalorder %s4292_s24, 1  ;;  %s4292_s24 = sphi %s4335_s24, %s17_s24  }
   0x2   : > { %p239_p1 = scmp.lt.s32.totalorder %s4292_s24, 3 }
   0x4   : > { %p240_p2 = pnand %p4183_p0, %p239_p1 }
   0x6   : > { %243 = sbr.rel (%p240_p2) target bundleno = 994 (0x3e2), region = 48 }
   0xb   : > { %v4211_v0 = vld [vmem:[%s7183_s1 + $0xf8] sm:$0xff]  ;;  %v4210_v1 = vld [vmem:[%s7183_s1 + $0xf0] sm:$0xff]  ;;  %v4209_v2 = vld [vmem:[%s7183_s1 + $0xe8] sm:$0xff]  ;;  %s4352_s9 = sshll.u32 %s4179_s25, 2  ;;  %v7190_v23 = vmov 0.0  }
   0xc   : > { %v4354_v3 = vand.u32 4294901760, %v4211_v0  ;;  %v4356_v4 = vand.u32 4294901760, %v4210_v1  ;;  %v4358_v5 = vand.u32 4294901760, %v4209_v2  ;;  %v4208_v6 = vld [vmem:[%s7183_s1 + $0xe0] sm:$0xff]  ;;  %v4207_v7 = vld [vmem:[%s7183_s1 + $0xd8] sm:$0xff]  ;;  %v4206_v8 = vld [vmem:[%s7183_s1 + $0xd0] sm:$0xff] }
   0xd   : > { %v4369_v9 = vand.u32 4294901760, %v4208_v6  ;;  %v4371_v10 = vand.u32 4294901760, %v4207_v7  ;;  %v4373_v11 = vand.u32 4294901760, %v4206_v8  ;;  %v4205_v12 = vld [vmem:[%s7183_s1 + $0xc8] sm:$0xff]  ;;  %v4204_v13 = vld [vmem:[%s7183_s1 + $0xc0] sm:$0xff]  ;;  %v4203_v18 = vld [vmem:[%s7183_s1 + $0xb8] sm:$0xff] }
   0xe   : > { %366 = vmatpush.msra.mxu0 %v4354_v3  ;;  %v4383_v14 = vsub.f32 %v4211_v0, %v4354_v3  ;;  %v4386_v15 = vsub.f32 %v4210_v1, %v4356_v4  ;;  %698 = vmatpush.msra.mxu3 %v4354_v3  ;;  %v4390_v16 = vsub.f32 %v4209_v2, %v4358_v5  ;;  %v4392_v17 = vand.u32 4294901760, %v4205_v12  ;;  %p274_p3 = scmp.lt.s32.totalorder %s4352_s9, 7  ;;  %v4202_v30 = vld [vmem:[%s7183_s1 + $0xb0] sm:$0xff]  ;;  %v4201_v37 = vld [vmem:[%s7183_s1 + $0xa8] sm:$0xff]  ;;  %v4200_v46 = vld [vmem:[%s7183_s1 + $0xa0] sm:$0xff] }
   0xf   : > { %v4399_v19 = vsub.f32 %v4208_v6, %v4369_v9  ;;  %v4402_v20 = vsub.f32 %v4207_v7, %v4371_v10  ;;  %v4404_v21 = vand.u32 4294901760, %v4204_v13  ;;  %v4407_v22 = vsub.f32 %v4206_v8, %v4373_v11  ;;  %292 = vst [vmem:[#allocation2 + $0x11] sm:$0x1] %v7190_v23  ;;  %v4199_v53 = vld [vmem:[%s7183_s1 + $0x98] sm:$0xff]  ;;  %v4198_v59 = vld [vmem:[%s7183_s1 + $0x90] sm:$0xff]  ;;  %v4197_v1 = vld [vmem:[%s7183_s1 + $0x88] sm:$0xff] }
  0x10   : > { %368 = vmatpush.msra.mxu0 %v4356_v4  ;;  %605 = vmatpush.msra.mxu2 %v4383_v14  ;;  %v472_v24 = vand.u32 4294901760, %v4383_v14  ;;  %v478_v25 = vand.u32 4294901760, %v4386_v15  ;;  %v484_v26 = vand.u32 4294901760, %v4390_v16  ;;  %s7483_s9 = smov (!%p274_p3, %s4352_s9), 7  ;;  %v4420_v28 = vand.u32 4294901760, %v4203_v18 }
  0x11   : > { %700 = vmatpush.msra.mxu3 %v4356_v4  ;;  %v490_v27 = vand.u32 4294901760, %v4399_v19  ;;  %v4423_v29 = vsub.f32 %v4205_v12, %v4392_v17  ;;  %293 = vst [vmem:[#allocation2 + $0x12] sm:$0x1] %v7190_v23  ;;  %v496_v34 = vand.u32 4294901760, %v4402_v20  ;;  %s4271_s25 = sshll.u32 %s7483_s9, 4  ;;  %v502_v35 = vand.u32 4294901760, %v4407_v22 }
  0x12   : > { %370 = vmatpush.msra.mxu0 %v4358_v5  ;;  %608 = vmatpush.msra.mxu2 %v4386_v15  ;;  %v473_v31 = vsub.f32 %v4383_v14, %v472_v24  ;;  %v479_v32 = vsub.f32 %v4386_v15, %v478_v25  ;;  %v485_v33 = vsub.f32 %v4390_v16, %v484_v26  ;;  %s4455_s30 = scalar_lea.vmem %s7182_s0, %s4271_s25  ;;  %v4463_v41 = vand.u32 4294901760, %v4202_v30  ;;  %v337_v14 = vld [vmem:[%s7183_s1 + $0x70] sm:$0xff]  ;;  %s7138_s8 = scalar_lea.vmem %s7189_s7, %s4271_s25 }
  0x13   : > { %702 = vmatpush.msra.mxu3 %v4358_v5  ;;  %v4445_v36 = vsub.f32 %v4204_v13, %v4404_v21  ;;  %287 = vst [vmem:[#allocation2] sm:$0x1] %v7190_v23  ;;  %v491_v40 = vsub.f32 %v4399_v19, %v490_v27  ;;  %v4466_v42 = vld [vmem:[%s4455_s30] sm:$0xff]  ;;  %v4190_v43 = vld [vmem:[%s4455_s30 + $0x10] sm:$0xff]  ;;  %v508_v44 = vand.u32 4294901760, %v4423_v29  ;;  %v4472_v45 = vsub.f32 %v4203_v18, %v4420_v28  ;;  %v4479_v47 = vld [vmem:[%s4455_s30 + $0x8] sm:$0xff] }
  0x14   : > { %372 = vmatpush.msra.mxu0 %v4369_v9  ;;  %v474_v38 = vand.u32 4294901760, %v473_v31  ;;  %611 = vmatpush.msra.mxu2 %v4390_v16  ;;  %v480_v39 = vand.u32 4294901760, %v479_v32  ;;  %290 = vst [vmem:[#allocation2 + $0x1] sm:$0xff] %v4466_v42  ;;  %v486_v48 = vand.u32 4294901760, %v485_v33  ;;  %v497_v49 = vsub.f32 %v4402_v20, %v496_v34  ;;  %v4191_v12 = vld [vmem:[%s4455_s30 + $0x18] sm:$0xff]  ;;  %v4192_v31 = vld [vmem:[%s4455_s30 + $0x20] sm:$0xff] }
  0x15   : > { %704 = vmatpush.msra.mxu3 %v4369_v9  ;;  %v4485_v50 = vand.u32 4294901760, %v4201_v37  ;;  %291 = vst [vmem:[#allocation2 + $0x9] sm:$0xff] %v4479_v47  ;;  %v503_v51 = vsub.f32 %v4407_v22, %v502_v35  ;;  %v514_v52 = vand.u32 4294901760, %v4445_v36  ;;  %v492_v54 = vand.u32 4294901760, %v491_v40 }
  0x16   : > { %374 = vmatpush.msra.mxu0 %v4371_v10  ;;  %475 = vmatpush.msra.mxu1 %v474_v38  ;;  %297 = vst [vmem:[#allocation2 + $0x13] sm:$0xff] %v4190_v43  ;;  %v4498_v55 = vand.u32 4294901760, %v4200_v46  ;;  %v4501_v56 = vsub.f32 %v4202_v30, %v4463_v41  ;;  %v509_v57 = vsub.f32 %v4423_v29, %v508_v44  ;;  %v520_v58 = vand.u32 4294901760, %v4472_v45  ;;  %v4196_v30 = vld [vmem:[%s7183_s1 + $0x80] sm:$0xff] }
  0x17   : > { %614 = vmatpush.msra.mxu2 %v4399_v19  ;;  %706 = vmatpush.msra.mxu3 %v4371_v10  ;;  %299 = vst [vmem:[#allocation2 + $0x23] sm:$0x1] %v7190_v23  ;;  %v498_v60 = vand.u32 4294901760, %v497_v49  ;;  %v4515_v61 = vand.u32 4294901760, %v4199_v53  ;;  %v4518_v62 = vsub.f32 %v4201_v37, %v4485_v50  ;;  %v504_v63 = vand.u32 4294901760, %v503_v51 }
  0x18   : > { %376 = vmatpush.msra.mxu0 %v4373_v11  ;;  %481 = vmatpush.msra.mxu1 %v480_v39  ;;  %300 = vst [vmem:[#allocation2 + $0x24] sm:$0x1] %v7190_v23  ;;  %v515_v0 = vsub.f32 %v4445_v36, %v514_v52  ;;  %v4531_v2 = vand.u32 4294901760, %v4198_v59  ;;  %v526_v6 = vand.u32 4294901760, %v4501_v56  ;;  %v4535_v7 = vsub.f32 %v4200_v46, %v4498_v55 }
  0x19   : > { %617 = vmatpush.msra.mxu2 %v4402_v20  ;;  %708 = vmatpush.msra.mxu3 %v4373_v11  ;;  %306 = vst [vmem:[#allocation2 + $0x35] sm:$0x1] %v7190_v23  ;;  %v4538_v8 = vand.u32 4294901760, %v4466_v42  ;;  %v510_v13 = vand.u32 4294901760, %v509_v57  ;;  %v521_v18 = vsub.f32 %v4472_v45, %v520_v58  ;;  %v4553_v32 = vand.u32 4294901760, %v4197_v1 }
  0x1a   : > { %378 = vmatpush.msra.mxu0 %v4392_v17  ;;  %487 = vmatpush.msra.mxu1 %v486_v48  ;;  %307 = vst [vmem:[#allocation2 + $0x36] sm:$0x1] %v7190_v23  ;;  %v532_v33 = vand.u32 4294901760, %v4518_v62  ;;  %v4557_v37 = vsub.f32 %v4199_v53, %v4515_v61  ;;  %v516_v39 = vand.u32 4294901760, %v515_v0  ;;  %v527_v40 = vsub.f32 %v4501_v56, %v526_v6 }
  0x1b   : > { %620 = vmatpush.msra.mxu2 %v4407_v22  ;;  %710 = vmatpush.msra.mxu3 %v4392_v17  ;;  %313 = vst [vmem:[#allocation2 + $0x47] sm:$0x1] %v7190_v23  ;;  %v4561_v38 = vsub.f32 %v4466_v42, %v4538_v8  ;;  %v4570_v43 = vand.u32 4294901760, %v4196_v30  ;;  %v538_v42 = vand.u32 4294901760, %v4535_v7  ;;  %v4574_v46 = vsub.f32 %v4198_v59, %v4531_v2  ;;  %v4193_v59 = vld [vmem:[%s4455_s30 + $0x28] sm:$0xff] }
  0x1c   : > { %380 = vmatpush.msra.mxu0 %v4404_v21  ;;  %493 = vmatpush.msra.mxu1 %v492_v54  ;;  %2211 = vst [vmem:[#allocation3] sm:$0x1] %v7190_v23  ;;  %v4580_v49 = vand.u32 4294901760, %v4479_v47  ;;  %v522_v51 = vand.u32 4294901760, %v521_v18  ;;  %v533_v53 = vsub.f32 %v4518_v62, %v532_v33  ;;  %v7193_v54 = vand.u32 4294901760, %v4557_v37 }
  0x1d   : > { %623 = vmatpush.msra.mxu2 %v4423_v29  ;;  %712 = vmatpush.msra.mxu3 %v4404_v21  ;;  %2218 = vst [vmem:[#allocation3 + $0x47] sm:$0x1] %v7190_v23  ;;  %v399_v48 = vand.u32 4294901760, %v4561_v38  ;;  %v4588_v57 = vsub.f32 %v4197_v1, %v4553_v32  ;;  %v7192_v0 = vand.u32 4294901760, %v4574_v46 }
  0x1e   : > { %382 = vmatpush.msra.mxu0 %v4420_v28  ;;  %499 = vmatpush.msra.mxu1 %v498_v60  ;;  %298 = vst [vmem:[#allocation2 + $0x1b] sm:$0xff] %v4191_v12  ;;  %v528_v60 = vand.u32 4294901760, %v527_v40  ;;  %v4599_v12 = vsub.f32 %v4196_v30, %v4570_v43  ;;  %v534_v18 = vand.u32 4294901760, %v533_v53 }
  0x1f   : > { %626 = vmatpush.msra.mxu2 %v4445_v36  ;;  %714 = vmatpush.msra.mxu3 %v4420_v28  ;;  %304 = vst [vmem:[#allocation2 + $0x25] sm:$0xff] %v4192_v31  ;;  %v400_v1 = vsub.f32 %v4561_v38, %v399_v48  ;;  %v545_v31 = vsub.f32 %v4557_v37, %v7193_v54  ;;  %v7194_v30 = vand.u32 4294901760, %v4588_v57 }
  0x20   : > { %384 = vmatpush.msra.mxu0 %v4463_v41  ;;  %505 = vmatpush.msra.mxu1 %v504_v63  ;;  %305 = vst [vmem:[#allocation2 + $0x2d] sm:$0xff] %v4193_v59  ;;  %v539_v63 = vsub.f32 %v4535_v7, %v538_v42  ;;  %v551_v40 = vsub.f32 %v4574_v46, %v7192_v0  ;;  %v4194_v0 = vld [vmem:[%s4455_s30 + $0x30] sm:$0xff] }
  0x21   : > { %629 = vmatpush.msra.mxu2 %v4472_v45  ;;  %716 = vmatpush.msra.mxu3 %v4463_v41  ;;  %v401_v53 = vand.u32 4294901760, %v400_v1  ;;  %311 = vst [vmem:[#allocation2 + $0x37] sm:$0xff] %v4194_v0 }
  0x22   : > { %386 = vmatpush.msra.mxu0 %v4485_v50  ;;  %511 = vmatpush.msra.mxu1 %v510_v13  ;;  %v4606_v13 = vsub.f32 %v4479_v47, %v4580_v49  ;;  %v540_v47 = vand.u32 4294901760, %v539_v63  ;;  %v557_v63 = vsub.f32 %v4588_v57, %v7194_v30  ;;  %v552_v1 = vand.u32 4294901760, %v551_v40 }
  0x23   : > { %632 = vmatpush.msra.mxu2 %v4501_v56  ;;  %718 = vmatpush.msra.mxu3 %v4485_v50 }
  0x24   : > { %388 = vmatpush.msra.mxu0 %v4498_v55  ;;  %517 = vmatpush.msra.mxu1 %v516_v39  ;;  %v341_v39 = vld [vmem:[#allocation2 + $0x11] sm:$0xff]  ;;  %v407_v59 = vand.u32 4294901760, %v4606_v13  ;;  %v558_v30 = vand.u32 4294901760, %v557_v63 }
  0x25   : > { %635 = vmatpush.msra.mxu2 %v4518_v62  ;;  %720 = vmatpush.msra.mxu3 %v4498_v55  ;;  %v4623_v23 = vand.u32 4294901760, %v341_v39  ;;  %v342_v0 = vld [vmem:[#allocation2 + $0x19] sm:$0xff]  ;;  %v325_v62 = vld [vmem:[%s7183_s1 + $0x10] sm:$0xff] }
  0x26   : > { %390 = vmatpush.msra.mxu0 %v4515_v61  ;;  %523 = vmatpush.msra.mxu1 %v522_v51  ;;  %v7201_v51 = vand.u32 4294901760, %v4599_v12 }
  0x27   : > { %638 = vmatpush.msra.mxu2 %v4535_v7  ;;  %722 = vmatpush.msra.mxu3 %v4515_v61 }
  0x28   : > { %392 = vmatpush.msra.mxu0 %v4531_v2  ;;  %529 = vmatpush.msra.mxu1 %v528_v60  ;;  %v546_v60 = vand.u32 4294901760, %v545_v31  ;;  %v563_v54 = vsub.f32 %v4599_v12, %v7201_v51  ;;  %v4639_v31 = vsub.f32 %v341_v39, %v4623_v23 }
  0x29   : > { %641 = vmatpush.msra.mxu2 %v4557_v37  ;;  %724 = vmatpush.msra.mxu3 %v4531_v2 }
  0x2a   : > { %394 = vmatpush.msra.mxu0 %v4553_v32  ;;  %535 = vmatpush.msra.mxu1 %v534_v18  ;;  %v408_v18 = vsub.f32 %v4606_v13, %v407_v59  ;;  %v415_v39 = vand.u32 4294901760, %v4639_v31 }
  0x2b   : > { %644 = vmatpush.msra.mxu2 %v4574_v46  ;;  %726 = vmatpush.msra.mxu3 %v4553_v32 }
  0x2c   : > { %396 = vmatpush.msra.mxu0 %v4570_v43  ;;  %541 = vmatpush.msra.mxu1 %v540_v47  ;;  %v564_v47 = vand.u32 4294901760, %v563_v54  ;;  %v409_v40 = vand.u32 4294901760, %v408_v18  ;;  %v416_v15 = vsub.f32 %v4639_v31, %v415_v39  ;;  %v336_v54 = vld [vmem:[%s7183_s1 + $0x68] sm:$0xff] }
  0x2d   : > { %402 = vmatmul.f32.vlgmr.msra.gmra.mxu0 %v401_v53  ;;  %647 = vmatpush.msra.mxu2 %v4588_v57  ;;  %v4647_v53 = vand.u32 4294901760, %v342_v0  ;;  %v4680_v18 = vand.u32 4294901760, %v336_v54 }
  0x2e   : > { %547 = vmatpush.msra.mxu1 %v546_v60  ;;  %728 = vmatpush.msra.mxu3 %v4570_v43  ;;  %v338_v60 = vld [vmem:[%s7183_s1 + $0x78] sm:$0xff] }
  0x2f   : > { %650 = vmatpush.msra.mxu2 %v4599_v12  ;;  %732 = vmatmul.f32.vlgmr.msra.gmra.mxu3 %v399_v48  ;;  %v4652_v63 = vand.u32 4294901760, %v338_v60  ;;  %v4195_v48 = vld [vmem:[%s4455_s30 + $0x38] sm:$0xff] }
  0x30   : > { %553 = vmatpush.msra.mxu1 %v552_v1  ;;  %653 = vmatmul.f32.vlgmr.msra.gmra.mxu2 %v4561_v38  ;;  %312 = vst [vmem:[#allocation2 + $0x3f] sm:$0xff] %v4195_v48 }
  0x31   : > { %787 = vmatpush.msrb.mxu0 %v472_v24  ;;  %955 = vmatpush.msrb.mxu2 %v4652_v63  ;;  %v4661_v24 = vand.u32 4294901760, %v337_v14  ;;  %v4664_v38 = vsub.f32 %v338_v60, %v4652_v63 }
  0x32   : > { %559 = vmatpush.msra.mxu1 %v558_v30  ;;  %v343_v30 = vld [vmem:[#allocation2 + $0x21] sm:$0xff] }
  0x33   : > { %791 = vmatpush.msrb.mxu0 %v478_v25  ;;  %v4671_v25 = vsub.f32 %v342_v0, %v4647_v53  ;;  %v7199_v1 = vand.u32 4294901760, %v4664_v38  ;;  %957 = vmatpush.msrb.mxu2 %v4661_v24  ;;  %v335_v0 = vld [vmem:[%s7183_s1 + $0x60] sm:$0xff] }
  0x34   : > { %565 = vmatpush.msra.mxu1 %v564_v47  ;;  %v4683_v47 = vsub.f32 %v337_v14, %v4661_v24 }
  0x35   : > { %410 = vmatmul.f32.gmra.mxu0 %v409_v40  ;;  %567 = vmatmul.f32.vlgmr.msra.gmra.mxu1 %v4538_v8  ;;  %v417_v40 = vand.u32 4294901760, %v416_v15  ;;  %v423_v60 = vand.u32 4294901760, %v4671_v25 }
  0x36   : > { %886 = vmatpush.msrb.mxu1 %v4354_v3  ;;  %795 = vmatpush.msrb.mxu0 %v484_v26  ;;  %v1062_v3 = vsub.f32 %v4664_v38, %v7199_v1  ;;  %v7196_v16 = vand.u32 4294901760, %v4683_v47  ;;  %v4695_v26 = vand.u32 4294901760, %v335_v0 }
  0x37   : > { %738 = vmatmul.f32.gmra.mxu3 %v407_v59  ;;  %v4698_v59 = vsub.f32 %v336_v54, %v4680_v18  ;;  %959 = vmatpush.msrb.mxu2 %v4680_v18 }
  0x38   : > { %658 = vmatmul.f32.gmra.mxu2 %v4606_v13  ;;  %888 = vmatpush.msrb.mxu1 %v4356_v4  ;;  %v4703_v13 = vand.u32 4294901760, %v343_v30  ;;  %v334_v4 = vld [vmem:[%s7183_s1 + $0x58] sm:$0xff]  ;;  %v1063_v48 = vand.u32 4294901760, %v1062_v3  ;;  %v1068_v14 = vsub.f32 %v4683_v47, %v7196_v16  ;;  %v4720_v15 = vsub.f32 %v335_v0, %v4695_v26 }
  0x39   : > { %799 = vmatpush.msrb.mxu0 %v490_v27  ;;  %v7195_v19 = vand.u32 4294901760, %v4698_v59  ;;  %v4714_v27 = vand.u32 4294901760, %v334_v4  ;;  %961 = vmatpush.msrb.mxu2 %v4695_v26 }
  0x3a   : > { %890 = vmatpush.msrb.mxu1 %v4358_v5  ;;  %v333_v5 = vld [vmem:[%s7183_s1 + $0x50] sm:$0xff]  ;;  %1064 = vmatpush.msrb.mxu3 %v1063_v48  ;;  %v4739_v0 = vsub.f32 %v343_v30, %v4703_v13  ;;  %v7198_v48 = vand.u32 4294901760, %v4720_v15 }
  0x3b   : > { %803 = vmatpush.msrb.mxu0 %v496_v34  ;;  %v1074_v54 = vsub.f32 %v4698_v59, %v7195_v19  ;;  %v4729_v3 = vand.u32 4294901760, %v333_v5  ;;  %v4732_v20 = vsub.f32 %v334_v4, %v4714_v27  ;;  %v424_v34 = vsub.f32 %v4671_v25, %v423_v60  ;;  %v332_v19 = vld [vmem:[%s7183_s1 + $0x48] sm:$0xff]  ;;  %963 = vmatpush.msrb.mxu2 %v4714_v27 }
  0x3c   : > { %892 = vmatpush.msrb.mxu1 %v4369_v9  ;;  %v1069_v9 = vand.u32 4294901760, %v1068_v14  ;;  %v4748_v4 = vand.u32 4294901760, %v332_v19 }
  0x3d   : > { %418 = vmatmul.f32.gmra.mxu0 %v417_v40  ;;  %571 = vmatmul.f32.gmra.mxu1 %v4580_v49  ;;  %v344_v40 = vld [vmem:[#allocation2 + $0x29] sm:$0xff]  ;;  %v4751_v16 = vsub.f32 %v333_v5, %v4729_v3  ;;  %v1075_v30 = vand.u32 4294901760, %v1074_v54  ;;  %v7197_v14 = vand.u32 4294901760, %v4732_v20  ;;  %v425_v5 = vand.u32 4294901760, %v424_v34 }
  0x3e   : > { %894 = vmatpush.msrb.mxu1 %v4371_v10  ;;  %807 = vmatpush.msrb.mxu0 %v502_v35  ;;  %v331_v10 = vld [vmem:[%s7183_s1 + $0x40] sm:$0xff]  ;;  %v4765_v35 = vsub.f32 %v332_v19, %v4748_v4  ;;  %v4770_v54 = vand.u32 4294901760, %v344_v40 }
  0x3f   : > { %744 = vmatmul.f32.gmra.mxu3 %v415_v39  ;;  %v4762_v22 = vand.u32 4294901760, %v331_v10  ;;  %v431_v39 = vand.u32 4294901760, %v4739_v0  ;;  %965 = vmatpush.msrb.mxu2 %v4729_v3  ;;  %v7200_v19 = vand.u32 4294901760, %v4751_v16  ;;  %v1086_v29 = vsub.f32 %v4732_v20, %v7197_v14 }
  0x40   : > { %663 = vmatmul.f32.gmra.mxu2 %v4639_v31  ;;  %896 = vmatpush.msrb.mxu1 %v4373_v11  ;;  %v1080_v31 = vsub.f32 %v4720_v15, %v7198_v48  ;;  %v330_v11 = vld [vmem:[%s7183_s1 + $0x38] sm:$0xff]  ;;  %v328_v48 = vld [vmem:[%s7183_s1 + $0x28] sm:$0xff] }
  0x41   : > { %811 = vmatpush.msrb.mxu0 %v508_v44  ;;  %1070 = vmatpush.msrb.mxu3 %v1069_v9  ;;  %v4781_v34 = vand.u32 4294901760, %v330_v11  ;;  %v4789_v44 = vsub.f32 %v331_v10, %v4762_v22  ;;  %v7205_v9 = vand.u32 4294901760, %v4765_v35  ;;  %v4807_v10 = vsub.f32 %v344_v40, %v4770_v54 }
  0x42   : > { %898 = vmatpush.msrb.mxu1 %v4392_v17  ;;  %v329_v17 = vld [vmem:[%s7183_s1 + $0x30] sm:$0xff]  ;;  %967 = vmatpush.msrb.mxu2 %v4748_v4  ;;  %v4819_v1 = vand.u32 4294901760, %v328_v48 }
  0x43   : > { %815 = vmatpush.msrb.mxu0 %v514_v52  ;;  %1076 = vmatpush.msrb.mxu3 %v1075_v30  ;;  %v4797_v36 = vand.u32 4294901760, %v329_v17  ;;  %v4800_v52 = vsub.f32 %v330_v11, %v4781_v34  ;;  %v432_v30 = vsub.f32 %v4739_v0, %v431_v39  ;;  %v7203_v14 = vand.u32 4294901760, %v4789_v44 }
  0x44   : > { %900 = vmatpush.msrb.mxu1 %v4404_v21  ;;  %v1081_v21 = vand.u32 4294901760, %v1080_v31  ;;  %v1092_v11 = vsub.f32 %v4751_v16, %v7200_v19  ;;  %v1087_v31 = vand.u32 4294901760, %v1086_v29  ;;  %969 = vmatpush.msrb.mxu2 %v4762_v22  ;;  %v439_v19 = vand.u32 4294901760, %v4807_v10 }
  0x45   : > { %426 = vmatmul.f32.gmra.mxu0 %v425_v5  ;;  %575 = vmatmul.f32.gmra.mxu1 %v4623_v23  ;;  %v345_v5 = vld [vmem:[#allocation2 + $0x31] sm:$0xff]  ;;  %v4822_v40 = vsub.f32 %v329_v17, %v4797_v36  ;;  %v7202_v45 = vand.u32 4294901760, %v4800_v52  ;;  %v433_v29 = vand.u32 4294901760, %v432_v30  ;;  %v1104_v56 = vsub.f32 %v4789_v44, %v7203_v14 }
  0x46   : > { %819 = vmatpush.msrb.mxu0 %v520_v58  ;;  %902 = vmatpush.msrb.mxu1 %v4420_v28  ;;  %v327_v28 = vld [vmem:[%s7183_s1 + $0x20] sm:$0xff]  ;;  %v1098_v58 = vsub.f32 %v4765_v35, %v7205_v9  ;;  %v4843_v51 = vand.u32 4294901760, %v345_v5 }
  0x47   : > { %750 = vmatmul.f32.gmra.mxu3 %v423_v60  ;;  %v4837_v17 = vand.u32 4294901760, %v327_v28  ;;  %v4840_v60 = vsub.f32 %v328_v48, %v4819_v1  ;;  %971 = vmatpush.msrb.mxu2 %v4781_v34  ;;  %v7204_v48 = vand.u32 4294901760, %v4822_v40 }
  0x48   : > { %668 = vmatmul.f32.gmra.mxu2 %v4671_v25  ;;  %823 = vmatpush.msrb.mxu0 %v526_v6  ;;  %v326_v6 = vld [vmem:[%s7183_s1 + $0x18] sm:$0xff]  ;;  %v1093_v25 = vand.u32 4294901760, %v1092_v11  ;;  %v4872_v11 = vand.u32 4294901760, %v325_v62  ;;  %v4882_v7 = vsub.f32 %v345_v5, %v4843_v51 }
  0x49   : > { %904 = vmatpush.msrb.mxu1 %v4463_v41  ;;  %1082 = vmatpush.msrb.mxu3 %v1081_v21  ;;  %v4856_v30 = vand.u32 4294901760, %v326_v6  ;;  %v1110_v41 = vsub.f32 %v4800_v52, %v7202_v45  ;;  %v4863_v21 = vsub.f32 %v327_v28, %v4837_v17  ;;  %v440_v28 = vsub.f32 %v4807_v10, %v439_v19  ;;  %v346_v45 = vld [vmem:[#allocation2 + $0x39] sm:$0xff] }
  0x4a   : > { %827 = vmatpush.msrb.mxu0 %v532_v33  ;;  %v1099_v33 = vand.u32 4294901760, %v1098_v58  ;;  %973 = vmatpush.msrb.mxu2 %v4797_v36  ;;  %v324_v58 = vld [vmem:[%s7183_s1 + $0x8] sm:$0xff]  ;;  %v4895_v5 = vsub.f32 %v325_v62, %v4872_v11 }
  0x4b   : > { %906 = vmatpush.msrb.mxu1 %v4485_v50  ;;  %1088 = vmatpush.msrb.mxu3 %v1087_v31  ;;  %v7206_v50 = vand.u32 4294901760, %v4840_v60  ;;  %v4875_v31 = vsub.f32 %v326_v6, %v4856_v30  ;;  %v1127_v6 = vand.u32 4294901760, %v4863_v21  ;;  %v4892_v14 = vand.u32 4294901760, %v324_v58 }
  0x4c   : > { %831 = vmatpush.msrb.mxu0 %v538_v42  ;;  %v1105_v42 = vand.u32 4294901760, %v1104_v56  ;;  %v7270_v56 = vand.u32 4294901760, %v4557_v37  ;;  %v441_v37 = vand.u32 4294901760, %v440_v28  ;;  %975 = vmatpush.msrb.mxu2 %v4819_v1 }
  0x4d   : > { %434 = vmatmul.f32.gmra.mxu0 %v433_v29  ;;  %579 = vmatmul.f32.gmra.mxu1 %v4647_v53  ;;  %v1116_v29 = vsub.f32 %v4822_v40, %v7204_v48  ;;  %v1122_v48 = vsub.f32 %v4840_v60, %v7206_v50  ;;  %v7207_v62 = vand.u32 4294901760, %v4875_v31  ;;  %v1128_v50 = vsub.f32 %v4863_v21, %v1127_v6 }
  0x4e   : > { %1094 = vmatpush.msrb.mxu3 %v1093_v25  ;;  %908 = vmatpush.msrb.mxu1 %v4498_v55  ;;  %v1111_v25 = vand.u32 4294901760, %v1110_v41  ;;  %v323_v55 = vld [vmem:[%s7183_s1] sm:$0xff]  ;;  %v447_v41 = vand.u32 4294901760, %v4882_v7 }
  0x4f   : > { %756 = vmatmul.f32.gmra.mxu3 %v431_v39  ;;  %835 = vmatpush.msrb.mxu0 %v7270_v56  ;;  %v4909_v9 = vand.u32 4294901760, %v323_v55  ;;  %v4912_v39 = vsub.f32 %v324_v58, %v4892_v14  ;;  %v4915_v56 = vand.u32 4294901760, %v346_v45  ;;  %v1139_v58 = vand.u32 4294901760, %v4895_v5 }
  0x50   : > { %673 = vmatmul.f32.gmra.mxu2 %v4739_v0  ;;  %1100 = vmatpush.msrb.mxu3 %v1099_v33  ;;  %v7271_v0 = vand.u32 4294901760, %v4574_v46  ;;  %v1117_v33 = vand.u32 4294901760, %v1116_v29  ;;  %v1123_v46 = vand.u32 4294901760, %v1122_v48 }
  0x51   : > { %910 = vmatpush.msrb.mxu1 %v4515_v61  ;;  %v4926_v28 = vsub.f32 %v323_v55, %v4909_v9  ;;  %v7272_v61 = vand.u32 4294901760, %v4588_v57  ;;  %977 = vmatpush.msrb.mxu2 %v4837_v17  ;;  %v1145_v29 = vand.u32 4294901760, %v4912_v39  ;;  %v448_v55 = vsub.f32 %v4882_v7, %v447_v41 }
  0x52   : > { %839 = vmatpush.msrb.mxu0 %v7271_v0  ;;  %1106 = vmatpush.msrb.mxu3 %v1105_v42  ;;  %v1134_v42 = vsub.f32 %v4875_v31, %v7207_v62  ;;  %v347_v0 = vld [vmem:[#allocation2 + $0x41] sm:$0x3f]  ;;  %v1129_v57 = vand.u32 4294901760, %v1128_v50  ;;  %v1140_v48 = vsub.f32 %v4895_v5, %v1139_v58 }
  0x53   : > { %912 = vmatpush.msrb.mxu1 %v4531_v2  ;;  %v454_v2 = vsub.f32 %v346_v45, %v4915_v56  ;;  %979 = vmatpush.msrb.mxu2 %v4856_v30  ;;  %v1146_v50 = vsub.f32 %v4912_v39, %v1145_v29  ;;  %v4952_v62 = vand.u32 4294901760, %v347_v0 }
  0x54   : > { %843 = vmatpush.msrb.mxu0 %v7272_v61  ;;  %1112 = vmatpush.msrb.mxu3 %v1111_v25  ;;  %v1151_v25 = vand.u32 4294901760, %v4926_v28  ;;  %v1135_v45 = vand.u32 4294901760, %v1134_v42 }
  0x55   : > { %442 = vmatmul.f32.gmra.mxu0 %v441_v37  ;;  %583 = vmatmul.f32.gmra.mxu1 %v4703_v13  ;;  %v7273_v37 = vand.u32 4294901760, %v4599_v12  ;;  %v455_v61 = vand.u32 4294901760, %v454_v2 }
  0x56   : > { %1118 = vmatpush.msrb.mxu3 %v1117_v33  ;;  %v449_v33 = vand.u32 4294901760, %v448_v55  ;;  %914 = vmatpush.msrb.mxu1 %v4553_v32  ;;  %v1152_v12 = vsub.f32 %v4926_v28, %v1151_v25 }
  0x57   : > { %762 = vmatmul.f32.gmra.mxu3 %v439_v19  ;;  %847 = vmatpush.msrb.mxu0 %v7273_v37  ;;  %v1141_v19 = vand.u32 4294901760, %v1140_v48  ;;  %v456_v32 = vsub.f32 %v454_v2, %v455_v61 }
  0x58   : > { %678 = vmatmul.f32.gmra.mxu2 %v4807_v10  ;;  %1124 = vmatpush.msrb.mxu3 %v1123_v46  ;;  %v1147_v10 = vand.u32 4294901760, %v1146_v50  ;;  %v462_v46 = vsub.f32 %v347_v0, %v4952_v62  ;;  %v1153_v42 = vand.u32 4294901760, %v1152_v12  ;;  %v7274_v0 = vand.u32 4294901760, %v4664_v38 }
  0x59   : > { %981 = vmatpush.msrb.mxu2 %v4872_v11  ;;  %1194 = vmatpush.msra.mxu0 %v4664_v38  ;;  %v7276_v38 = vand.u32 4294901760, %v4698_v59  ;;  %v7278_v50 = vand.u32 4294901760, %v4732_v20  ;;  %v7281_v12 = vand.u32 4294901760, %v4789_v44 }
  0x5a   : > { %1130 = vmatpush.msrb.mxu3 %v1129_v57  ;;  %916 = vmatpush.msrb.mxu1 %v4570_v43  ;;  %v457_v43 = vand.u32 4294901760, %v456_v32  ;;  %v463_v55 = vand.u32 4294901760, %v462_v46  ;;  %v314_v57 = vld [vmem:[#allocation2] sm:$0xff] }
  0x5b   : > { %983 = vmatpush.msrb.mxu2 %v4892_v14  ;;  %1197 = vmatpush.msra.mxu0 %v4683_v47 }
  0x5c   : > { %1136 = vmatpush.msrb.mxu3 %v1135_v45  ;;  %1287 = vmatpush.msra.mxu1 %v4652_v63  ;;  %v464_v48 = vsub.f32 %v462_v46, %v463_v55  ;;  %v7277_v45 = vand.u32 4294901760, %v4720_v15 }
  0x5d   : > { %450 = vmatmul.f32.gmra.mxu0 %v449_v33  ;;  %587 = vmatmul.f32.gmra.mxu1 %v4770_v54 }
  0x5e   : > { %1142 = vmatpush.msrb.mxu3 %v1141_v19  ;;  %985 = vmatpush.msrb.mxu2 %v4909_v9 }
  0x5f   : > { %768 = vmatmul.f32.gmra.mxu3 %v447_v41  ;;  %1289 = vmatpush.msra.mxu1 %v4661_v24  ;;  %v4974_v41 = vand.u32 4294901760, %v314_v57 }
  0x60   : > { %683 = vmatmul.f32.gmra.mxu2 %v4882_v7  ;;  %1148 = vmatpush.msrb.mxu3 %v1147_v10  ;;  %v7275_v7 = vand.u32 4294901760, %v4683_v47  ;;  %v465_v47 = vand.u32 4294901760, %v464_v48 }
  0x61   : > { %1200 = vmatpush.msra.mxu0 %v4698_v59  ;;  %1376 = vmatpush.msra.mxu2 %v7274_v0  ;;  %v4985_v37 = vsub.f32 %v314_v57, %v4974_v41  ;;  %v4227_v57 = vld [vmem:[%s7183_s1 + $0x178] sm:$0xff] }
  0x62   : > { %1154 = vmatpush.msrb.mxu3 %v1153_v42  ;;  %1291 = vmatpush.msra.mxu1 %v4680_v18 }
  0x63   : > { %1203 = vmatpush.msra.mxu0 %v4720_v15  ;;  %1380 = vmatpush.msra.mxu2 %v7275_v7  ;;  %v988_v59 = vand.u32 4294901760, %v4985_v37 }
  0x64   : > { %1475 = vmatpush.msra.mxu3 %v4652_v63  ;;  %1293 = vmatpush.msra.mxu1 %v4695_v26  ;;  %v315_v63 = vld [vmem:[#allocation2 + $0x8] sm:$0xff] }
  0x65   : > { %458 = vmatmul.f32.gmra.mxu0 %v457_v43  ;;  %591 = vmatmul.f32.gmra.mxu1 %v4843_v51 }
  0x66   : > { %1206 = vmatpush.msra.mxu0 %v4732_v20  ;;  %1384 = vmatpush.msra.mxu2 %v7276_v38  ;;  %v316_v20 = vld [vmem:[#allocation2 + $0x10] sm:$0xff] }
  0x67   : > { %774 = vmatmul.f32.gmra.mxu3 %v455_v61  ;;  %1295 = vmatpush.msra.mxu1 %v4714_v27  ;;  %v5021_v19 = vand.u32 4294901760, %v316_v20 }
  0x68   : > { %688 = vmatmul.f32.gmra.mxu2 %v454_v2  ;;  %1209 = vmatpush.msra.mxu0 %v4751_v16  ;;  %v4996_v2 = vand.u32 4294901760, %v315_v63 }
  0x69   : > { %1477 = vmatpush.msra.mxu3 %v4661_v24  ;;  %1297 = vmatpush.msra.mxu1 %v4729_v3  ;;  %v7279_v24 = vand.u32 4294901760, %v4751_v16  ;;  %v7280_v16 = vand.u32 4294901760, %v4765_v35 }
  0x6a   : > { %1388 = vmatpush.msra.mxu2 %v7277_v45  ;;  %1212 = vmatpush.msra.mxu0 %v4765_v35  ;;  %v5010_v15 = vsub.f32 %v315_v63, %v4996_v2  ;;  %v5037_v35 = vsub.f32 %v316_v20, %v5021_v19 }
  0x6b   : > { %1479 = vmatpush.msra.mxu3 %v4680_v18  ;;  %1299 = vmatpush.msra.mxu1 %v4748_v4  ;;  %v989_v18 = vsub.f32 %v4985_v37, %v988_v59 }
  0x6c   : > { %1392 = vmatpush.msra.mxu2 %v7278_v50  ;;  %1215 = vmatpush.msra.mxu0 %v4789_v44  ;;  %v996_v61 = vand.u32 4294901760, %v5010_v15  ;;  %v317_v44 = vld [vmem:[#allocation2 + $0x18] sm:$0xff]  ;;  %v1004_v32 = vand.u32 4294901760, %v5037_v35 }
  0x6d   : > { %466 = vmatmul.f32.gmra.mxu0 %v465_v47  ;;  %595 = vmatmul.f32.gmra.mxu1 %v4915_v56  ;;  %v990_v33 = vand.u32 4294901760, %v989_v18  ;;  %v4226_v47 = vld [vmem:[%s7183_s1 + $0x170] sm:$0xff] }
  0x6e   : > { %1301 = vmatpush.msra.mxu1 %v4762_v22  ;;  %1396 = vmatpush.msra.mxu2 %v7279_v24  ;;  %v5159_v50 = vand.u32 4294901760, %v4226_v47 }
  0x6f   : > { %780 = vmatmul.f32.gmra.mxu3 %v463_v55  ;;  %1218 = vmatpush.msra.mxu0 %v4800_v52  ;;  %v322_v55 = vld [vmem:[#allocation2 + $0x40] sm:$0x3f] }
  0x70   : > { %693 = vmatmul.f32.gmra.mxu2 %v462_v46  ;;  %1303 = vmatpush.msra.mxu1 %v4781_v34  ;;  %v5048_v46 = vand.u32 4294901760, %v317_v44  ;;  %v5137_v48 = vand.u32 4294901760, %v322_v55  ;;  %v5168_v20 = vsub.f32 %v4226_v47, %v5159_v50 }
  0x71   : > { %1481 = vmatpush.msra.mxu3 %v4695_v26  ;;  %1221 = vmatpush.msra.mxu0 %v4822_v40  ;;  %v7282_v26 = vand.u32 4294901760, %v4800_v52  ;;  %v7283_v52 = vand.u32 4294901760, %v4822_v40 }
  0x72   : > { %1400 = vmatpush.msra.mxu2 %v7280_v16  ;;  %1305 = vmatpush.msra.mxu1 %v4797_v36 }
  0x73   : > { %1483 = vmatpush.msra.mxu3 %v4714_v27  ;;  %1224 = vmatpush.msra.mxu0 %v4840_v60  ;;  %v997_v27 = vsub.f32 %v5010_v15, %v996_v61 }
  0x74   : > { %1404 = vmatpush.msra.mxu2 %v7281_v12  ;;  %1307 = vmatpush.msra.mxu1 %v4819_v1 }
  0x75   : > { %599 = vmatmul.f32.gmra.mxu1 %v4952_v62  ;;  %849 = vmatmul.f32.vlgmr.msrb.gmra.mxu0 %v4538_v8  ;;  %v998_v10 = vand.u32 4294901760, %v997_v27  ;;  %v4225_v27 = vld [vmem:[%s7183_s1 + $0x168] sm:$0xff] }
  0x76   : > { %1227 = vmatpush.msra.mxu0 %v4863_v21  ;;  %1408 = vmatpush.msra.mxu2 %v7282_v26  ;;  %v1682_v26 = vand.u32 4294901760, %v5168_v20 }
  0x77   : > { %1156 = vmatmul.f32.vlgmr.msrb.gmra.mxu3 %v4974_v41  ;;  %1309 = vmatpush.msra.mxu1 %v4837_v17 }
  0x78   : > { %991 = vmatmul.f32.vlgmr.msrb.gmra.mxu2 %v990_v33  ;;  %1485 = vmatpush.msra.mxu3 %v4729_v3  ;;  %v7284_v3 = vand.u32 4294901760, %v4840_v60 }
  0x79   : > { %1230 = vmatpush.msra.mxu0 %v4875_v31  ;;  %1412 = vmatpush.msra.mxu2 %v7283_v52  ;;  %v1683_v52 = vsub.f32 %v5168_v20, %v1682_v26 }
  0x7a   : > { %1487 = vmatpush.msra.mxu3 %v4748_v4  ;;  %1311 = vmatpush.msra.mxu1 %v4856_v30  ;;  %v1005_v4 = vsub.f32 %v5037_v35, %v1004_v32 }
  0x7b   : > { %1233 = vmatpush.msra.mxu0 %v4895_v5  ;;  %1416 = vmatpush.msra.mxu2 %v7284_v3  ;;  %v4224_v3 = vld [vmem:[%s7183_s1 + $0x160] sm:$0xff] }
  0x7c   : > { %1489 = vmatpush.msra.mxu3 %v4762_v22  ;;  %1313 = vmatpush.msra.mxu1 %v4872_v11  ;;  %v5064_v22 = vsub.f32 %v317_v44, %v5048_v46  ;;  %v1006_v40 = vand.u32 4294901760, %v1005_v4  ;;  %v5177_v44 = vand.u32 4294901760, %v4225_v27  ;;  %v1684_v4 = vand.u32 4294901760, %v1683_v52 }
  0x7d   : > { %853 = vmatmul.f32.gmra.mxu0 %v4580_v49  ;;  %918 = vmatmul.f32.vlgmr.msrb.gmra.mxu1 %v4538_v8  ;;  %v318_v8 = vld [vmem:[#allocation2 + $0x20] sm:$0xff] }
  0x7e   : > { %1491 = vmatpush.msra.mxu3 %v4781_v34  ;;  %1420 = vmatpush.msra.mxu2 %v1127_v6  ;;  %v7285_v34 = vand.u32 4294901760, %v4875_v31  ;;  %v1012_v60 = vand.u32 4294901760, %v5064_v22  ;;  %v5076_v21 = vand.u32 4294901760, %v318_v8  ;;  %v320_v6 = vld [vmem:[#allocation2 + $0x30] sm:$0xff] }
  0x7f   : > { %1160 = vmatmul.f32.gmra.mxu3 %v4996_v2  ;;  %1236 = vmatpush.msra.mxu0 %v4912_v39 }
  0x80   : > { %999 = vmatmul.f32.gmra.mxu2 %v998_v10  ;;  %1493 = vmatpush.msra.mxu3 %v4797_v36  ;;  %v5090_v36 = vsub.f32 %v318_v8, %v5076_v21  ;;  %v5189_v10 = vsub.f32 %v4225_v27, %v5177_v44  ;;  %v5194_v8 = vand.u32 4294901760, %v4224_v3 }
  0x81   : > { %1424 = vmatpush.msra.mxu2 %v7285_v34  ;;  %1315 = vmatpush.msra.mxu1 %v4892_v14 }
  0x82   : > { %1495 = vmatpush.msra.mxu3 %v4819_v1  ;;  %1239 = vmatpush.msra.mxu0 %v4926_v28  ;;  %v1013_v1 = vsub.f32 %v5064_v22, %v1012_v60  ;;  %v321_v28 = vld [vmem:[#allocation2 + $0x38] sm:$0xff] }
  0x83   : > { %1428 = vmatpush.msra.mxu2 %v1139_v58  ;;  %1317 = vmatpush.msra.mxu1 %v4909_v9  ;;  %v5110_v58 = vand.u32 4294901760, %v320_v6  ;;  %v5122_v42 = vand.u32 4294901760, %v321_v28 }
  0x84   : > { %1497 = vmatpush.msra.mxu3 %v4837_v17  ;;  %v319_v17 = vld [vmem:[#allocation2 + $0x28] sm:$0xff] }
  0x85   : > { %857 = vmatmul.f32.gmra.mxu0 %v4623_v23  ;;  %922 = vmatmul.f32.gmra.mxu1 %v4580_v49  ;;  %v1014_v49 = vand.u32 4294901760, %v1013_v1  ;;  %v5097_v31 = vand.u32 4294901760, %v319_v17  ;;  %v5131_v43 = vsub.f32 %v321_v28, %v5122_v42  ;;  %v1688_v1 = vand.u32 4294901760, %v5189_v10 }
  0x86   : > { %1499 = vmatpush.msra.mxu3 %v4856_v30  ;;  %1432 = vmatpush.msra.mxu2 %v1145_v29  ;;  %v1020_v30 = vand.u32 4294901760, %v5090_v36 }
  0x87   : > { %1164 = vmatmul.f32.gmra.mxu3 %v5021_v19  ;;  %v7209_v7 = vand.u32 4294901760, %v5131_v43 }
  0x88   : > { %1007 = vmatmul.f32.gmra.mxu2 %v1006_v40  ;;  %1501 = vmatpush.msra.mxu3 %v4872_v11  ;;  %v1021_v11 = vsub.f32 %v5090_v36, %v1020_v30 }
  0x89   : > { %1436 = vmatpush.msra.mxu2 %v1151_v25  ;;  %v1045_v63 = vsub.f32 %v5131_v43, %v7209_v7 }
  0x8a   : > { %1503 = vmatpush.msra.mxu3 %v4892_v14  ;;  %v5107_v14 = vsub.f32 %v319_v17, %v5097_v31  ;;  %v1022_v5 = vand.u32 4294901760, %v1021_v11 }
  0x8b   : > { %v1046_v16 = vand.u32 4294901760, %v1045_v63 }
  0x8c   : > { %1505 = vmatpush.msra.mxu3 %v4909_v9  ;;  %v1028_v39 = vand.u32 4294901760, %v5107_v14  ;;  %v5119_v9 = vsub.f32 %v320_v6, %v5110_v58  ;;  %v5201_v6 = vsub.f32 %v4224_v3, %v5194_v8 }
  0x8d   : > { %861 = vmatmul.f32.gmra.mxu0 %v4647_v53  ;;  %926 = vmatmul.f32.gmra.mxu1 %v4623_v23 }
  0x8e   : > { %v1029_v23 = vsub.f32 %v5107_v14, %v1028_v39  ;;  %v7217_v25 = vand.u32 4294901760, %v5119_v9 }
  0x8f   : > { %1168 = vmatmul.f32.gmra.mxu3 %v5048_v46 }
  0x90   : > { %1015 = vmatmul.f32.gmra.mxu2 %v1014_v49  ;;  %v1030_v29 = vand.u32 4294901760, %v1029_v23  ;;  %v1689_v23 = vsub.f32 %v5189_v10, %v1688_v1 }
  0x95   : > { %865 = vmatmul.f32.gmra.mxu0 %v4703_v13  ;;  %930 = vmatmul.f32.gmra.mxu1 %v4647_v53  ;;  %v1037_v53 = vsub.f32 %v5119_v9, %v7217_v25 }
  0x97   : > { %1172 = vmatmul.f32.gmra.mxu3 %v5076_v21  ;;  %v1038_v0 = vand.u32 4294901760, %v1037_v53  ;;  %v4223_v53 = vld [vmem:[%s7183_s1 + $0x158] sm:$0xff] }
  0x98   : > { %1023 = vmatmul.f32.gmra.mxu2 %v1022_v5 }
  0x9d   : > { %869 = vmatmul.f32.gmra.mxu0 %v4770_v54  ;;  %934 = vmatmul.f32.gmra.mxu1 %v4703_v13  ;;  %v5139_v13 = vand.u32 4294901760, %v4227_v57 }
  0x9f   : > { %1176 = vmatmul.f32.gmra.mxu3 %v5097_v31  ;;  %1570 = vmatpush.msrb.mxu0 %v5139_v13  ;;  %v5145_v38 = vsub.f32 %v4227_v57, %v5139_v13  ;;  %v5213_v57 = vand.u32 4294901760, %v4223_v53 }
  0xa0   : > { %1031 = vmatmul.f32.gmra.mxu2 %v1030_v29  ;;  %1902 = vmatpush.msrb.mxu3 %v5139_v13  ;;  %v7220_v29 = vand.u32 4294901760, %v5201_v6 }
  0xa1   : > { %v1676_v45 = vand.u32 4294901760, %v5145_v38  ;;  %1809 = vmatpush.msrb.mxu2 %v5145_v38  ;;  %1572 = vmatpush.msrb.mxu0 %v5159_v50 }
  0xa2   : > { %1904 = vmatpush.msrb.mxu3 %v5159_v50  ;;  %v1695_v47 = vsub.f32 %v5201_v6, %v7220_v29 }
  0xa3   : > { %v1677_v18 = vsub.f32 %v5145_v38, %v1676_v45  ;;  %1812 = vmatpush.msrb.mxu2 %v5168_v20  ;;  %1574 = vmatpush.msrb.mxu0 %v5177_v44  ;;  %v7286_v20 = vand.u32 4294901760, %v5201_v6 }
  0xa4   : > { %1906 = vmatpush.msrb.mxu3 %v5177_v44  ;;  %v1696_v63 = vand.u32 4294901760, %v1695_v47 }
  0xa5   : > { %873 = vmatmul.f32.gmra.mxu0 %v4843_v51  ;;  %938 = vmatmul.f32.gmra.mxu1 %v4770_v54  ;;  %v5156_v54 = vsub.f32 %v322_v55, %v5137_v48  ;;  %v1678_v12 = vand.u32 4294901760, %v1677_v18  ;;  %v1690_v55 = vand.u32 4294901760, %v1689_v23 }
  0xa6   : > { %1815 = vmatpush.msrb.mxu2 %v5189_v10  ;;  %1576 = vmatpush.msrb.mxu0 %v5194_v8 }
  0xa7   : > { %1180 = vmatmul.f32.gmra.mxu3 %v5110_v58  ;;  %v7208_v33 = vand.u32 4294901760, %v5156_v54  ;;  %1679 = vmatpush.msrb.mxu1 %v1678_v12 }
  0xa8   : > { %1039 = vmatmul.f32.gmra.mxu2 %v1038_v0  ;;  %1908 = vmatpush.msrb.mxu3 %v5194_v8 }
  0xa9   : > { %1685 = vmatpush.msrb.mxu1 %v1684_v4  ;;  %1818 = vmatpush.msrb.mxu2 %v5201_v6 }
  0xaa   : > { %v403_v24 = vpop.f32.mrf.mxu0  ;;  %1578 = vmatpush.msrb.mxu0 %v5213_v57  ;;  %1910 = vmatpush.msrb.mxu3 %v5213_v57 }
  0xab   : > { %1691 = vmatpush.msrb.mxu1 %v1690_v55 }
  0xad   : > { %877 = vmatmul.f32.gmra.mxu0 %v4915_v56  ;;  %942 = vmatmul.f32.gmra.mxu1 %v4843_v51  ;;  %v1053_v51 = vsub.f32 %v5156_v54, %v7208_v33 }
  0xae   : > { %1697 = vmatpush.msrb.mxu1 %v1696_v63 }
  0xaf   : > { %1184 = vmatmul.f32.gmra.mxu3 %v5122_v42  ;;  %v1054_v5 = vand.u32 4294901760, %v1053_v51  ;;  %v4222_v51 = vld [vmem:[%s7183_s1 + $0x150] sm:$0xff] }
  0xb0   : > { %1047 = vmatmul.f32.gmra.mxu2 %v1046_v16  ;;  %v5235_v4 = vand.u32 4294901760, %v4222_v51 }
  0xb2   : > { %v411_v34 = vpop.f32.mrf.mxu0  ;;  %v568_v40 = vpop.f32.mrf.mxu1  ;;  %1580 = vmatpush.msrb.mxu0 %v5235_v4  ;;  %1912 = vmatpush.msrb.mxu3 %v5235_v4 }
  0xb3   : > { %v569_v17 = vadd.f32 %v568_v40, %v403_v24  ;;  %v654_v49 = vpop.f32.mrf.mxu2  ;;  %v733_v11 = vpop.f32.mrf.mxu3 }
  0xb5   : > { %v655_v28 = vadd.f32 %v654_v49, %v569_v17  ;;  %881 = vmatmul.f32.gmra.mxu0 %v4952_v62  ;;  %946 = vmatmul.f32.gmra.mxu1 %v4915_v56  ;;  %v5223_v56 = vsub.f32 %v4223_v53, %v5213_v57 }
  0xb7   : > { %v5216_v0 = vadd.f32 %v733_v11, %v655_v28  ;;  %1188 = vmatmul.f32.gmra.mxu3 %v5137_v48  ;;  %v7219_v16 = vand.u32 4294901760, %v5223_v56  ;;  %1821 = vmatpush.msrb.mxu2 %v5223_v56  ;;  %v4221_v11 = vld [vmem:[%s7183_s1 + $0x148] sm:$0xff] }
  0xb8   : > { %1055 = vmatmul.f32.gmra.mxu2 %v1054_v5  ;;  %v5252_v5 = vand.u32 4294901760, %v4221_v11 }
  0xb9   : > { %v1701_v3 = vsub.f32 %v5223_v56, %v7219_v16 }
  0xba   : > { %v419_v24 = vpop.f32.mrf.mxu0  ;;  %v572_v18 = vpop.f32.mrf.mxu1  ;;  %1582 = vmatpush.msrb.mxu0 %v5252_v5  ;;  %v5260_v55 = vsub.f32 %v4221_v11, %v5252_v5  ;;  %1914 = vmatpush.msrb.mxu3 %v5252_v5 }
  0xbb   : > { %v573_v12 = vadd.f32 %v572_v18, %v411_v34  ;;  %v659_v27 = vpop.f32.mrf.mxu2  ;;  %v739_v52 = vpop.f32.mrf.mxu3  ;;  %v1702_v17 = vand.u32 4294901760, %v1701_v3  ;;  %v5241_v34 = vsub.f32 %v4222_v51, %v5235_v4  ;;  %v4220_v18 = vld [vmem:[%s7183_s1 + $0x140] sm:$0xff] }
  0xbd   : > { %v660_v40 = vadd.f32 %v659_v27, %v573_v12  ;;  %950 = vmatmul.f32.gmra.mxu1 %v4952_v62  ;;  %1242 = vmatmul.f32.vlgmr.msra.gmra.mxu0 %v4985_v37  ;;  %v7218_v62 = vand.u32 4294901760, %v5241_v34  ;;  %v7216_v27 = vand.u32 4294901760, %v5260_v55 }
  0xbe   : > { %1703 = vmatpush.msrb.mxu1 %v1702_v17  ;;  %1824 = vmatpush.msrb.mxu2 %v5241_v34  ;;  %v4219_v17 = vld [vmem:[%s7183_s1 + $0x138] sm:$0xff] }
  0xbf   : > { %v5244_v49 = vadd.f32 %v739_v52, %v660_v40  ;;  %1507 = vmatmul.f32.vlgmr.msra.gmra.mxu3 %v4974_v41  ;;  %v1707_v53 = vsub.f32 %v5241_v34, %v7218_v62  ;;  %v5267_v52 = vand.u32 4294901760, %v4220_v18  ;;  %v5288_v11 = vand.u32 4294901760, %v4219_v17 }
  0xc0   : > { %1438 = vmatmul.f32.vlgmr.msra.gmra.mxu2 %v4974_v41 }
  0xc1   : > { %v1708_v12 = vand.u32 4294901760, %v1707_v53  ;;  %1827 = vmatpush.msrb.mxu2 %v5260_v55  ;;  %1584 = vmatpush.msrb.mxu0 %v5267_v52  ;;  %v5278_v3 = vsub.f32 %v4220_v18, %v5267_v52 }
  0xc2   : > { %v427_v23 = vpop.f32.mrf.mxu0  ;;  %v576_v28 = vpop.f32.mrf.mxu1  ;;  %1916 = vmatpush.msrb.mxu3 %v5267_v52 }
  0xc3   : > { %v577_v41 = vadd.f32 %v576_v28, %v419_v24  ;;  %v664_v47 = vpop.f32.mrf.mxu2  ;;  %v745_v63 = vpop.f32.mrf.mxu3  ;;  %1709 = vmatpush.msrb.mxu1 %v1708_v12  ;;  %v1713_v24 = vsub.f32 %v5260_v55, %v7216_v27  ;;  %1830 = vmatpush.msrb.mxu2 %v5278_v3 }
  0xc4   : > { %1586 = vmatpush.msrb.mxu0 %v5288_v11  ;;  %1918 = vmatpush.msrb.mxu3 %v5288_v11 }
  0xc5   : > { %v665_v51 = vadd.f32 %v664_v47, %v577_v41  ;;  %1247 = vmatmul.f32.gmra.mxu0 %v5010_v15  ;;  %1321 = vmatmul.f32.vlgmr.msra.gmra.mxu1 %v988_v59  ;;  %v1714_v37 = vand.u32 4294901760, %v1713_v24  ;;  %v7213_v59 = vand.u32 4294901760, %v5278_v3  ;;  %v4217_v15 = vld [vmem:[%s7183_s1 + $0x128] sm:$0xff] }
  0xc7   : > { %v5280_v40 = vadd.f32 %v745_v63, %v665_v51  ;;  %1511 = vmatmul.f32.gmra.mxu3 %v4996_v2  ;;  %1715 = vmatpush.msrb.mxu1 %v1714_v37  ;;  %v1719_v41 = vsub.f32 %v5278_v3, %v7213_v59 }
  0xc8   : > { %1442 = vmatmul.f32.gmra.mxu2 %v4996_v2  ;;  %v5297_v2 = vsub.f32 %v4219_v17, %v5288_v11  ;;  %v4218_v17 = vld [vmem:[%s7183_s1 + $0x130] sm:$0xff] }
  0xc9   : > { %v1720_v12 = vand.u32 4294901760, %v1719_v41  ;;  %v5311_v37 = vand.u32 4294901760, %v4218_v17 }
  0xca   : > { %v435_v28 = vpop.f32.mrf.mxu0  ;;  %v580_v53 = vpop.f32.mrf.mxu1  ;;  %v7210_v51 = vand.u32 4294901760, %v5297_v2  ;;  %1833 = vmatpush.msrb.mxu2 %v5297_v2 }
  0xcb   : > { %v581_v47 = vadd.f32 %v580_v53, %v427_v23  ;;  %v669_v63 = vpop.f32.mrf.mxu2  ;;  %v751_v18 = vpop.f32.mrf.mxu3  ;;  %1721 = vmatpush.msrb.mxu1 %v1720_v12  ;;  %1588 = vmatpush.msrb.mxu0 %v5311_v37  ;;  %v5322_v41 = vsub.f32 %v4218_v17, %v5311_v37 }
  0xcc   : > { %v1725_v23 = vsub.f32 %v5297_v2, %v7210_v51  ;;  %1920 = vmatpush.msrb.mxu3 %v5311_v37 }
  0xcd   : > { %v670_v24 = vadd.f32 %v669_v63, %v581_v47  ;;  %1252 = vmatmul.f32.gmra.mxu0 %v5037_v35  ;;  %1327 = vmatmul.f32.gmra.mxu1 %v996_v61  ;;  %v5324_v47 = vand.u32 4294901760, %v4217_v15  ;;  %v7212_v12 = vand.u32 4294901760, %v5322_v41 }
  0xce   : > { %v1726_v61 = vand.u32 4294901760, %v1725_v23  ;;  %1836 = vmatpush.msrb.mxu2 %v5322_v41 }
  0xcf   : > { %v5313_v53 = vadd.f32 %v751_v18, %v670_v24  ;;  %1515 = vmatmul.f32.gmra.mxu3 %v5021_v19  ;;  %1590 = vmatpush.msrb.mxu0 %v5324_v47  ;;  %v5330_v23 = vsub.f32 %v4217_v15, %v5324_v47  ;;  %v1731_v17 = vsub.f32 %v5322_v41, %v7212_v12  ;;  %v4216_v15 = vld [vmem:[%s7183_s1 + $0x120] sm:$0xff] }
  0xd0   : > { %1446 = vmatmul.f32.gmra.mxu2 %v5021_v19  ;;  %1727 = vmatpush.msrb.mxu1 %v1726_v61 }
  0xd1   : > { %1922 = vmatpush.msrb.mxu3 %v5324_v47  ;;  %v1732_v61 = vand.u32 4294901760, %v1731_v17  ;;  %1839 = vmatpush.msrb.mxu2 %v5330_v23 }
  0xd2   : > { %v443_v63 = vpop.f32.mrf.mxu0  ;;  %v584_v18 = vpop.f32.mrf.mxu1 }
  0xd3   : > { %v585_v24 = vadd.f32 %v584_v18, %v435_v28  ;;  %v674_v33 = vpop.f32.mrf.mxu2  ;;  %v757_v19 = vpop.f32.mrf.mxu3  ;;  %v7211_v28 = vand.u32 4294901760, %v5330_v23  ;;  %v5344_v18 = vand.u32 4294901760, %v4216_v15  ;;  %1733 = vmatpush.msrb.mxu1 %v1732_v61 }
  0xd5   : > { %v675_v7 = vadd.f32 %v674_v33, %v585_v24  ;;  %1257 = vmatmul.f32.gmra.mxu0 %v5064_v22  ;;  %1333 = vmatmul.f32.gmra.mxu1 %v1004_v32  ;;  %v1737_v35 = vsub.f32 %v5330_v23, %v7211_v28  ;;  %v5355_v32 = vsub.f32 %v4216_v15, %v5344_v18  ;;  %v4215_v33 = vld [vmem:[%s7183_s1 + $0x118] sm:$0xff] }
  0xd6   : > { %1592 = vmatpush.msrb.mxu0 %v5344_v18  ;;  %1924 = vmatpush.msrb.mxu3 %v5344_v18 }
  0xd7   : > { %v5347_v51 = vadd.f32 %v757_v19, %v675_v7  ;;  %1519 = vmatmul.f32.gmra.mxu3 %v5048_v46  ;;  %v1738_v24 = vand.u32 4294901760, %v1737_v35  ;;  %v5361_v7 = vand.u32 4294901760, %v4215_v33  ;;  %v7214_v28 = vand.u32 4294901760, %v5355_v32  ;;  %1842 = vmatpush.msrb.mxu2 %v5355_v32 }
  0xd8   : > { %1450 = vmatmul.f32.gmra.mxu2 %v5048_v46 }
  0xd9   : > { %1739 = vmatpush.msrb.mxu1 %v1738_v24  ;;  %1594 = vmatpush.msrb.mxu0 %v5361_v7  ;;  %v5368_v35 = vsub.f32 %v4215_v33, %v5361_v7  ;;  %v1743_v12 = vsub.f32 %v5355_v32, %v7214_v28  ;;  %v4214_v24 = vld [vmem:[%s7183_s1 + $0x110] sm:$0xff] }
  0xda   : > { %v451_v19 = vpop.f32.mrf.mxu0  ;;  %v588_v17 = vpop.f32.mrf.mxu1  ;;  %1926 = vmatpush.msrb.mxu3 %v5361_v7 }
  0xdb   : > { %v589_v46 = vadd.f32 %v588_v17, %v443_v63  ;;  %v679_v15 = vpop.f32.mrf.mxu2  ;;  %v763_v61 = vpop.f32.mrf.mxu3  ;;  %v7215_v63 = vand.u32 4294901760, %v5368_v35  ;;  %v1744_v33 = vand.u32 4294901760, %v1743_v12  ;;  %v5381_v17 = vand.u32 4294901760, %v4214_v24  ;;  %1845 = vmatpush.msrb.mxu2 %v5368_v35 }
  0xdd   : > { %v680_v59 = vadd.f32 %v679_v15, %v589_v46  ;;  %1262 = vmatmul.f32.gmra.mxu0 %v5090_v36  ;;  %1339 = vmatmul.f32.gmra.mxu1 %v1012_v60  ;;  %v1749_v22 = vsub.f32 %v5368_v35, %v7215_v63  ;;  %v4213_v60 = vld [vmem:[%s7183_s1 + $0x108] sm:$0xff]  ;;  %v5395_v12 = vsub.f32 %v4214_v24, %v5381_v17  ;;  %v4212_v15 = vld [vmem:[%s7183_s1 + $0x100] sm:$0xff] }
  0xde   : > { %1745 = vmatpush.msrb.mxu1 %v1744_v33  ;;  %v5397_v46 = vand.u32 4294901760, %v4213_v60  ;;  %1596 = vmatpush.msrb.mxu0 %v5381_v17 }
  0xdf   : > { %v5384_v28 = vadd.f32 %v763_v61, %v680_v59  ;;  %1523 = vmatmul.f32.gmra.mxu3 %v5076_v21  ;;  %v1750_v59 = vand.u32 4294901760, %v1749_v22  ;;  %v1754_v27 = vand.u32 4294901760, %v5395_v12  ;;  %1848 = vmatpush.msrb.mxu2 %v5395_v12 }
  0xe0   : > { %1454 = vmatmul.f32.gmra.mxu2 %v5076_v21  ;;  %1928 = vmatpush.msrb.mxu3 %v5381_v17  ;;  %v5405_v21 = vand.u32 4294901760, %v4212_v15  ;;  %v5408_v24 = vsub.f32 %v4213_v60, %v5397_v46 }
  0xe1   : > { %1751 = vmatpush.msrb.mxu1 %v1750_v59  ;;  %1598 = vmatpush.msrb.mxu0 %v5397_v46  ;;  %v1755_v62 = vsub.f32 %v5395_v12, %v1754_v27 }
  0xe2   : > { %v459_v61 = vpop.f32.mrf.mxu0  ;;  %v592_v63 = vpop.f32.mrf.mxu1  ;;  %v1760_v16 = vand.u32 4294901760, %v5408_v24  ;;  %1851 = vmatpush.msrb.mxu2 %v5408_v24  ;;  %v5418_v29 = vsub.f32 %v4212_v15, %v5405_v21  ;;  %1930 = vmatpush.msrb.mxu3 %v5397_v46 }
  0xe3   : > { %v593_v33 = vadd.f32 %v592_v63, %v451_v19  ;;  %v684_v22 = vpop.f32.mrf.mxu2  ;;  %v769_v25 = vpop.f32.mrf.mxu3  ;;  %v1756_v19 = vand.u32 4294901760, %v1755_v62  ;;  %1600 = vmatpush.msrb.mxu0 %v5405_v21 }
  0xe4   : > { %v1761_v63 = vsub.f32 %v5408_v24, %v1760_v16  ;;  %1854 = vmatpush.msrb.mxu2 %v5418_v29  ;;  %v1766_v59 = vand.u32 4294901760, %v5418_v29  ;;  %1932 = vmatpush.msrb.mxu3 %v5405_v21 }
  0xe5   : > { %v685_v60 = vadd.f32 %v684_v22, %v593_v33  ;;  %1267 = vmatmul.f32.gmra.mxu0 %v5107_v14  ;;  %1345 = vmatmul.f32.gmra.mxu1 %v1020_v30 }
  0xe6   : > { %1991 = vmatpush.msra.mxu0 %v1676_v45  ;;  %1757 = vmatpush.msrb.mxu1 %v1756_v19  ;;  %v1762_v36 = vand.u32 4294901760, %v1761_v63  ;;  %v1767_v30 = vsub.f32 %v5418_v29, %v1766_v59  ;;  %v7289_v19 = vand.u32 4294901760, %v5241_v34  ;;  %v1544_v63 = vld [vmem:[#allocation2 + $0xa] sm:$0xff] }
  0xe7   : > { %v5430_v15 = vadd.f32 %v769_v25, %v685_v60  ;;  %1527 = vmatmul.f32.gmra.mxu3 %v5097_v31  ;;  %v1543_v60 = vld [vmem:[#allocation2 + $0x2] sm:$0xff]  ;;  %v5476_v34 = vand.u32 4294901760, %v1544_v63 }
  0xe8   : > { %1458 = vmatmul.f32.gmra.mxu2 %v5097_v31  ;;  %1995 = vmatpush.msra.mxu0 %v1682_v26  ;;  %v1768_v33 = vand.u32 4294901760, %v1767_v30  ;;  %v5455_v10 = vand.u32 4294901760, %v1543_v60  ;;  %v7293_v30 = vand.u32 4294901760, %v5278_v3 }
  0xe9   : > { %1763 = vmatpush.msrb.mxu1 %v1762_v36  ;;  %v1610_v3 = vsub.f32 %v1544_v63, %v5476_v34 }
  0xea   : > { %v467_v25 = vpop.f32.mrf.mxu0  ;;  %v596_v62 = vpop.f32.mrf.mxu1  ;;  %1999 = vmatpush.msra.mxu0 %v1688_v1  ;;  %v7288_v1 = vand.u32 4294901760, %v5223_v56  ;;  %v1602_v56 = vsub.f32 %v1543_v60, %v5455_v10  ;;  %v7297_v60 = vand.u32 4294901760, %v5330_v23 }
  0xeb   : > { %v597_v22 = vadd.f32 %v596_v62, %v459_v61  ;;  %v689_v38 = vpop.f32.mrf.mxu2  ;;  %v775_v45 = vpop.f32.mrf.mxu3  ;;  %1769 = vmatpush.msrb.mxu1 %v1768_v33 }
  0xec   : > { %2003 = vmatpush.msra.mxu0 %v7286_v20 }
  0xed   : > { %v690_v31 = vadd.f32 %v689_v38, %v597_v22  ;;  %1272 = vmatmul.f32.gmra.mxu0 %v5119_v9  ;;  %1351 = vmatmul.f32.gmra.mxu1 %v1028_v39  ;;  %v7294_v22 = vand.u32 4294901760, %v5297_v2  ;;  %v1545_v38 = vld [vmem:[#allocation2 + $0x12] sm:$0xff]  ;;  %v1611_v2 = vand.u32 4294901760, %v1610_v3 }
  0xee   : > { %2090 = vmatpush.msra.mxu1 %v5139_v13  ;;  %2007 = vmatpush.msra.mxu0 %v7288_v1 }
  0xef   : > { %v5450_v26 = vadd.f32 %v775_v45, %v690_v31  ;;  %1531 = vmatmul.f32.gmra.mxu3 %v5110_v58  ;;  %v5497_v31 = vand.u32 4294901760, %v1545_v38 }
  0xf0   : > { %1462 = vmatmul.f32.gmra.mxu2 %v5110_v58  ;;  %2092 = vmatpush.msra.mxu1 %v5159_v50  ;;  %v7290_v50 = vand.u32 4294901760, %v5119_v9  ;;  %v1603_v9 = vand.u32 4294901760, %v1602_v56 }
  0xf1   : > { %7287 = vst [vmem:[#allocation4_spill] sm:$0xff] %v5450_v26  ;;  %2011 = vmatpush.msra.mxu0 %v7289_v19  ;;  %v1618_v23 = vsub.f32 %v1545_v38, %v5497_v31 }
  0xf2   : > { %v600_v14 = vpop.f32.mrf.mxu1  ;;  %v850_v39 = vpop.f32.mrf.mxu0  ;;  %2094 = vmatpush.msra.mxu1 %v5177_v44  ;;  %v7291_v44 = vand.u32 4294901760, %v5260_v55 }
  0xf3   : > { %v601_v13 = vadd.f32 %v600_v14, %v467_v25  ;;  %v694_v6 = vpop.f32.mrf.mxu2  ;;  %v781_v61 = vpop.f32.mrf.mxu3 }
  0xf4   : > { %2096 = vmatpush.msra.mxu1 %v5194_v8  ;;  %2015 = vmatpush.msra.mxu0 %v7291_v44  ;;  %v851_v8 = vadd.f32 %v850_v39, %v5216_v0  ;;  %v7295_v0 = vand.u32 4294901760, %v5131_v43  ;;  %v1612_v39 = vsub.f32 %v1610_v3, %v1611_v2 }
  0xf5   : > { %v695_v58 = vadd.f32 %v694_v6, %v601_v13  ;;  %1277 = vmatmul.f32.gmra.mxu0 %v5131_v43  ;;  %1357 = vmatmul.f32.gmra.mxu1 %v7290_v50  ;;  %v1546_v13 = vld [vmem:[#allocation2 + $0x1a] sm:$0xff]  ;;  %v7300_v6 = vand.u32 4294901760, %v5368_v35  ;;  %v1547_v50 = vld [vmem:[#allocation2 + $0x22] sm:$0xff] }
  0xf6   : > { %2098 = vmatpush.msra.mxu1 %v5213_v57  ;;  %2019 = vmatpush.msra.mxu0 %v7293_v30 }
  0xf7   : > { %v5470_v36 = vadd.f32 %v781_v61, %v695_v58  ;;  %1535 = vmatmul.f32.gmra.mxu3 %v5122_v42  ;;  %v5516_v61 = vand.u32 4294901760, %v1546_v13 }
  0xf8   : > { %1466 = vmatmul.f32.gmra.mxu2 %v5122_v42  ;;  %2100 = vmatpush.msra.mxu1 %v5235_v4  ;;  %v1604_v4 = vsub.f32 %v1602_v56, %v1603_v9 }
  0xf9   : > { %7292 = vst [vmem:[#allocation5_spill] sm:$0xff] %v5470_v36  ;;  %2023 = vmatpush.msra.mxu0 %v7294_v22 }
  0xfa   : > { %v854_v57 = vpop.f32.mrf.mxu0  ;;  %v919_v25 = vpop.f32.mrf.mxu1  ;;  %2102 = vmatpush.msra.mxu1 %v5252_v5  ;;  %v7296_v5 = vand.u32 4294901760, %v5322_v41 }
  0xfb   : > { %v920_v55 = vadd.f32 %v919_v25, %v851_v8  ;;  %v992_v62 = vpop.f32.mrf.mxu2  ;;  %v1157_v33 = vpop.f32.mrf.mxu3  ;;  %v855_v43 = vadd.f32 %v854_v57, %v5244_v49  ;;  %v1548_v8 = vld [vmem:[#allocation2 + $0x2a] sm:$0xff] }
  0xfc   : > { %2104 = vmatpush.msra.mxu1 %v5267_v52  ;;  %2027 = vmatpush.msra.mxu0 %v7296_v5  ;;  %v1605_v52 = vand.u32 4294901760, %v1604_v4  ;;  %v5541_v57 = vand.u32 4294901760, %v1548_v8 }
  0xfd   : > { %v993_v42 = vadd.f32 %v992_v62, %v920_v55  ;;  %1282 = vmatmul.f32.gmra.mxu0 %v5156_v54  ;;  %1363 = vmatmul.f32.gmra.mxu1 %v7295_v0  ;;  %v1549_v0 = vld [vmem:[#allocation2 + $0x32] sm:$0xff] }
  0xfe   : > { %2106 = vmatpush.msra.mxu1 %v5288_v11  ;;  %2031 = vmatpush.msra.mxu0 %v7297_v60  ;;  %v5553_v38 = vand.u32 4294901760, %v1549_v0 }
  0xff   : > { %v5491_v45 = vadd.f32 %v1157_v33, %v993_v42  ;;  %1539 = vmatmul.f32.gmra.mxu3 %v5137_v48  ;;  %v1642_v42 = vsub.f32 %v1548_v8, %v5541_v57 }
 0x100   : > { %1470 = vmatmul.f32.gmra.mxu2 %v5137_v48  ;;  %2108 = vmatpush.msra.mxu1 %v5311_v37  ;;  %v7298_v48 = vand.u32 4294901760, %v5355_v32  ;;  %v7299_v37 = vand.u32 4294901760, %v5156_v54  ;;  %v1619_v32 = vand.u32 4294901760, %v1618_v23  ;;  %v1650_v60 = vsub.f32 %v1549_v0, %v5553_v38 }
 0x102   : > { %v858_v11 = vpop.f32.mrf.mxu0  ;;  %v923_v41 = vpop.f32.mrf.mxu1  ;;  %2110 = vmatpush.msra.mxu1 %v5324_v47  ;;  %2035 = vmatpush.msra.mxu0 %v7298_v48 }
 0x103   : > { %v924_v20 = vadd.f32 %v923_v41, %v855_v43  ;;  %v1000_v1 = vpop.f32.mrf.mxu2  ;;  %v1161_v14 = vpop.f32.mrf.mxu3  ;;  %v859_v54 = vadd.f32 %v858_v11, %v5280_v40  ;;  %v1620_v40 = vsub.f32 %v1618_v23, %v1619_v32  ;;  %v1550_v11 = vld [vmem:[#allocation2 + $0x3a] sm:$0xff] }
 0x104   : > { %2112 = vmatpush.msra.mxu1 %v5344_v18  ;;  %2039 = vmatpush.msra.mxu0 %v7300_v6  ;;  %v1613_v18 = vand.u32 4294901760, %v1612_v39 }
 0x105   : > { %v1001_v49 = vadd.f32 %v1000_v1, %v924_v20  ;;  %1369 = vmatmul.f32.gmra.mxu1 %v7299_v37  ;;  %1606 = vmatmul.f32.vlgmr.msrb.gmra.mxu0 %v1605_v52  ;;  %v1651_v1 = vand.u32 4294901760, %v1650_v60 }
 0x106   : > { %2114 = vmatpush.msra.mxu1 %v5361_v7  ;;  %2043 = vmatpush.msra.mxu0 %v1754_v27 }
 0x107   : > { %v5511_v47 = vadd.f32 %v1161_v14, %v1001_v49  ;;  %1936 = vmatmul.f32.vlgmr.msrb.gmra.mxu3 %v1603_v9  ;;  %v5565_v14 = vand.u32 4294901760, %v1550_v11  ;;  %v1652_v37 = vsub.f32 %v1650_v60, %v1651_v1 }
 0x108   : > { %1857 = vmatmul.f32.vlgmr.msrb.gmra.mxu2 %v1602_v56  ;;  %2116 = vmatpush.msra.mxu1 %v5381_v17  ;;  %v1626_v17 = vsub.f32 %v1546_v13, %v5516_v61  ;;  %v5531_v56 = vand.u32 4294901760, %v1547_v50 }
 0x109   : > { %2047 = vmatpush.msra.mxu0 %v1760_v16  ;;  %v1621_v16 = vand.u32 4294901760, %v1620_v40  ;;  %v1658_v39 = vsub.f32 %v1550_v11, %v5565_v14 }
 0x10a   : > { %v5519_v19 = vpop.f32.mrf.mxu0  ;;  %v927_v35 = vpop.f32.mrf.mxu1  ;;  %2118 = vmatpush.msra.mxu1 %v5397_v46  ;;  %v1627_v46 = vand.u32 4294901760, %v1626_v17 }
 0x10b   : > { %v928_v7 = vadd.f32 %v927_v35, %v859_v54  ;;  %v1008_v58 = vpop.f32.mrf.mxu2  ;;  %v1165_v12 = vpop.f32.mrf.mxu3  ;;  %2051 = vmatpush.msra.mxu0 %v1766_v59  ;;  %v1653_v54 = vand.u32 4294901760, %v1652_v37 }
 0x10c   : > { %2120 = vmatpush.msra.mxu1 %v5405_v21  ;;  %v1628_v44 = vsub.f32 %v1626_v17, %v1627_v46  ;;  %v1634_v21 = vsub.f32 %v1547_v50, %v5531_v56 }
 0x10d   : > { %v1009_v27 = vadd.f32 %v1008_v58, %v928_v7  ;;  %1614 = vmatmul.f32.gmra.mxu0 %v1613_v18  ;;  %1771 = vmatmul.f32.vlgmr.msrb.gmra.mxu1 %v5455_v10  ;;  %v1659_v18 = vand.u32 4294901760, %v1658_v39 }
 0x10e   : > { %v1629_v9 = vand.u32 4294901760, %v1628_v44  ;;  %v1635_v30 = vand.u32 4294901760, %v1634_v21 }
 0x10f   : > { %v5529_v24 = vadd.f32 %v1165_v12, %v1009_v27  ;;  %1942 = vmatmul.f32.gmra.mxu3 %v1611_v2  ;;  %v1660_v58 = vsub.f32 %v1658_v39, %v1659_v18 }
 0x110   : > { %1862 = vmatmul.f32.gmra.mxu2 %v1610_v3  ;;  %v1636_v22 = vsub.f32 %v1634_v21, %v1635_v30  ;;  %v1643_v3 = vand.u32 4294901760, %v1642_v42 }
 0x111   : > { %7301 = vst [vmem:[#allocation6_spill] sm:$0xff] %v5529_v24  ;;  %v1661_v40 = vand.u32 4294901760, %v1660_v58  ;;  %v4230_v24 = vld [vmem:[%s7184_s2 + $0x90] sm:$0xff] }
 0x112   : > { %v5533_v29 = vpop.f32.mrf.mxu0  ;;  %v5535_v59 = vpop.f32.mrf.mxu1  ;;  %v1637_v4 = vand.u32 4294901760, %v1636_v22  ;;  %v1644_v2 = vsub.f32 %v1642_v42, %v1643_v3 }
 0x113   : > { %v5537_v63 = vpop.f32.mrf.mxu2  ;;  %v5547_v62 = vpop.f32.mrf.mxu3 }
 0x114   : > { %7302 = vst [vmem:[#allocation7_spill] sm:$0xff] %v5537_v63  ;;  %v1645_v20 = vand.u32 4294901760, %v1644_v2 }
 0x115   : > { %1622 = vmatmul.f32.gmra.mxu0 %v1621_v16  ;;  %1775 = vmatmul.f32.gmra.mxu1 %v5476_v34  ;;  %7303 = vst [vmem:[#allocation8_spill] sm:$0xff] %v5547_v62  ;;  %v4233_v62 = vld [vmem:[%s7184_s2 + $0xa8] sm:$0xff] }
 0x117   : > { %1948 = vmatmul.f32.gmra.mxu3 %v1619_v32 }
 0x118   : > { %1867 = vmatmul.f32.gmra.mxu2 %v1618_v23  ;;  %v1551_v23 = vld [vmem:[#allocation2 + $0x42] sm:$0x3f] }
 0x119   : > { %v5577_v32 = vand.u32 4294901760, %v1551_v23 }
 0x11a   : > { %v5543_v25 = vpop.f32.mrf.mxu0  ;;  %v5545_v55 = vpop.f32.mrf.mxu1 }
 0x11b   : > { %v5549_v33 = vpop.f32.mrf.mxu2  ;;  %v5559_v52 = vpop.f32.mrf.mxu3  ;;  %v1666_v12 = vsub.f32 %v1551_v23, %v5577_v32 }
 0x11c   : > { %7304 = vst [vmem:[#allocation9_spill] sm:$0xff] %v5549_v33 }
 0x11d   : > { %1630 = vmatmul.f32.gmra.mxu0 %v1629_v9  ;;  %1779 = vmatmul.f32.gmra.mxu1 %v5497_v31  ;;  %7305 = vst [vmem:[#allocation10_spill] sm:$0xff] %v5559_v52  ;;  %v4234_v52 = vld [vmem:[%s7184_s2 + $0xb0] sm:$0xff] }
 0x11f   : > { %1954 = vmatmul.f32.gmra.mxu3 %v1627_v46 }
 0x120   : > { %1872 = vmatmul.f32.gmra.mxu2 %v1626_v17  ;;  %v1667_v17 = vand.u32 4294901760, %v1666_v12 }
 0x122   : > { %v5555_v5 = vpop.f32.mrf.mxu0  ;;  %v5557_v43 = vpop.f32.mrf.mxu1  ;;  %v1668_v44 = vsub.f32 %v1666_v12, %v1667_v17 }
 0x123   : > { %v5563_v41 = vpop.f32.mrf.mxu2  ;;  %v5573_v13 = vpop.f32.mrf.mxu3 }
 0x124   : > { %7306 = vst [vmem:[#allocation11_spill] sm:$0xff] %v5563_v41 }
 0x125   : > { %1638 = vmatmul.f32.gmra.mxu0 %v1637_v4  ;;  %1783 = vmatmul.f32.gmra.mxu1 %v5516_v61  ;;  %7309 = vst [vmem:[#allocation14_spill] sm:$0xff] %v5573_v13 }
 0x127   : > { %1960 = vmatmul.f32.gmra.mxu3 %v1635_v30 }
 0x128   : > { %1877 = vmatmul.f32.gmra.mxu2 %v1634_v21  ;;  %v1669_v21 = vand.u32 4294901760, %v1668_v44 }
 0x12a   : > { %v5567_v48 = vpop.f32.mrf.mxu0  ;;  %v5569_v49 = vpop.f32.mrf.mxu1 }
 0x12b   : > { %7307 = vst [vmem:[#allocation12_spill] sm:$0xff] %v5567_v48  ;;  %v5575_v6 = vpop.f32.mrf.mxu2  ;;  %v5585_v27 = vpop.f32.mrf.mxu3  ;;  %v5853_v48 = vand.u32 4294901760, %v4233_v62 }
 0x12c   : > { %7308 = vst [vmem:[#allocation13_spill] sm:$0xff] %v5569_v49 }
 0x12d   : > { %1646 = vmatmul.f32.gmra.mxu0 %v1645_v20  ;;  %1787 = vmatmul.f32.gmra.mxu1 %v5531_v56  ;;  %7310 = vst [vmem:[#allocation15_spill] sm:$0xff] %v5575_v6  ;;  %v5838_v6 = vand.u32 4294901760, %v4234_v52 }
 0x12e   : > { %7313 = vst [vmem:[#allocation18_spill] sm:$0xff] %v5585_v27 }
 0x12f   : > { %1966 = vmatmul.f32.gmra.mxu3 %v1643_v3  ;;  %v5857_v26 = vsub.f32 %v4234_v52, %v5838_v6 }
 0x130   : > { %1882 = vmatmul.f32.gmra.mxu2 %v1642_v42 }
 0x131   : > { %v7229_v52 = vand.u32 4294901760, %v5857_v26 }
 0x132   : > { %v5579_v35 = vpop.f32.mrf.mxu0  ;;  %v5581_v7 = vpop.f32.mrf.mxu1 }
 0x133   : > { %7311 = vst [vmem:[#allocation16_spill] sm:$0xff] %v5579_v35  ;;  %v5591_v46 = vpop.f32.mrf.mxu2  ;;  %v5598_v30 = vpop.f32.mrf.mxu3 }
 0x134   : > { %7312 = vst [vmem:[#allocation17_spill] sm:$0xff] %v5581_v7 }
 0x135   : > { %1654 = vmatmul.f32.gmra.mxu0 %v1653_v54  ;;  %1791 = vmatmul.f32.gmra.mxu1 %v5541_v57  ;;  %7315 = vst [vmem:[#allocation20_spill] sm:$0xff] %v5591_v46 }
 0x136   : > { %7316 = vst [vmem:[#allocation21_spill] sm:$0xff] %v5598_v30 }
 0x137   : > { %1972 = vmatmul.f32.gmra.mxu3 %v1651_v1 }
 0x138   : > { %1887 = vmatmul.f32.gmra.mxu2 %v1650_v60 }
 0x13a   : > { %v5587_v50 = vpop.f32.mrf.mxu1  ;;  %v5589_v16 = vpop.f32.mrf.mxu0 }
 0x13b   : > { %7314 = vst [vmem:[#allocation19_spill] sm:$0xff] %v5587_v50  ;;  %v5600_v22 = vpop.f32.mrf.mxu2  ;;  %v5607_v4 = vpop.f32.mrf.mxu3  ;;  %v4238_v50 = vld [vmem:[%s7184_s2 + $0xd0] sm:$0xff] }
 0x13c   : > { %7317 = vst [vmem:[#allocation22_spill] sm:$0xff] %v5600_v22  ;;  %v5776_v27 = vand.u32 4294901760, %v4238_v50 }
 0x13d   : > { %1662 = vmatmul.f32.gmra.mxu0 %v1661_v40  ;;  %1795 = vmatmul.f32.gmra.mxu1 %v5553_v38  ;;  %7319 = vst [vmem:[#allocation24_spill] sm:$0xff] %v5607_v4 }
 0x13f   : > { %1978 = vmatmul.f32.gmra.mxu3 %v1659_v18 }
 0x140   : > { %1892 = vmatmul.f32.gmra.mxu2 %v1658_v39 }
 0x142   : > { %v5594_v8 = vpop.f32.mrf.mxu0  ;;  %v5596_v9 = vpop.f32.mrf.mxu1 }
 0x143   : > { %v5611_v3 = vpop.f32.mrf.mxu2  ;;  %v5619_v11 = vpop.f32.mrf.mxu3 }
 0x145   : > { %1670 = vmatmul.f32.gmra.mxu0 %v1669_v21  ;;  %1799 = vmatmul.f32.gmra.mxu1 %v5565_v14 }
 0x147   : > { %1984 = vmatmul.f32.gmra.mxu3 %v1667_v17 }
 0x148   : > { %1897 = vmatmul.f32.gmra.mxu2 %v1666_v12 }
 0x14a   : > { %v5603_v42 = vpop.f32.mrf.mxu0  ;;  %v5605_v0 = vpop.f32.mrf.mxu1 }
 0x14b   : > { %7318 = vst [vmem:[#allocation23_spill] sm:$0xff] %v5603_v42  ;;  %v5621_v20 = vpop.f32.mrf.mxu2  ;;  %v5629_v39 = vpop.f32.mrf.mxu3  ;;  %v2432_v42 = vsub.f32 %v5857_v26, %v7229_v52 }
 0x14c   : > { %7322 = vst [vmem:[#allocation27_spill] sm:$0xff] %v5621_v20 }
 0x14d   : > { %1803 = vmatmul.f32.gmra.mxu1 %v5577_v32  ;;  %2053 = vmatmul.f32.vlgmr.msra.gmra.mxu0 %v5455_v10  ;;  %7325 = vst [vmem:[#allocation30_spill] sm:$0xff] %v5629_v39  ;;  %v2433_v33 = vand.u32 4294901760, %v2432_v42  ;;  %v4229_v42 = vld [vmem:[%s7184_s2 + $0x88] sm:$0xff] }
 0x152   : > { %v5613_v2 = vpop.f32.mrf.mxu0  ;;  %v5615_v60 = vpop.f32.mrf.mxu1 }
 0x153   : > { %7320 = vst [vmem:[#allocation25_spill] sm:$0xff] %v5613_v2  ;;  %v5635_v18 = vpop.f32.mrf.mxu2  ;;  %v5643_v12 = vpop.f32.mrf.mxu3  ;;  %v4236_v2 = vld [vmem:[%s7184_s2 + $0xc0] sm:$0xff] }
 0x154   : > { %7321 = vst [vmem:[#allocation26_spill] sm:$0xff] %v5615_v60 }
 0x155   : > { %2057 = vmatmul.f32.gmra.mxu0 %v5476_v34  ;;  %2122 = vmatmul.f32.vlgmr.msra.gmra.mxu1 %v5455_v10  ;;  %7328 = vst [vmem:[#allocation33_spill] sm:$0xff] %v5635_v18 }
 0x156   : > { %7331 = vst [vmem:[#allocation36_spill] sm:$0xff] %v5643_v12 }
 0x15a   : > { %v5623_v1 = vpop.f32.mrf.mxu0  ;;  %v5625_v37 = vpop.f32.mrf.mxu1 }
 0x15b   : > { %7323 = vst [vmem:[#allocation28_spill] sm:$0xff] %v5623_v1  ;;  %v5645_v40 = vpop.f32.mrf.mxu2  ;;  %v5653_v44 = vpop.f32.mrf.mxu3 }
 0x15c   : > { %7324 = vst [vmem:[#allocation29_spill] sm:$0xff] %v5625_v37 }
 0x15d   : > { %2061 = vmatmul.f32.gmra.mxu0 %v5497_v31  ;;  %2126 = vmatmul.f32.gmra.mxu1 %v5476_v34  ;;  %7332 = vst [vmem:[#allocation37_spill] sm:$0xff] %v5645_v40 }
 0x15e   : > { %7335 = vst [vmem:[#allocation40_spill] sm:$0xff] %v5653_v44 }
 0x162   : > { %v5631_v23 = vpop.f32.mrf.mxu0  ;;  %v5633_v54 = vpop.f32.mrf.mxu1 }
 0x163   : > { %7326 = vst [vmem:[#allocation31_spill] sm:$0xff] %v5631_v23 }
 0x164   : > { %7327 = vst [vmem:[#allocation32_spill] sm:$0xff] %v5633_v54  ;;  %v4240_v54 = vld [vmem:[%s7184_s2 + $0xe0] sm:$0xff] }
 0x165   : > { %2065 = vmatmul.f32.gmra.mxu0 %v5516_v61  ;;  %2130 = vmatmul.f32.gmra.mxu1 %v5497_v31  ;;  %v5657_v31 = vpop.f32.mrf.mxu2  ;;  %v5742_v23 = vand.u32 4294901760, %v4240_v54 }
 0x166   : > { %7336 = vst [vmem:[#allocation41_spill] sm:$0xff] %v5657_v31 }
 0x16a   : > { %v5639_v10 = vpop.f32.mrf.mxu0  ;;  %v5641_v58 = vpop.f32.mrf.mxu1 }
 0x16b   : > { %7329 = vst [vmem:[#allocation34_spill] sm:$0xff] %v5639_v10 }
 0x16c   : > { %7330 = vst [vmem:[#allocation35_spill] sm:$0xff] %v5641_v58 }
 0x16d   : > { %2069 = vmatmul.f32.gmra.mxu0 %v5531_v56  ;;  %2134 = vmatmul.f32.gmra.mxu1 %v5516_v61  ;;  %v5665_v61 = vpop.f32.mrf.mxu3 }
 0x16e   : > { %7339 = vst [vmem:[#allocation44_spill] sm:$0xff] %v5665_v61 }
 0x172   : > { %v5649_v34 = vpop.f32.mrf.mxu0  ;;  %v5651_v17 = vpop.f32.mrf.mxu1 }
 0x173   : > { %7333 = vst [vmem:[#allocation38_spill] sm:$0xff] %v5649_v34  ;;  %v5667_v34 = vpop.f32.mrf.mxu2 }
 0x174   : > { %7334 = vst [vmem:[#allocation39_spill] sm:$0xff] %v5651_v17 }
 0x175   : > { %2073 = vmatmul.f32.gmra.mxu0 %v5541_v57  ;;  %2138 = vmatmul.f32.gmra.mxu1 %v5531_v56  ;;  %7340 = vst [vmem:[#allocation45_spill] sm:$0xff] %v5667_v34  ;;  %v4243_v56 = vld [vmem:[%s7184_s2 + $0xf8] sm:$0xff] }
 0x17a   : > { %v5659_v21 = vpop.f32.mrf.mxu0  ;;  %v5661_v4 = vpop.f32.mrf.mxu1 }
 0x17b   : > { %7337 = vst [vmem:[#allocation42_spill] sm:$0xff] %v5659_v21  ;;  %v5678_v21 = vand.u32 4294901760, %v4243_v56 }
 0x17c   : > { %7338 = vst [vmem:[#allocation43_spill] sm:$0xff] %v5661_v4  ;;  %v5680_v4 = vpop.f32.mrf.mxu3 }
 0x17d   : > { %2077 = vmatmul.f32.gmra.mxu0 %v5553_v38  ;;  %2142 = vmatmul.f32.gmra.mxu1 %v5541_v57  ;;  %7342 = vst [vmem:[#allocation47_spill] sm:$0xff] %v5680_v4  ;;  %v4242_v4 = vld [vmem:[%s7184_s2 + $0xf0] sm:$0xff] }
 0x17e   : > { %2271 = vmatpush.msra.mxu2 %v5678_v21  ;;  %2603 = vmatpush.msrb.mxu1 %v5678_v21  ;;  %v5703_v31 = vand.u32 4294901760, %v4242_v4 }
 0x180   : > { %2273 = vmatpush.msra.mxu2 %v5703_v31  ;;  %v5710_v30 = vsub.f32 %v4242_v4, %v5703_v31  ;;  %2605 = vmatpush.msrb.mxu1 %v5703_v31 }
 0x182   : > { %v5669_v40 = vpop.f32.mrf.mxu1  ;;  %v5671_v44 = vpop.f32.mrf.mxu0 }
 0x183   : > { %7341 = vst [vmem:[#allocation46_spill] sm:$0xff] %v5669_v40  ;;  %v5688_v40 = vsub.f32 %v4243_v56, %v5678_v21 }
 0x184   : > { %v5721_v12 = vpop.f32.mrf.mxu3 }
 0x185   : > { %2081 = vmatmul.f32.gmra.mxu0 %v5565_v14  ;;  %2146 = vmatmul.f32.gmra.mxu1 %v5553_v38  ;;  %v5691_v38 = vpop.f32.mrf.mxu2  ;;  %v7221_v34 = vand.u32 4294901760, %v5688_v40  ;;  %7345 = vst [vmem:[#allocation50_spill] sm:$0xff] %v5721_v12 }
 0x186   : > { %7343 = vst [vmem:[#allocation48_spill] sm:$0xff] %v5691_v38  ;;  %2510 = vmatpush.msrb.mxu0 %v5688_v40  ;;  %v4241_v38 = vld [vmem:[%s7184_s2 + $0xe8] sm:$0xff] }
 0x187   : > { %v2378_v56 = vsub.f32 %v5688_v40, %v7221_v34  ;;  %v7222_v34 = vand.u32 4294901760, %v5710_v30 }
 0x188   : > { %2513 = vmatpush.msrb.mxu0 %v5710_v30 }
 0x189   : > { %v2379_v22 = vand.u32 4294901760, %v2378_v56  ;;  %v2384_v4 = vsub.f32 %v5710_v30, %v7222_v34 }
 0x18a   : > { %v5682_v57 = vpop.f32.mrf.mxu0  ;;  %v5684_v61 = vpop.f32.mrf.mxu1 }
 0x18b   : > { %2380 = vmatpush.msra.mxu3 %v2379_v22  ;;  %v2385_v12 = vand.u32 4294901760, %v2384_v4  ;;  %v5750_v4 = vsub.f32 %v4240_v54, %v5742_v23 }
 0x18d   : > { %2085 = vmatmul.f32.gmra.mxu0 %v5577_v32  ;;  %2150 = vmatmul.f32.gmra.mxu1 %v5565_v14  ;;  %v5712_v14 = vand.u32 4294901760, %v4241_v38  ;;  %v5731_v10 = vpop.f32.mrf.mxu2 }
 0x18e   : > { %7346 = vst [vmem:[#allocation51_spill] sm:$0xff] %v5731_v10  ;;  %2386 = vmatpush.msra.mxu3 %v2385_v12  ;;  %v7224_v12 = vand.u32 4294901760, %v5750_v4 }
 0x18f   : > { %2275 = vmatpush.msra.mxu2 %v5712_v14  ;;  %v5724_v56 = vsub.f32 %v4241_v38, %v5712_v14  ;;  %2607 = vmatpush.msrb.mxu1 %v5712_v14 }
 0x190   : > { %v2396_v54 = vsub.f32 %v5750_v4, %v7224_v12 }
 0x191   : > { %v7223_v22 = vand.u32 4294901760, %v5724_v56  ;;  %2516 = vmatpush.msrb.mxu0 %v5724_v56  ;;  %2277 = vmatpush.msra.mxu2 %v5742_v23 }
 0x192   : > { %v5715_v17 = vpop.f32.mrf.mxu0  ;;  %v5717_v58 = vpop.f32.mrf.mxu1  ;;  %2609 = vmatpush.msrb.mxu1 %v5742_v23  ;;  %v2397_v46 = vand.u32 4294901760, %v2396_v54  ;;  %v5791_v54 = vsub.f32 %v4238_v50, %v5776_v27  ;;  %v4235_v50 = vld [vmem:[%s7184_s2 + $0xb8] sm:$0xff] }
 0x193   : > { %7344 = vst [vmem:[#allocation49_spill] sm:$0xff] %v5715_v17  ;;  %v2390_v38 = vsub.f32 %v5724_v56, %v7223_v22  ;;  %v4239_v22 = vld [vmem:[%s7184_s2 + $0xd8] sm:$0xff]  ;;  %2519 = vmatpush.msrb.mxu0 %v5750_v4  ;;  %v5819_v36 = vand.u32 4294901760, %v4235_v50 }
 0x194   : > { %v5757_v37 = vand.u32 4294901760, %v4239_v22 }
 0x195   : > { %2154 = vmatmul.f32.gmra.mxu1 %v5577_v32  ;;  %v2391_v34 = vand.u32 4294901760, %v2390_v38  ;;  %v5760_v38 = vpop.f32.mrf.mxu3  ;;  %v5770_v1 = vpop.f32.mrf.mxu2  ;;  %v5834_v7 = vsub.f32 %v4235_v50, %v5819_v36 }
 0x196   : > { %7349 = vst [vmem:[#allocation54_spill] sm:$0xff] %v5760_v38  ;;  %2279 = vmatpush.msra.mxu2 %v5757_v37  ;;  %2611 = vmatpush.msrb.mxu1 %v5757_v37 }
 0x197   : > { %2392 = vmatpush.msra.mxu3 %v2391_v34  ;;  %v5767_v34 = vsub.f32 %v4239_v22, %v5757_v37  ;;  %7350 = vst [vmem:[#allocation55_spill] sm:$0xff] %v5770_v1  ;;  %v4237_v22 = vld [vmem:[%s7184_s2 + $0xc8] sm:$0xff]  ;;  %v7228_v39 = vand.u32 4294901760, %v5834_v7 }
 0x198   : > { %2281 = vmatpush.msra.mxu2 %v5776_v27  ;;  %2613 = vmatpush.msrb.mxu1 %v5776_v27 }
 0x199   : > { %v7225_v38 = vand.u32 4294901760, %v5767_v34  ;;  %2522 = vmatpush.msrb.mxu0 %v5767_v34  ;;  %2398 = vmatpush.msra.mxu3 %v2397_v46  ;;  %v7226_v46 = vand.u32 4294901760, %v5791_v54 }
 0x19a   : > { %v5744_v10 = vpop.f32.mrf.mxu0  ;;  %v5746_v32 = vpop.f32.mrf.mxu1 }
 0x19b   : > { %7347 = vst [vmem:[#allocation52_spill] sm:$0xff] %v5744_v10  ;;  %v2402_v1 = vsub.f32 %v5767_v34, %v7225_v38  ;;  %v5793_v10 = vand.u32 4294901760, %v4237_v22  ;;  %2525 = vmatpush.msrb.mxu0 %v5791_v54 }
 0x19c   : > { %7348 = vst [vmem:[#allocation53_spill] sm:$0xff] %v5746_v32 }
 0x19d   : > { %2283 = vmatpush.msra.mxu2 %v5793_v10  ;;  %v5802_v38 = vsub.f32 %v4237_v22, %v5793_v10  ;;  %2615 = vmatpush.msrb.mxu1 %v5793_v10  ;;  %v5821_v13 = vpop.f32.mrf.mxu3 }
 0x19e   : > { %7353 = vst [vmem:[#allocation58_spill] sm:$0xff] %v5821_v13  ;;  %v5836_v13 = vpop.f32.mrf.mxu2 }
 0x19f   : > { %v7227_v35 = vand.u32 4294901760, %v5802_v38  ;;  %2528 = vmatpush.msrb.mxu0 %v5802_v38 }
 0x1a2   : > { %v5782_v12 = vpop.f32.mrf.mxu0  ;;  %v5784_v18 = vpop.f32.mrf.mxu1 }
 0x1a3   : > { %7351 = vst [vmem:[#allocation56_spill] sm:$0xff] %v5782_v12  ;;  %v2403_v12 = vand.u32 4294901760, %v2402_v1  ;;  %v2408_v1 = vsub.f32 %v5791_v54, %v7226_v46  ;;  %v2414_v46 = vsub.f32 %v5802_v38, %v7227_v35 }
 0x1a4   : > { %7352 = vst [vmem:[#allocation57_spill] sm:$0xff] %v5784_v18  ;;  %v5804_v18 = vand.u32 4294901760, %v4236_v2 }
 0x1a5   : > { %2404 = vmatpush.msra.mxu3 %v2403_v12  ;;  %v2409_v12 = vand.u32 4294901760, %v2408_v1  ;;  %v5901_v52 = vpop.f32.mrf.mxu3 }
 0x1a6   : > { %2285 = vmatpush.msra.mxu2 %v5804_v18  ;;  %v5817_v22 = vsub.f32 %v4236_v2, %v5804_v18  ;;  %2617 = vmatpush.msrb.mxu1 %v5804_v18  ;;  %v2415_v2 = vand.u32 4294901760, %v2414_v46  ;;  %v5919_v17 = vpop.f32.mrf.mxu2 }
 0x1a7   : > { %2410 = vmatpush.msra.mxu3 %v2409_v12  ;;  %v2426_v12 = vsub.f32 %v5834_v7, %v7228_v39 }
 0x1a8   : > { %2287 = vmatpush.msra.mxu2 %v5819_v36  ;;  %2531 = vmatpush.msrb.mxu0 %v5817_v22  ;;  %v7356_v50 = vand.u32 4294901760, %v5817_v22 }
 0x1a9   : > { %2619 = vmatpush.msrb.mxu1 %v5819_v36  ;;  %2416 = vmatpush.msra.mxu3 %v2415_v2  ;;  %v2427_v2 = vand.u32 4294901760, %v2426_v12 }
 0x1aa   : > { %v5845_v1 = vpop.f32.mrf.mxu0  ;;  %v5847_v35 = vpop.f32.mrf.mxu1  ;;  %v2420_v60 = vsub.f32 %v5817_v22, %v7356_v50  ;;  %2289 = vmatpush.msra.mxu2 %v5838_v6  ;;  %2534 = vmatpush.msrb.mxu0 %v5834_v7  ;;  %v5867_v50 = vsub.f32 %v4233_v62, %v5853_v48 }
 0x1ab   : > { %7354 = vst [vmem:[#allocation59_spill] sm:$0xff] %v5845_v1  ;;  %v4232_v1 = vld [vmem:[%s7184_s2 + $0xa0] sm:$0xff]  ;;  %2621 = vmatpush.msrb.mxu1 %v5838_v6 }
 0x1ac   : > { %7355 = vst [vmem:[#allocation60_spill] sm:$0xff] %v5847_v35  ;;  %v2421_v46 = vand.u32 4294901760, %v2420_v60  ;;  %v5869_v35 = vand.u32 4294901760, %v4232_v1  ;;  %2291 = vmatpush.msra.mxu2 %v5853_v48  ;;  %2537 = vmatpush.msrb.mxu0 %v5857_v26  ;;  %v4231_v60 = vld [vmem:[%s7184_s2 + $0x98] sm:$0xff]  ;;  %v7230_v39 = vand.u32 4294901760, %v5867_v50 }
 0x1ad   : > { %v5882_v41 = vand.u32 4294901760, %v4231_v60  ;;  %2623 = vmatpush.msrb.mxu1 %v5853_v48  ;;  %v5965_v20 = vpop.f32.mrf.mxu3 }
 0x1ae   : > { %7357 = vst [vmem:[#allocation61_spill] sm:$0xff] %v5869_v35  ;;  %2422 = vmatpush.msra.mxu3 %v2421_v46  ;;  %v5880_v62 = vsub.f32 %v4232_v1, %v5869_v35  ;;  %2293 = vmatpush.msra.mxu2 %v5869_v35  ;;  %v2438_v46 = vsub.f32 %v5867_v50, %v7230_v39 }
 0x1af   : > { %7358 = vst [vmem:[#allocation62_spill] sm:$0xff] %v5882_v41  ;;  %2540 = vmatpush.msrb.mxu0 %v5867_v50  ;;  %v5895_v12 = vsub.f32 %v4231_v60, %v5882_v41  ;;  %2625 = vmatpush.msrb.mxu1 %v5869_v35 }
 0x1b0   : > { %2428 = vmatpush.msra.mxu3 %v2427_v2  ;;  %2295 = vmatpush.msra.mxu2 %v5882_v41  ;;  %v5905_v2 = vand.u32 4294901760, %v4230_v24  ;;  %v2439_v60 = vand.u32 4294901760, %v2438_v46  ;;  %v7362_v49 = vand.u32 4294901760, %v5880_v62  ;;  %v5925_v46 = vand.u32 4294901760, %v4229_v42 }
 0x1b1   : > { %2543 = vmatpush.msrb.mxu0 %v5880_v62  ;;  %v7233_v32 = vand.u32 4294901760, %v5895_v12  ;;  %2627 = vmatpush.msrb.mxu1 %v5882_v41  ;;  %v4228_v41 = vld [vmem:[%s7184_s2 + $0x80] sm:$0xff] }
 0x1b2   : > { %7359 = vst [vmem:[#allocation63_spill] sm:$0xff] %v5905_v2  ;;  %v5907_v39 = vpop.f32.mrf.mxu0  ;;  %v5909_v1 = vpop.f32.mrf.mxu1  ;;  %v2444_v63 = vsub.f32 %v5880_v62, %v7362_v49  ;;  %2434 = vmatpush.msra.mxu3 %v2433_v33  ;;  %2297 = vmatpush.msra.mxu2 %v5905_v2  ;;  %v5937_v33 = vsub.f32 %v4229_v42, %v5925_v46 }
 0x1b3   : > { %7360 = vst [vmem:[#allocation64_spill] sm:$0xff] %v5907_v39  ;;  %v5922_v39 = vsub.f32 %v4230_v24, %v5905_v2  ;;  %2546 = vmatpush.msrb.mxu0 %v5895_v12  ;;  %v2450_v49 = vsub.f32 %v5895_v12, %v7233_v32  ;;  %2629 = vmatpush.msrb.mxu1 %v5905_v2 }
 0x1b4   : > { %7361 = vst [vmem:[#allocation65_spill] sm:$0xff] %v5909_v1  ;;  %v2445_v1 = vand.u32 4294901760, %v2444_v63  ;;  %2440 = vmatpush.msra.mxu3 %v2439_v60  ;;  %v5940_v63 = vand.u32 4294901760, %v4228_v41  ;;  %2299 = vmatpush.msra.mxu2 %v5925_v46  ;;  %v7237_v60 = vand.u32 4294901760, %v5937_v33 }
 0x1b5   : > { %7363 = vst [vmem:[#allocation66_spill] sm:$0xff] %v5925_v46  ;;  %v7235_v24 = vand.u32 4294901760, %v5922_v39  ;;  %2549 = vmatpush.msrb.mxu0 %v5922_v39  ;;  %v2451_v35 = vand.u32 4294901760, %v2450_v49  ;;  %2631 = vmatpush.msrb.mxu1 %v5925_v46  ;;  %v7367_v46 = vand.u32 4294901760, %v5688_v40  ;;  %v7370_v40 = vand.u32 4294901760, %v5750_v4 }
 0x1b6   : > { %7364 = vst [vmem:[#allocation67_spill] sm:$0xff] %v5940_v63  ;;  %2446 = vmatpush.msra.mxu3 %v2445_v1  ;;  %v5949_v2 = vsub.f32 %v4228_v41, %v5940_v63  ;;  %2301 = vmatpush.msra.mxu2 %v5940_v63  ;;  %v2462_v1 = vsub.f32 %v5937_v33, %v7237_v60  ;;  %v7368_v60 = vand.u32 4294901760, %v5710_v30  ;;  %v7371_v30 = vand.u32 4294901760, %v5767_v34 }
 0x1b7   : > { %v2456_v32 = vsub.f32 %v5922_v39, %v7235_v24  ;;  %2552 = vmatpush.msrb.mxu0 %v5937_v33  ;;  %2633 = vmatpush.msrb.mxu1 %v5940_v63  ;;  %v5972_v63 = vpop.f32.mrf.mxu2  ;;  %v1773_v4 = vadd.f32 %v5684_v61, %v5671_v44 }
 0x1b8   : > { %2452 = vmatpush.msra.mxu3 %v2451_v35  ;;  %v2467_v49 = vand.u32 4294901760, %v5949_v2  ;;  %2692 = vmatpush.msrb.mxu2 %v7367_v46  ;;  %v2463_v35 = vand.u32 4294901760, %v2462_v1 }
 0x1b9   : > { %v2457_v42 = vand.u32 4294901760, %v2456_v32  ;;  %2555 = vmatpush.msrb.mxu0 %v5949_v2  ;;  %v1859_v61 = vadd.f32 %v5836_v13, %v1773_v4  ;;  %v1249_v13 = vadd.f32 %v5594_v8, %v5511_v47 }
 0x1ba   : > { %v5959_v24 = vpop.f32.mrf.mxu0  ;;  %v5961_v41 = vpop.f32.mrf.mxu1  ;;  %v2468_v32 = vsub.f32 %v5949_v2, %v2467_v49  ;;  %2696 = vmatpush.msrb.mxu2 %v7368_v60 }
 0x1bb   : > { %7365 = vst [vmem:[#allocation68_spill] sm:$0xff] %v5959_v24  ;;  %2458 = vmatpush.msra.mxu3 %v2457_v42 }
 0x1bc   : > { %7366 = vst [vmem:[#allocation69_spill] sm:$0xff] %v5961_v41  ;;  %v2469_v24 = vand.u32 4294901760, %v2468_v32  ;;  %v7369_v41 = vand.u32 4294901760, %v5724_v56  ;;  %v7372_v56 = vand.u32 4294901760, %v5791_v54  ;;  %v7387_v32 = vld [vmem:[#allocation13_spill] sm:$0xff] }
 0x1bd   : > { %2464 = vmatpush.msra.mxu3 %v2463_v35 }
 0x1be   : > { %2700 = vmatpush.msrb.mxu2 %v7369_v41  ;;  %v7386_v41 = vld [vmem:[#allocation7_spill] sm:$0xff] }
 0x1bf   : > { %2470 = vmatpush.msra.mxu3 %v2469_v24  ;;  %v5989_v24 = vpop.f32.mrf.mxu3  ;;  %v5996_v60 = vpop.f32.mrf.mxu2 }
 0x1c0   : > { %2704 = vmatpush.msrb.mxu2 %v7370_v40 }
 0x1c1   : > { %2791 = vmatpush.msrb.mxu3 %v5678_v21  ;;  %v7373_v21 = vand.u32 4294901760, %v5802_v38  ;;  %v1329_v38 = vadd.f32 %v5605_v0, %v1249_v13  ;;  %v7380_v0 = vand.u32 4294901760, %v5922_v39  ;;  %v7384_v39 = vld [vmem:[#allocation49_spill] sm:$0xff] }
 0x1c2   : > { %v5979_v46 = vpop.f32.mrf.mxu0  ;;  %v5981_v42 = vpop.f32.mrf.mxu1  ;;  %2708 = vmatpush.msrb.mxu2 %v7371_v30  ;;  %v7391_v30 = vld [vmem:[#allocation23_spill] sm:$0xff] }
 0x1c3   : > { %2793 = vmatpush.msrb.mxu3 %v5703_v31  ;;  %v7374_v31 = vand.u32 4294901760, %v5817_v22 }
 0x1c4   : > { %2712 = vmatpush.msrb.mxu2 %v7372_v56 }
 0x1c5   : > { %2795 = vmatpush.msrb.mxu3 %v5712_v14  ;;  %v1244_v14 = vadd.f32 %v5589_v16, %v5491_v45  ;;  %v7377_v45 = vand.u32 4294901760, %v5867_v50 }
 0x1c6   : > { %2716 = vmatpush.msrb.mxu2 %v7373_v21 }
 0x1c7   : > { %2797 = vmatpush.msrb.mxu3 %v5742_v23  ;;  %v7375_v23 = vand.u32 4294901760, %v5834_v7  ;;  %v1323_v44 = vadd.f32 %v5596_v9, %v1244_v14  ;;  %v1777_v7 = vadd.f32 %v5717_v58, %v5682_v57  ;;  %v6020_v9 = vpop.f32.mrf.mxu3  ;;  %v7379_v57 = vand.u32 4294901760, %v5895_v12 }
 0x1c8   : > { %2720 = vmatpush.msrb.mxu2 %v7374_v31  ;;  %v7392_v31 = vld [vmem:[#allocation11_spill] sm:$0xff] }
 0x1c9   : > { %2799 = vmatpush.msrb.mxu3 %v5757_v37  ;;  %v7376_v37 = vand.u32 4294901760, %v5857_v26  ;;  %v1440_v16 = vadd.f32 %v5611_v3, %v1323_v44  ;;  %v7378_v26 = vand.u32 4294901760, %v5880_v62  ;;  %v863_v3 = vadd.f32 %v5519_v19, %v5313_v53  ;;  %v6042_v53 = vld [vmem:[%s7185_s3] ss:$0 sm:$0xff]  ;;  %v7385_v62 = vld [vmem:[#allocation53_spill] sm:$0xff] }
 0x1ca   : > { %v6003_v34 = vpop.f32.mrf.mxu1  ;;  %v2054_v54 = vpop.f32.mrf.mxu0  ;;  %2724 = vmatpush.msrb.mxu2 %v7375_v23  ;;  %v1864_v8 = vadd.f32 %v5919_v17, %v1777_v7  ;;  %v875_v17 = vadd.f32 %v5555_v5, %v5430_v15  ;;  %v1781_v12 = vadd.f32 %v7385_v62, %v7384_v39  ;;  %v7388_v5 = vld [vmem:[#allocation62_spill] sm:$0xff]  ;;  %v7394_v23 = vld [vmem:[#allocation12_spill] sm:$0xff]  ;;  %v7410_v39 = vld [vmem:[#allocation33_spill] sm:$0xff] }
 0x1cb   : > { %2801 = vmatpush.msrb.mxu3 %v5776_v27  ;;  %v1938_v27 = vadd.f32 %v5901_v52, %v1859_v61  ;;  %v1509_v47 = vadd.f32 %v5619_v11, %v1440_v16  ;;  %v932_v19 = vadd.f32 %v5535_v59, %v863_v3  ;;  %v6054_v11 = vld [vmem:[%s7186_s4] ss:$0 sm:$0xff]  ;;  %v7381_v52 = vld [vmem:[#allocation27_spill] sm:$0xff] }
 0x1cc   : > { %2728 = vmatpush.msrb.mxu2 %v7376_v37  ;;  %v944_v15 = vadd.f32 %v7387_v32, %v875_v17  ;;  %v7395_v61 = vld [vmem:[#allocation30_spill] sm:$0xff]  ;;  %v1869_v7 = vadd.f32 %v5972_v63, %v1781_v12 }
 0x1cd   : > { %2803 = vmatpush.msrb.mxu3 %v5793_v10  ;;  %v2055_v10 = vadd.f32 %v2054_v54, %v1938_v27  ;;  %v1017_v35 = vadd.f32 %v7386_v41, %v932_v19  ;;  %v7393_v54 = vld [vmem:[#allocation4_spill] sm:$0xff]  ;;  %v7397_v16 = vld [vmem:[#allocation26_spill] sm:$0xff] }
 0x1ce   : > { %2732 = vmatpush.msrb.mxu2 %v7377_v45  ;;  %v879_v44 = vadd.f32 %v7394_v23, %v7393_v54  ;;  %v1950_v12 = vadd.f32 %v5989_v24, %v1869_v7  ;;  %v7417_v23 = vld [vmem:[#allocation32_spill] sm:$0xff] }
 0x1cf   : > { %2805 = vmatpush.msrb.mxu3 %v5804_v18  ;;  %v6027_v18 = vpop.f32.mrf.mxu2 }
 0x1d0   : > { %2736 = vmatpush.msrb.mxu2 %v7378_v26 }
 0x1d1   : > { %2807 = vmatpush.msrb.mxu3 %v5819_v36  ;;  %v867_v36 = vadd.f32 %v5533_v29, %v5347_v51 }
 0x1d2   : > { %v2058_v22 = vpop.f32.mrf.mxu0  ;;  %v2123_v58 = vpop.f32.mrf.mxu1  ;;  %2740 = vmatpush.msrb.mxu2 %v7379_v57 }
 0x1d3   : > { %2809 = vmatpush.msrb.mxu3 %v5838_v6  ;;  %v2124_v50 = vadd.f32 %v2123_v58, %v2055_v10  ;;  %v871_v6 = vadd.f32 %v5543_v25, %v5384_v28  ;;  %v936_v51 = vadd.f32 %v5545_v55, %v867_v36  ;;  %v1444_v28 = vadd.f32 %v7381_v52, %v1329_v38  ;;  %v7382_v25 = vld [vmem:[#allocation61_spill] sm:$0xff]  ;;  %v7398_v10 = vld [vmem:[#allocation8_spill] sm:$0xff]  ;;  %v7399_v38 = vld [vmem:[#allocation15_spill] sm:$0xff] }
 0x1d4   : > { %2744 = vmatpush.msrb.mxu2 %v7380_v0  ;;  %v1944_v55 = vadd.f32 %v5965_v20, %v1864_v8  ;;  %v6075_v20 = vpop.f32.mrf.mxu3  ;;  %v1170_v3 = vadd.f32 %v7398_v10, %v1017_v35  ;;  %v7400_v58 = vld [vmem:[#allocation17_spill] sm:$0xff]  ;;  %v7402_v8 = vld [vmem:[#allocation10_spill] sm:$0xff]  ;;  %v7420_v10 = vld [vmem:[#allocation35_spill] sm:$0xff] }
 0x1d5   : > { %2811 = vmatpush.msrb.mxu3 %v5853_v48  ;;  %v2158_v29 = vadd.f32 %v2124_v50, %v1509_v47  ;;  %v940_v59 = vadd.f32 %v5557_v43, %v871_v6  ;;  %v7383_v48 = vand.u32 4294901760, %v5937_v33  ;;  %v7389_v43 = vld [vmem:[#allocation9_spill] sm:$0xff]  ;;  %v7390_v33 = vld [vmem:[#allocation6_spill] sm:$0xff]  ;;  %v1513_v37 = vadd.f32 %v7395_v61, %v1444_v28  ;;  %v7407_v28 = vld [vmem:[#allocation52_spill] sm:$0xff] }
 0x1d6   : > { %v1025_v40 = vadd.f32 %v7389_v43, %v936_v51  ;;  %v1254_v56 = vadd.f32 %v7391_v30, %v7390_v33  ;;  %v2059_v21 = vadd.f32 %v2058_v22, %v1944_v55  ;;  %v1041_v22 = vadd.f32 %v7399_v38, %v944_v15  ;;  %v7401_v47 = vld [vmem:[#allocation66_spill] sm:$0xff]  ;;  %v7404_v51 = vld [vmem:[#allocation5_spill] sm:$0xff]  ;;  %v7409_v55 = vld [vmem:[#allocation67_spill] sm:$0xff] }
 0x1d7   : > { %2813 = vmatpush.msrb.mxu3 %v7382_v25  ;;  %2748 = vmatpush.msrb.mxu2 %v7383_v48  ;;  %v2171_v1 = vmul.f32 %v6042_v53, %v2158_v29  ;;  %v1033_v14 = vadd.f32 %v7392_v31, %v940_v59  ;;  %v948_v57 = vadd.f32 %v7400_v58, %v879_v44  ;;  %v6088_v36 = vpop.f32.mrf.mxu2  ;;  %v7403_v0 = vld [vmem:[#allocation14_spill] sm:$0xff]  ;;  %v7405_v29 = vld [vmem:[#allocation16_spill] sm:$0xff]  ;;  %v7406_v59 = vld [vmem:[#allocation25_spill] sm:$0xff] }
 0x1d8   : > { %v1335_v27 = vadd.f32 %v7397_v16, %v1254_v56  ;;  %v1174_v50 = vadd.f32 %v7402_v8, %v1025_v40  ;;  %v883_v17 = vadd.f32 %v7405_v29, %v7404_v51  ;;  %v1259_v52 = vadd.f32 %v7406_v59, %v1170_v3  ;;  %v7408_v25 = vld [vmem:[#allocation57_spill] sm:$0xff]  ;;  %v7411_v35 = vld [vmem:[#allocation18_spill] sm:$0xff]  ;;  %v7412_v15 = vld [vmem:[#allocation20_spill] sm:$0xff] }
 0x1d9   : > { %2815 = vmatpush.msrb.mxu3 %v7388_v5  ;;  %2752 = vmatpush.msrb.mxu2 %v2467_v49  ;;  %v2184_v4 = vadd.f32 %v6054_v11, %v2171_v1  ;;  %v7396_v49 = vld [vmem:[#allocation63_spill] sm:$0xff]  ;;  %v1178_v63 = vadd.f32 %v7403_v0, %v1033_v14  ;;  %v1785_v48 = vadd.f32 %v7408_v25, %v7407_v28  ;;  %v7414_v33 = vld [vmem:[#allocation28_spill] sm:$0xff]  ;;  %v7415_v56 = vld [vmem:[#allocation29_spill] sm:$0xff] }
 0x1da   : > { %v2062_v45 = vpop.f32.mrf.mxu0  ;;  %v2127_v2 = vpop.f32.mrf.mxu1  ;;  %v1448_v62 = vadd.f32 %v7410_v39, %v1335_v27  ;;  %v1182_v32 = vadd.f32 %v7411_v35, %v1041_v22  ;;  %v1049_v5 = vadd.f32 %v7412_v15, %v948_v57  ;;  %v7413_v43 = vld [vmem:[#allocation19_spill] sm:$0xff]  ;;  %v1264_v30 = vadd.f32 %v7414_v33, %v1174_v50  ;;  %v7418_v61 = vld [vmem:[#allocation34_spill] sm:$0xff]  ;;  %v7419_v27 = vld [vmem:[#allocation36_spill] sm:$0xff] }
 0x1db   : > { %2817 = vmatpush.msrb.mxu3 %v7396_v49  ;;  %v2193_v13 = vmax.f32 %v2184_v4, 0.0  ;;  %v2128_v26 = vadd.f32 %v2127_v2, %v2059_v21  ;;  %v952_v40 = vadd.f32 %v7413_v43, %v883_v17  ;;  %v1341_v21 = vadd.f32 %v7415_v56, %v1259_v52  ;;  %v7416_v14 = vld [vmem:[#allocation31_spill] sm:$0xff]  ;;  %v7422_v57 = vld [vmem:[#allocation21_spill] sm:$0xff]  ;;  %v7426_v28 = vld [vmem:[#allocation56_spill] sm:$0xff] }
 0x1dc   : > { %v2063_v4 = vadd.f32 %v2062_v45, %v1950_v12  ;;  %v1269_v54 = vadd.f32 %v7416_v14, %v1178_v63  ;;  %v1347_v44 = vadd.f32 %v7417_v23, %v1264_v30  ;;  %v1874_v2 = vadd.f32 %v5996_v60, %v1785_v48  ;;  %v7421_v38 = vld [vmem:[#allocation39_spill] sm:$0xff]  ;;  %v6119_v58 = vpop.f32.mrf.mxu3  ;;  %v7424_v63 = vld [vmem:[#allocation37_spill] sm:$0xff]  ;;  %v7427_v25 = vld [vmem:[#allocation60_spill] sm:$0xff] }
 0x1dd   : > { %2819 = vmatpush.msrb.mxu3 %v7401_v47  ;;  %2202 = vst [vmem:[#allocation3 + $0x1] sm:$0xff] %v2193_v13  ;;  %v2159_v19 = vadd.f32 %v2128_v26, %v1513_v37  ;;  %v6092_v6 = vand.u32 4294901760, %v2193_v13  ;;  %v1274_v37 = vadd.f32 %v7418_v61, %v1182_v32  ;;  %v1517_v7 = vadd.f32 %v7419_v27, %v1448_v62  ;;  %v7425_v29 = vld [vmem:[#allocation41_spill] sm:$0xff]  ;;  %v7430_v35 = vld [vmem:[#allocation48_spill] sm:$0xff]  ;;  %v7431_v15 = vld [vmem:[#allocation59_spill] sm:$0xff] }
 0x1de   : > { %v1353_v3 = vadd.f32 %v7420_v10, %v1269_v54  ;;  %v1186_v47 = vadd.f32 %v7422_v57, %v1049_v5  ;;  %v1452_v51 = vadd.f32 %v7424_v63, %v1341_v21  ;;  %v1456_v17 = vadd.f32 %v7425_v29, %v1347_v44  ;;  %v7428_v62 = vld [vmem:[#allocation45_spill] sm:$0xff]  ;;  %v7433_v43 = vld [vmem:[#allocation64_spill] sm:$0xff]  ;;  %v7438_v44 = vld [vmem:[#allocation43_spill] sm:$0xff] }
 0x1df   : > { %2821 = vmatpush.msrb.mxu3 %v7409_v55  ;;  %v2172_v1 = vmul.f32 %v6042_v53, %v2159_v19  ;;  %v2303_v41 = vsub.f32 %v2193_v13, %v6092_v6  ;;  %v1359_v22 = vadd.f32 %v7421_v38, %v1274_v37  ;;  %v7423_v19 = vld [vmem:[#allocation22_spill] sm:$0xff]  ;;  %v1956_v59 = vadd.f32 %v6020_v9, %v1874_v2  ;;  %v1888_v52 = vpop.f32.mrf.mxu2  ;;  %v7432_v5 = vld [vmem:[#allocation65_spill] sm:$0xff]  ;;  %v7437_v54 = vld [vmem:[#allocation44_spill] sm:$0xff] }
 0x1e0   : > { %2472 = vmatmul.f32.vlgmr.msra.gmra.mxu3 %v6092_v6  ;;  %v1057_v0 = vadd.f32 %v7423_v19, %v952_v40  ;;  %v1789_v48 = vadd.f32 %v7427_v25, %v7426_v28  ;;  %v1460_v12 = vadd.f32 %v7428_v62, %v1353_v3  ;;  %v1793_v9 = vadd.f32 %v7432_v5, %v7431_v15  ;;  %v7434_v40 = vld [vmem:[#allocation69_spill] sm:$0xff]  ;;  %v7440_v10 = vld [vmem:[#allocation50_spill] sm:$0xff]  ;;  %v2242_v19 = vld [vmem:[%s7184_s2 + $0x70] sm:$0xff] }
 0x1e1   : > { %v2185_v31 = vadd.f32 %v6054_v11, %v2172_v1  ;;  %2558 = vmatmul.f32.vlgmr.msrb.gmra.mxu0 %v2303_v41  ;;  %v2304_v24 = vand.u32 4294901760, %v2303_v41  ;;  %v7429_v1 = vld [vmem:[#allocation38_spill] sm:$0xff]  ;;  %v1464_v32 = vadd.f32 %v7430_v35, %v1359_v22  ;;  %v1797_v33 = vadd.f32 %v7434_v40, %v7433_v43 }
 0x1e2   : > { %v2066_v49 = vpop.f32.mrf.mxu0  ;;  %v2131_v16 = vpop.f32.mrf.mxu1  ;;  %v6144_v23 = vadd.f32 %v7437_v54, %v1456_v17  ;;  %v7441_v38 = vld [vmem:[#allocation42_spill] sm:$0xff]  ;;  %v7443_v29 = vmov 0.0  }
 0x1e3   : > { %v2194_v13 = vmax.f32 %v2185_v31, 0.0  ;;  %v2132_v26 = vadd.f32 %v2131_v16, %v2063_v4  ;;  %2637 = vmatmul.f32.vlgmr.msrb.gmra.mxu1 %v2304_v24  ;;  %v2305_v45 = vsub.f32 %v2303_v41, %v2304_v24  ;;  %v1279_v41 = vadd.f32 %v7429_v1, %v1186_v47  ;;  %v7435_v4 = vld [vmem:[#allocation24_spill] sm:$0xff]  ;;  %v2240_v15 = vld [vmem:[%s7184_s2 + $0x60] sm:$0xff] }
 0x1e4   : > { %v2067_v30 = vadd.f32 %v2066_v49, %v1956_v59  ;;  %v1190_v31 = vadd.f32 %v7435_v4, %v1057_v0  ;;  %v7436_v24 = vld [vmem:[#allocation40_spill] sm:$0xff]  ;;  %v1879_v16 = vadd.f32 %v6027_v18, %v1789_v48  ;;  %v6155_v3 = vadd.f32 %v7440_v10, %v1464_v32  ;;  %v7442_v0 = vld [vmem:[#allocation51_spill] sm:$0xff] }
 0x1e5   : > { %2203 = vst [vmem:[#allocation3 + $0x9] sm:$0xff] %v2194_v13  ;;  %v2160_v8 = vadd.f32 %v2132_v26, %v1517_v7  ;;  %v2306_v50 = vand.u32 4294901760, %v2305_v45  ;;  %v6122_v60 = vand.u32 4294901760, %v2194_v13  ;;  %v1521_v14 = vadd.f32 %v7436_v24, %v1452_v51  ;;  %v7439_v26 = vld [vmem:[#allocation47_spill] sm:$0xff]  ;;  %v1973_v51 = vpop.f32.mrf.mxu3 }
 0x1e6   : > { %v1365_v61 = vadd.f32 %v7438_v44, %v1279_v41  ;;  %v6152_v45 = vadd.f32 %v7439_v26, %v1460_v12  ;;  %v1284_v22 = vadd.f32 %v7441_v38, %v1190_v31  ;;  %v1884_v18 = vadd.f32 %v6088_v36, %v1793_v9  ;;  %v2241_v48 = vld [vmem:[%s7184_s2 + $0x68] sm:$0xff]  ;;  %v2239_v31 = vld [vmem:[%s7184_s2 + $0x58] sm:$0xff] }
 0x1e7   : > { %v2173_v55 = vmul.f32 %v6042_v53, %v2160_v8  ;;  %2307 = vmatmul.f32.vlgmr.msra.gmra.mxu2 %v2306_v50  ;;  %v2311_v39 = vsub.f32 %v2194_v13, %v6122_v60  ;;  %v2243_v13 = vld [vmem:[%s7184_s2 + $0x78] sm:$0xff]  ;;  %v1889_v47 = vadd.f32 %v1888_v52, %v1797_v33  ;;  %v6172_v36 = vand.u32 4294901760, %v2242_v19  ;;  %v7444_v52 = vld [vmem:[#allocation68_spill] sm:$0xff]  ;;  %v1893_v62 = vpop.f32.mrf.mxu2 }
 0x1e8   : > { %2476 = vmatmul.f32.gmra.mxu3 %v6122_v60  ;;  %v6158_v57 = vand.u32 4294901760, %v2243_v13  ;;  %v6165_v63 = vadd.f32 %v7442_v0, %v1365_v61  ;;  %v1962_v59 = vadd.f32 %v6075_v20, %v1879_v16  ;;  %v1801_v28 = vadd.f32 %v5981_v42, %v7444_v52 }
 0x1e9   : > { %v2186_v56 = vadd.f32 %v6054_v11, %v2173_v55  ;;  %2563 = vmatmul.f32.gmra.mxu0 %v2311_v39  ;;  %v2312_v21 = vand.u32 4294901760, %v2311_v39  ;;  %v7445_v55 = vld [vmem:[#allocation46_spill] sm:$0xff]  ;;  %v6188_v12 = vand.u32 4294901760, %v2241_v48  ;;  %v6191_v42 = vsub.f32 %v2242_v19, %v6172_v36 }
 0x1ea   : > { %v2070_v37 = vpop.f32.mrf.mxu0  ;;  %v2135_v2 = vpop.f32.mrf.mxu1  ;;  %2860 = vmatpush.msra.mxu0 %v6158_v57  ;;  %v6170_v17 = vsub.f32 %v2243_v13, %v6158_v57  ;;  %3192 = vmatpush.msra.mxu3 %v6158_v57  ;;  %v1968_v1 = vadd.f32 %v6119_v58, %v1884_v18  ;;  %v6195_v41 = vadd.f32 %v1973_v51, %v1889_v47  ;;  %v6207_v40 = vand.u32 4294901760, %v2240_v15 }
 0x1eb   : > { %v2195_v27 = vmax.f32 %v2186_v56, 0.0  ;;  %v2136_v7 = vadd.f32 %v2135_v2, %v2067_v30  ;;  %2643 = vmatmul.f32.gmra.mxu1 %v2312_v21  ;;  %v2313_v49 = vsub.f32 %v2311_v39, %v2312_v21  ;;  %v6184_v39 = vadd.f32 %v7445_v55, %v1284_v22  ;;  %v2238_v2 = vld [vmem:[%s7184_s2 + $0x50] sm:$0xff]  ;;  %v2237_v22 = vld [vmem:[%s7184_s2 + $0x48] sm:$0xff] }
 0x1ec   : > { %2862 = vmatpush.msra.mxu0 %v6172_v36  ;;  %v2966_v20 = vand.u32 4294901760, %v6170_v17  ;;  %3099 = vmatpush.msra.mxu2 %v6170_v17  ;;  %v2071_v35 = vadd.f32 %v2070_v37, %v1962_v59  ;;  %v7250_v58 = vand.u32 4294901760, %v6191_v42  ;;  %v6210_v33 = vsub.f32 %v2241_v48, %v6188_v12 }
 0x1ed   : > { %2204 = vst [vmem:[#allocation3 + $0x11] sm:$0xff] %v2195_v27  ;;  %v2161_v8 = vadd.f32 %v2136_v7, %v1521_v14  ;;  %v2314_v50 = vand.u32 4294901760, %v2313_v49  ;;  %3194 = vmatpush.msra.mxu3 %v6172_v36  ;;  %v1894_v30 = vadd.f32 %v1893_v62, %v1801_v28  ;;  %v6215_v56 = vadd.f32 %v6003_v34, %v5979_v46  ;;  %v1979_v18 = vpop.f32.mrf.mxu3  ;;  %v2236_v28 = vld [vmem:[%s7184_s2 + $0x40] sm:$0xff] }
 0x1ee   : > { %2212 = vst [vmem:[#allocation3 + $0x11] sm:$0x1] %v7443_v29  ;;  %v2967_v43 = vsub.f32 %v6170_v17, %v2966_v20  ;;  %2864 = vmatpush.msra.mxu0 %v6188_v12  ;;  %3102 = vmatpush.msra.mxu2 %v6191_v42  ;;  %v2973_v14 = vsub.f32 %v6191_v42, %v7250_v58  ;;  %v7248_v54 = vand.u32 4294901760, %v6210_v33  ;;  %v6226_v44 = vand.u32 4294901760, %v2239_v31 }
 0x1ef   : > { %2213 = vst [vmem:[#allocation3 + $0x12] sm:$0x1] %v7443_v29  ;;  %v2174_v25 = vmul.f32 %v6042_v53, %v2161_v8  ;;  %2315 = vmatmul.f32.gmra.mxu2 %v2314_v50  ;;  %3196 = vmatpush.msra.mxu3 %v6188_v12  ;;  %v6233_v37 = vsub.f32 %v2240_v15, %v6207_v40  ;;  %v6262_v50 = vand.u32 4294901760, %v2237_v22  ;;  %v1898_v15 = vpop.f32.mrf.mxu2 }
 0x1f0   : > { %v2968_v24 = vand.u32 4294901760, %v2967_v43  ;;  %2866 = vmatpush.msra.mxu0 %v6207_v40  ;;  %3105 = vmatpush.msra.mxu2 %v6210_v33  ;;  %v2974_v27 = vand.u32 4294901760, %v2973_v14  ;;  %v2979_v7 = vsub.f32 %v6210_v33, %v7248_v54  ;;  %v6246_v49 = vsub.f32 %v2239_v31, %v6226_v44 }
 0x1f1   : > { %v2187_v32 = vadd.f32 %v6054_v11, %v2174_v25  ;;  %3198 = vmatpush.msra.mxu3 %v6207_v40  ;;  %v7247_v38 = vand.u32 4294901760, %v6233_v37 }
 0x1f2   : > { %v2074_v5 = vpop.f32.mrf.mxu0  ;;  %v2139_v9 = vpop.f32.mrf.mxu1  ;;  %2969 = vmatpush.msra.mxu1 %v2968_v24  ;;  %2868 = vmatpush.msra.mxu0 %v6226_v44  ;;  %v2980_v47 = vand.u32 4294901760, %v2979_v7  ;;  %v7246_v8 = vand.u32 4294901760, %v6246_v49 }
 0x1f3   : > { %v2196_v21 = vmax.f32 %v2187_v32, 0.0  ;;  %v2140_v4 = vadd.f32 %v2139_v9, %v2071_v35  ;;  %v2075_v46 = vadd.f32 %v2074_v5, %v1968_v1  ;;  %3108 = vmatpush.msra.mxu2 %v6233_v37  ;;  %3200 = vmatpush.msra.mxu3 %v6226_v44  ;;  %v2985_v52 = vsub.f32 %v6233_v37, %v7247_v38 }
 0x1f4   : > { %2975 = vmatpush.msra.mxu1 %v2974_v27  ;;  %v2991_v55 = vsub.f32 %v6246_v49, %v7246_v8  ;;  %v6283_v1 = vand.u32 4294901760, %v2236_v28  ;;  %v6286_v35 = vsub.f32 %v2237_v22, %v6262_v50  ;;  %v1980_v32 = vadd.f32 %v1979_v18, %v1894_v30 }
 0x1f5   : > { %2205 = vst [vmem:[#allocation3 + $0x19] sm:$0xff] %v2196_v21  ;;  %v2162_v34 = vadd.f32 %v2140_v4, %v6144_v23  ;;  %v6230_v61 = vand.u32 4294901760, %v2196_v21  ;;  %v6243_v23 = vand.u32 4294901760, %v2238_v2  ;;  %3111 = vmatpush.msra.mxu2 %v6246_v49  ;;  %v2986_v31 = vand.u32 4294901760, %v2985_v52 }
 0x1f6   : > { %v2246_v16 = vld [vmem:[#allocation3 + $0x11] sm:$0xff]  ;;  %2981 = vmatpush.msra.mxu1 %v2980_v47  ;;  %v2992_v24 = vand.u32 4294901760, %v2991_v55  ;;  %v6311_v27 = vadd.f32 %v1898_v15, %v6215_v56 }
 0x1f7   : > { %v2175_v13 = vmul.f32 %v6042_v53, %v2162_v34  ;;  %v6249_v26 = vand.u32 4294901760, %v2246_v16  ;;  %v6252_v10 = vsub.f32 %v2196_v21, %v6230_v61  ;;  %2870 = vmatpush.msra.mxu0 %v6243_v23  ;;  %v6265_v19 = vsub.f32 %v2238_v2, %v6243_v23  ;;  %v2235_v21 = vld [vmem:[%s7184_s2 + $0x38] sm:$0xff]  ;;  %3202 = vmatpush.msra.mxu3 %v6243_v23 }
 0x1f8   : > { %v7244_v34 = vand.u32 4294901760, %v6286_v35  ;;  %v6304_v2 = vand.u32 4294901760, %v2235_v21  ;;  %2987 = vmatpush.msra.mxu1 %v2986_v31 }
 0x1f9   : > { %v2188_v0 = vadd.f32 %v6054_v11, %v2175_v13  ;;  %2480 = vmatmul.f32.gmra.mxu3 %v6249_v26  ;;  %v2319_v51 = vsub.f32 %v2246_v16, %v6249_v26  ;;  %v2328_v59 = vand.u32 4294901760, %v6252_v10  ;;  %2872 = vmatpush.msra.mxu0 %v6262_v50  ;;  %v7245_v62 = vand.u32 4294901760, %v6265_v19  ;;  %v2234_v16 = vld [vmem:[%s7184_s2 + $0x30] sm:$0xff] }
 0x1fa   : > { %v2078_v25 = vpop.f32.mrf.mxu0  ;;  %v2143_v48 = vpop.f32.mrf.mxu1  ;;  %3114 = vmatpush.msra.mxu2 %v6265_v19  ;;  %v6317_v13 = vand.u32 4294901760, %v2234_v16  ;;  %3204 = vmatpush.msra.mxu3 %v6262_v50  ;;  %v3003_v56 = vsub.f32 %v6286_v35, %v7244_v34  ;;  %v6327_v47 = vsub.f32 %v2235_v21, %v6304_v2 }
 0x1fb   : > { %v2197_v5 = vmax.f32 %v2188_v0, 0.0  ;;  %v2144_v9 = vadd.f32 %v2143_v48, %v2075_v46  ;;  %2568 = vmatmul.f32.gmra.mxu0 %v2319_v51  ;;  %v2320_v43 = vand.u32 4294901760, %v2319_v51  ;;  %v6295_v4 = vsub.f32 %v6252_v10, %v2328_v59  ;;  %v2233_v0 = vld [vmem:[%s7184_s2 + $0x28] sm:$0xff]  ;;  %2993 = vmatpush.msra.mxu1 %v2992_v24 }
 0x1fc   : > { %v2997_v30 = vsub.f32 %v6265_v19, %v7245_v62  ;;  %2874 = vmatpush.msra.mxu0 %v6283_v1  ;;  %3117 = vmatpush.msra.mxu2 %v6286_v35  ;;  %v6337_v48 = vsub.f32 %v2234_v16, %v6317_v13  ;;  %v1985_v62 = vpop.f32.mrf.mxu3 }
 0x1fd   : > { %2206 = vst [vmem:[#allocation3 + $0x21] sm:$0xff] %v2197_v5  ;;  %v2163_v14 = vadd.f32 %v2144_v9, %v6152_v45  ;;  %2649 = vmatmul.f32.gmra.mxu1 %v2320_v43  ;;  %v2321_v46 = vsub.f32 %v2319_v51, %v2320_v43  ;;  %v6315_v45 = vsub.f32 %v2236_v28, %v6283_v1  ;;  %v6334_v28 = vand.u32 4294901760, %v2233_v0 }
 0x1fe   : > { %2214 = vst [vmem:[#allocation3 + $0x23] sm:$0x1] %v7443_v29  ;;  %v2998_v7 = vand.u32 4294901760, %v2997_v30  ;;  %2876 = vmatpush.msra.mxu0 %v6304_v2  ;;  %v2079_v51 = vadd.f32 %v2078_v25, %v6195_v41  ;;  %v2330_v15 = vand.u32 4294901760, %v6295_v4  ;;  %v3004_v5 = vand.u32 4294901760, %v3003_v56  ;;  %v2232_v25 = vld [vmem:[%s7184_s2 + $0x20] sm:$0xff]  ;;  %3206 = vmatpush.msra.mxu3 %v6283_v1 }
 0x1ff   : > { %2215 = vst [vmem:[#allocation3 + $0x24] sm:$0x1] %v7443_v29  ;;  %v2176_v22 = vmul.f32 %v6042_v53, %v2163_v14  ;;  %v2322_v18 = vand.u32 4294901760, %v2321_v46  ;;  %v7242_v52 = vand.u32 4294901760, %v6315_v45  ;;  %3120 = vmatpush.msra.mxu2 %v6315_v45  ;;  %v7241_v41 = vand.u32 4294901760, %v6327_v47 }
 0x200   : > { %2999 = vmatpush.msra.mxu1 %v2998_v7  ;;  %2878 = vmatpush.msra.mxu0 %v6317_v13  ;;  %v7240_v31 = vand.u32 4294901760, %v6337_v48  ;;  %v6352_v24 = vand.u32 4294901760, %v2232_v25  ;;  %v6355_v4 = vsub.f32 %v2233_v0, %v6334_v28  ;;  %v2231_v7 = vld [vmem:[%s7184_s2 + $0x18] sm:$0xff] }
 0x201   : > { %v2189_v55 = vadd.f32 %v6054_v11, %v2176_v22  ;;  %2323 = vmatmul.f32.gmra.mxu2 %v2322_v18  ;;  %2484 = vmatmul.f32.gmra.mxu3 %v6230_v61  ;;  %v3009_v21 = vsub.f32 %v6315_v45, %v7242_v52  ;;  %v3015_v16 = vsub.f32 %v6327_v47, %v7241_v41  ;;  %v6370_v56 = vand.u32 4294901760, %v2231_v7 }
 0x202   : > { %v2082_v9 = vpop.f32.mrf.mxu0  ;;  %v2147_v43 = vpop.f32.mrf.mxu1  ;;  %3005 = vmatpush.msra.mxu1 %v3004_v5  ;;  %2880 = vmatpush.msra.mxu0 %v6334_v28  ;;  %v7239_v18 = vand.u32 4294901760, %v6355_v4  ;;  %v6378_v5 = vsub.f32 %v2232_v25, %v6352_v24 }
 0x203   : > { %v2198_v30 = vmax.f32 %v2189_v55, 0.0  ;;  %v2083_v14 = vadd.f32 %v2082_v9, %v1980_v32  ;;  %v2148_v46 = vadd.f32 %v2147_v43, %v2079_v51  ;;  %2573 = vmatmul.f32.gmra.mxu0 %v6252_v10  ;;  %v3010_v22 = vand.u32 4294901760, %v3009_v21  ;;  %v2230_v9 = vld [vmem:[%s7184_s2 + $0x10] sm:$0xff]  ;;  %3123 = vmatpush.msra.mxu2 %v6327_v47 }
 0x204   : > { %v3021_v32 = vsub.f32 %v6337_v48, %v7240_v31  ;;  %v3016_v55 = vand.u32 4294901760, %v3015_v16  ;;  %2882 = vmatpush.msra.mxu0 %v6352_v24  ;;  %v6388_v10 = vand.u32 4294901760, %v2230_v9  ;;  %3208 = vmatpush.msra.mxu3 %v6304_v2 }
 0x205   : > { %2207 = vst [vmem:[#allocation3 + $0x29] sm:$0xff] %v2198_v30  ;;  %v2164_v0 = vadd.f32 %v2148_v46, %v6155_v3  ;;  %2655 = vmatmul.f32.gmra.mxu1 %v2328_v59  ;;  %v6375_v51 = vand.u32 4294901760, %v2198_v30  ;;  %v3027_v3 = vsub.f32 %v6355_v4, %v7239_v18  ;;  %v6391_v59 = vsub.f32 %v2231_v7, %v6370_v56 }
 0x206   : > { %v2248_v43 = vld [vmem:[#allocation3 + $0x21] sm:$0xff]  ;;  %3011 = vmatpush.msra.mxu1 %v3010_v22  ;;  %v3022_v21 = vand.u32 4294901760, %v3021_v32  ;;  %v7243_v22 = vand.u32 4294901760, %v6378_v5  ;;  %3126 = vmatpush.msra.mxu2 %v6337_v48 }
 0x207   : > { %v2177_v25 = vmul.f32 %v6042_v53, %v2164_v0  ;;  %v6394_v46 = vand.u32 4294901760, %v2248_v43  ;;  %v6397_v16 = vsub.f32 %v2198_v30, %v6375_v51  ;;  %v2229_v32 = vld [vmem:[%s7184_s2 + $0x8] sm:$0xff]  ;;  %v3028_v7 = vand.u32 4294901760, %v3027_v3  ;;  %2884 = vmatpush.msra.mxu0 %v6370_v56  ;;  %v2228_v3 = vld [vmem:[%s7184_s2] sm:$0xff]  ;;  %3210 = vmatpush.msra.mxu3 %v6317_v13 }
 0x208   : > { %3017 = vmatpush.msra.mxu1 %v3016_v55  ;;  %v7249_v0 = vand.u32 4294901760, %v6391_v59  ;;  %v6407_v18 = vand.u32 4294901760, %v2229_v32  ;;  %v6410_v30 = vsub.f32 %v2230_v9, %v6388_v10  ;;  %v3033_v55 = vsub.f32 %v6378_v5, %v7243_v22  ;;  %v7446_v22 = vld [vmem:[#allocation54_spill] sm:$0xff]  ;;  %3129 = vmatpush.msra.mxu2 %v6355_v4 }
 0x209   : > { %v2190_v31 = vadd.f32 %v6054_v11, %v2177_v25  ;;  %2331 = vmatmul.f32.gmra.mxu2 %v2330_v15  ;;  %2488 = vmatmul.f32.gmra.mxu3 %v6394_v46  ;;  %v2335_v41 = vsub.f32 %v2248_v43, %v6394_v46  ;;  %v6426_v25 = vand.u32 4294901760, %v2228_v3  ;;  %v1537_v34 = vadd.f32 %v7446_v22, %v6165_v63 }
 0x20a   : > { %v2151_v52 = vpop.f32.mrf.mxu1  ;;  %3023 = vmatpush.msra.mxu1 %v3022_v21  ;;  %2886 = vmatpush.msra.mxu0 %v6388_v10  ;;  %v3039_v15 = vsub.f32 %v6391_v59, %v7249_v0  ;;  %v3044_v9 = vand.u32 4294901760, %v6410_v30  ;;  %v6429_v43 = vsub.f32 %v2229_v32, %v6407_v18  ;;  %v3034_v54 = vand.u32 4294901760, %v3033_v55  ;;  %v2086_v55 = vpop.f32.mrf.mxu0 }
 0x20b   : > { %v2199_v8 = vmax.f32 %v2190_v31, 0.0  ;;  %v2152_v38 = vadd.f32 %v2151_v52, %v2083_v14  ;;  %2578 = vmatmul.f32.gmra.mxu0 %v2335_v41  ;;  %v2336_v21 = vand.u32 4294901760, %v2335_v41  ;;  %v6440_v52 = vsub.f32 %v2228_v3, %v6426_v25  ;;  %v7447_v14 = vld [vmem:[#allocation55_spill] sm:$0xff]  ;;  %3212 = vmatpush.msra.mxu3 %v6334_v28 }
 0x20c   : > { %3029 = vmatpush.msra.mxu1 %v3028_v7  ;;  %v3040_v0 = vand.u32 4294901760, %v3039_v15  ;;  %2888 = vmatpush.msra.mxu0 %v6407_v18  ;;  %v3045_v32 = vsub.f32 %v6410_v30, %v3044_v9  ;;  %v3050_v31 = vand.u32 4294901760, %v6429_v43  ;;  %v1472_v22 = vadd.f32 %v7447_v14, %v6184_v39 }
 0x20d   : > { %2208 = vst [vmem:[#allocation3 + $0x31] sm:$0xff] %v2199_v8  ;;  %v2165_v58 = vadd.f32 %v2152_v38, %v1537_v34  ;;  %2661 = vmatmul.f32.gmra.mxu1 %v2336_v21  ;;  %v2337_v63 = vsub.f32 %v2335_v41, %v2336_v21  ;;  %v1986_v7 = vadd.f32 %v1985_v62, %v6311_v27  ;;  %v2344_v15 = vand.u32 4294901760, %v6397_v16  ;;  %v7448_v41 = vld [vmem:[#allocation58_spill] sm:$0xff] }
 0x20e   : > { %2216 = vst [vmem:[#allocation3 + $0x35] sm:$0x1] %v7443_v29  ;;  %3035 = vmatpush.msra.mxu1 %v3034_v54  ;;  %v3046_v8 = vand.u32 4294901760, %v3045_v32  ;;  %2890 = vmatpush.msra.mxu0 %v6426_v25  ;;  %v3051_v39 = vsub.f32 %v6429_v43, %v3050_v31  ;;  %v3056_v62 = vand.u32 4294901760, %v6440_v52  ;;  %v1541_v3 = vadd.f32 %v7448_v41, %v1472_v22 }
 0x20f   : > { %2217 = vst [vmem:[#allocation3 + $0x36] sm:$0x1] %v7443_v29  ;;  %v2178_v38 = vmul.f32 %v6042_v53, %v2165_v58  ;;  %v2338_v34 = vand.u32 4294901760, %v2337_v63  ;;  %v2087_v54 = vadd.f32 %v2086_v55, %v1986_v7  ;;  %3132 = vmatpush.msra.mxu2 %v6378_v5  ;;  %v7449_v63 = vand.u32 4294901760, %v6191_v42  ;;  %3214 = vmatpush.msra.mxu3 %v6352_v24 }
 0x210   : > { %3281 = vmatpush.msrb.mxu0 %v2966_v20  ;;  %3041 = vmatpush.msra.mxu1 %v3040_v0  ;;  %v3052_v58 = vand.u32 4294901760, %v3051_v39  ;;  %v3057_v27 = vsub.f32 %v6440_v52, %v3056_v62  ;;  %v2345_v0 = vsub.f32 %v6397_v16, %v2344_v15  ;;  %v7450_v7 = vand.u32 4294901760, %v6210_v33 }
 0x211   : > { %v2191_v29 = vadd.f32 %v6054_v11, %v2178_v38  ;;  %2339 = vmatmul.f32.gmra.mxu2 %v2338_v34  ;;  %2492 = vmatmul.f32.gmra.mxu3 %v6375_v51  ;;  %v7451_v42 = vand.u32 4294901760, %v6233_v37  ;;  %v7452_v33 = vand.u32 4294901760, %v6246_v49  ;;  %v7454_v49 = vand.u32 4294901760, %v6286_v35 }
 0x212   : > { %v2155_v17 = vpop.f32.mrf.mxu1  ;;  %3047 = vmatpush.msra.mxu1 %v3046_v8  ;;  %v3058_v32 = vand.u32 4294901760, %v3057_v27  ;;  %3285 = vmatpush.msrb.mxu0 %v7449_v63 }
 0x213   : > { %v2200_v20 = vmax.f32 %v2191_v29, 0.0  ;;  %v2156_v21 = vadd.f32 %v2155_v17, %v2087_v54  ;;  %2583 = vmatmul.f32.gmra.mxu0 %v6397_v16  ;;  %v2346_v16 = vand.u32 4294901760, %v2345_v0  ;;  %3135 = vmatpush.msra.mxu2 %v6391_v59 }
 0x214   : > { %3053 = vmatpush.msra.mxu1 %v3052_v58  ;;  %3289 = vmatpush.msrb.mxu0 %v7450_v7 }
 0x215   : > { %2209 = vst [vmem:[#allocation3 + $0x39] sm:$0xff] %v2200_v20  ;;  %v2166_v14 = vadd.f32 %v2156_v21, %v1541_v3  ;;  %2667 = vmatmul.f32.gmra.mxu1 %v2344_v15  ;;  %v6475_v38 = vand.u32 4294901760, %v2200_v20  ;;  %3216 = vmatpush.msra.mxu3 %v6370_v56 }
 0x216   : > { %v2250_v22 = vld [vmem:[#allocation3 + $0x31] sm:$0xff]  ;;  %3059 = vmatpush.msra.mxu1 %v3058_v32  ;;  %3293 = vmatpush.msrb.mxu0 %v7451_v42 }
 0x217   : > { %v2179_v55 = vmul.f32 %v6042_v53, %v2166_v14  ;;  %v6473_v8 = vand.u32 4294901760, %v2250_v22  ;;  %v2359_v37 = vsub.f32 %v2200_v20, %v6475_v38  ;;  %3138 = vmatpush.msra.mxu2 %v6410_v30  ;;  %3218 = vmatpush.msra.mxu3 %v6388_v10  ;;  %v2224_v14 = vld [vmem:[#allocation3 + $0x28] sm:$0xff]  ;;  %v2225_v42 = vld [vmem:[#allocation3 + $0x30] sm:$0xff] }
 0x218   : > { %3380 = vmatpush.msrb.mxu1 %v6158_v57  ;;  %3297 = vmatpush.msrb.mxu0 %v7452_v33  ;;  %v6588_v7 = vand.u32 4294901760, %v2224_v14 }
 0x219   : > { %v2192_v15 = vadd.f32 %v6054_v11, %v2179_v55  ;;  %2347 = vmatmul.f32.gmra.mxu2 %v2346_v16  ;;  %2496 = vmatmul.f32.gmra.mxu3 %v6473_v8  ;;  %v2351_v53 = vsub.f32 %v2250_v22, %v6473_v8  ;;  %v7453_v11 = vand.u32 4294901760, %v6265_v19  ;;  %v2360_v29 = vand.u32 4294901760, %v2359_v37 }
 0x21a   : > { %3382 = vmatpush.msrb.mxu1 %v6172_v36  ;;  %v2219_v36 = vld [vmem:[#allocation3] sm:$0xff]  ;;  %3220 = vmatpush.msra.mxu3 %v6407_v18  ;;  %v6595_v16 = vsub.f32 %v2224_v14, %v6588_v7 }
 0x21b   : > { %v2201_v57 = vmax.f32 %v2192_v15, 0.0  ;;  %2588 = vmatmul.f32.gmra.mxu0 %v2351_v53  ;;  %v2352_v34 = vand.u32 4294901760, %v2351_v53  ;;  %3141 = vmatpush.msra.mxu2 %v6429_v43  ;;  %v6503_v19 = vand.u32 4294901760, %v2219_v36  ;;  %v2361_v35 = vsub.f32 %v2359_v37, %v2360_v29 }
 0x21c   : > { %3384 = vmatpush.msrb.mxu1 %v6188_v12  ;;  %3301 = vmatpush.msrb.mxu0 %v7453_v11  ;;  %v7455_v12 = vand.u32 4294901760, %v6315_v45  ;;  %v2933_v15 = vand.u32 4294901760, %v6595_v16 }
 0x21d   : > { %2210 = vst [vmem:[#allocation3 + $0x41] sm:$0x3f] %v2201_v57  ;;  %2673 = vmatmul.f32.gmra.mxu1 %v2352_v34  ;;  %v2353_v39 = vsub.f32 %v2351_v53, %v2352_v34  ;;  %3222 = vmatpush.msra.mxu3 %v6426_v25  ;;  %v6515_v27 = vsub.f32 %v2219_v36, %v6503_v19  ;;  %v2362_v41 = vand.u32 4294901760, %v2361_v35  ;;  %v6600_v53 = vand.u32 4294901760, %v2225_v42  ;;  %v2226_v34 = vld [vmem:[#allocation3 + $0x38] sm:$0xff] }
 0x21e   : > { %3386 = vmatpush.msrb.mxu1 %v6207_v40  ;;  %3305 = vmatpush.msrb.mxu0 %v7454_v49  ;;  %v7456_v40 = vand.u32 4294901760, %v6327_v47  ;;  %v7458_v47 = vand.u32 4294901760, %v6355_v4  ;;  %v2934_v33 = vsub.f32 %v6595_v16, %v2933_v15  ;;  %v6612_v11 = vand.u32 4294901760, %v2226_v34 }
 0x21f   : > { %v2354_v54 = vand.u32 4294901760, %v2353_v39  ;;  %3144 = vmatpush.msra.mxu2 %v6440_v52  ;;  %v2893_v17 = vand.u32 4294901760, %v6515_v27  ;;  %v6607_v57 = vsub.f32 %v2225_v42, %v6600_v53 }
 0x220   : > { %3388 = vmatpush.msrb.mxu1 %v6226_v44  ;;  %3309 = vmatpush.msrb.mxu0 %v7455_v12  ;;  %v7457_v44 = vand.u32 4294901760, %v6337_v48  ;;  %v7459_v48 = vand.u32 4294901760, %v6378_v5  ;;  %v6619_v36 = vsub.f32 %v2226_v34, %v6612_v11  ;;  %v4259_v12 = vld [vmem:[%s7184_s2 + $0x178] sm:$0xff] }
 0x221   : > { %2355 = vmatmul.f32.gmra.mxu2 %v2354_v54  ;;  %2500 = vmatmul.f32.gmra.mxu3 %v6475_v38  ;;  %v2894_v5 = vsub.f32 %v6515_v27, %v2893_v17 }
 0x222   : > { %3390 = vmatpush.msrb.mxu1 %v6243_v23  ;;  %3313 = vmatpush.msrb.mxu0 %v7456_v40  ;;  %v2220_v23 = vld [vmem:[#allocation3 + $0x8] sm:$0xff]  ;;  %v7258_v54 = vand.u32 4294901760, %v6619_v36  ;;  %v6629_v40 = vand.u32 4294901760, %v4259_v12 }
 0x223   : > { %2593 = vmatmul.f32.gmra.mxu0 %v2359_v37  ;;  %v6527_v20 = vand.u32 4294901760, %v2220_v23  ;;  %v7266_v37 = vand.u32 4294901760, %v6607_v57 }
 0x224   : > { %v2252_v58 = vld [vmem:[#allocation3 + $0x41] sm:$0x3f]  ;;  %3392 = vmatpush.msrb.mxu1 %v6262_v50  ;;  %3317 = vmatpush.msrb.mxu0 %v7457_v44  ;;  %v6633_v35 = vsub.f32 %v4259_v12, %v6629_v40 }
 0x225   : > { %2679 = vmatmul.f32.gmra.mxu1 %v2360_v29  ;;  %v6512_v45 = vand.u32 4294901760, %v2252_v58  ;;  %v6539_v21 = vsub.f32 %v2220_v23, %v6527_v20  ;;  %v2942_v39 = vsub.f32 %v6607_v57, %v7266_v37  ;;  %v2227_v49 = vld [vmem:[#allocation3 + $0x40] sm:$0x3f] }
 0x226   : > { %3394 = vmatpush.msrb.mxu1 %v6283_v1  ;;  %3321 = vmatpush.msrb.mxu0 %v7458_v47  ;;  %v7460_v1 = vand.u32 4294901760, %v6391_v59  ;;  %v6624_v29 = vand.u32 4294901760, %v2227_v49  ;;  %v7265_v23 = vand.u32 4294901760, %v6633_v35 }
 0x227   : > { %v2367_v50 = vsub.f32 %v2252_v58, %v6512_v45  ;;  %v2901_v59 = vand.u32 4294901760, %v6539_v21 }
 0x228   : > { %3396 = vmatpush.msrb.mxu1 %v6304_v2  ;;  %3325 = vmatpush.msrb.mxu0 %v7459_v48  ;;  %v6641_v58 = vsub.f32 %v2227_v49, %v6624_v29  ;;  %v3582_v48 = vsub.f32 %v6633_v35, %v7265_v23 }
 0x229   : > { %2363 = vmatmul.f32.gmra.mxu2 %v2362_v41  ;;  %2504 = vmatmul.f32.gmra.mxu3 %v6512_v45  ;;  %v2368_v3 = vand.u32 4294901760, %v2367_v50  ;;  %v4258_v41 = vld [vmem:[%s7184_s2 + $0x170] sm:$0xff] }
 0x22a   : > { %3398 = vmatpush.msrb.mxu1 %v6317_v13  ;;  %3329 = vmatpush.msrb.mxu0 %v7460_v1  ;;  %v2221_v13 = vld [vmem:[#allocation3 + $0x10] sm:$0xff] }
 0x22b   : > { %2598 = vmatmul.f32.gmra.mxu0 %v2367_v50  ;;  %v2369_v4 = vsub.f32 %v2367_v50, %v2368_v3  ;;  %v6549_v30 = vand.u32 4294901760, %v2221_v13 }
 0x22c   : > { %3400 = vmatpush.msrb.mxu1 %v6334_v28  ;;  %3333 = vmatpush.msrb.mxu0 %v3044_v9  ;;  %v2895_v28 = vand.u32 4294901760, %v2894_v5  ;;  %v2222_v9 = vld [vmem:[#allocation3 + $0x18] sm:$0xff]  ;;  %v3583_v5 = vand.u32 4294901760, %v3582_v48 }
 0x22d   : > { %2685 = vmatmul.f32.gmra.mxu1 %v2368_v3  ;;  %v2370_v2 = vand.u32 4294901760, %v2369_v4  ;;  %v6657_v3 = vand.u32 4294901760, %v4258_v41  ;;  %v7251_v4 = vand.u32 4294901760, %v6641_v58 }
 0x22e   : > { %3402 = vmatpush.msrb.mxu1 %v6352_v24  ;;  %3337 = vmatpush.msrb.mxu0 %v3050_v31  ;;  %v2902_v24 = vsub.f32 %v6539_v21, %v2901_v59 }
 0x230   : > { %3404 = vmatpush.msrb.mxu1 %v6370_v56  ;;  %3341 = vmatpush.msrb.mxu0 %v3056_v62  ;;  %v6558_v56 = vsub.f32 %v2221_v13, %v6549_v30  ;;  %v6666_v13 = vsub.f32 %v4258_v41, %v6657_v3 }
 0x231   : > { %2371 = vmatmul.f32.gmra.mxu2 %v2370_v2  ;;  %2823 = vmatmul.f32.vlgmr.msrb.gmra.mxu3 %v6092_v6 }
 0x232   : > { %3406 = vmatpush.msrb.mxu1 %v6388_v10  ;;  %v2903_v10 = vand.u32 4294901760, %v2902_v24  ;;  %v2909_v43 = vand.u32 4294901760, %v6558_v56  ;;  %3584 = vmatpush.msrb.mxu3 %v3583_v5  ;;  %v7264_v24 = vand.u32 4294901760, %v6666_v13 }
 0x233   : > { %2896 = vmatmul.f32.vlgmr.msra.gmra.mxu0 %v2895_v28  ;;  %v4257_v28 = vld [vmem:[%s7184_s2 + $0x168] sm:$0xff] }
 0x234   : > { %3408 = vmatpush.msrb.mxu1 %v6407_v18  ;;  %v6564_v18 = vand.u32 4294901760, %v2222_v9  ;;  %v2910_v31 = vsub.f32 %v6558_v56, %v2909_v43  ;;  %3714 = vmatpush.msra.mxu0 %v6633_v35 }
 0x235   : > { %3061 = vmatmul.f32.vlgmr.msra.gmra.mxu1 %v6503_v19 }
 0x236   : > { %3410 = vmatpush.msrb.mxu1 %v6426_v25  ;;  %v6571_v52 = vsub.f32 %v2222_v9, %v6564_v18  ;;  %v2223_v25 = vld [vmem:[#allocation3 + $0x20] sm:$0xff]  ;;  %3717 = vmatpush.msra.mxu0 %v6666_v13  ;;  %v2958_v9 = vsub.f32 %v6641_v58, %v7251_v4 }
 0x237   : > { %v6576_v0 = vand.u32 4294901760, %v2223_v25 }
 0x238   : > { %v2917_v62 = vand.u32 4294901760, %v6571_v52  ;;  %3807 = vmatpush.msra.mxu1 %v6629_v40 }
 0x239   : > { %2754 = vmatmul.f32.vlgmr.msrb.gmra.mxu2 %v6092_v6  ;;  %2827 = vmatmul.f32.gmra.mxu3 %v6122_v60  ;;  %v2911_v6 = vand.u32 4294901760, %v2910_v31  ;;  %v6583_v63 = vsub.f32 %v2223_v25, %v6576_v0  ;;  %v4256_v25 = vld [vmem:[%s7184_s2 + $0x160] sm:$0xff] }
 0x23a   : > { %v2918_v32 = vsub.f32 %v6571_v52, %v2917_v62  ;;  %3475 = vmatpush.msrb.mxu2 %v6629_v40  ;;  %3809 = vmatpush.msra.mxu1 %v6657_v3  ;;  %v6691_v14 = vand.u32 4294901760, %v4256_v25 }
 0x23b   : > { %2904 = vmatmul.f32.gmra.mxu0 %v2903_v10  ;;  %v2925_v22 = vand.u32 4294901760, %v6583_v63  ;;  %v3588_v10 = vsub.f32 %v6666_v13, %v7264_v24 }
 0x23c   : > { %3477 = vmatpush.msrb.mxu2 %v6657_v3  ;;  %v6698_v34 = vsub.f32 %v4256_v25, %v6691_v14 }
 0x23d   : > { %3065 = vmatmul.f32.gmra.mxu1 %v6527_v20  ;;  %v2926_v55 = vsub.f32 %v6583_v63, %v2925_v22 }
 0x23e   : > { %v7261_v49 = vand.u32 4294901760, %v6698_v34 }
 0x240   : > { %v3600_v41 = vsub.f32 %v6698_v34, %v7261_v49  ;;  %v4245_v49 = vld [vmem:[%s7184_s2 + $0x108] sm:$0xff] }
 0x241   : > { %2758 = vmatmul.f32.gmra.mxu2 %v6122_v60  ;;  %2831 = vmatmul.f32.gmra.mxu3 %v6249_v26  ;;  %v2919_v60 = vand.u32 4294901760, %v2918_v32  ;;  %v3589_v32 = vand.u32 4294901760, %v3588_v10 }
 0x243   : > { %2912 = vmatmul.f32.gmra.mxu0 %v2911_v6  ;;  %3590 = vmatpush.msrb.mxu3 %v3589_v32 }
 0x245   : > { %3069 = vmatmul.f32.gmra.mxu1 %v6549_v30 }
 0x249   : > { %2762 = vmatmul.f32.gmra.mxu2 %v6249_v26  ;;  %2835 = vmatmul.f32.gmra.mxu3 %v6230_v61  ;;  %v2927_v26 = vand.u32 4294901760, %v2926_v55  ;;  %v2959_v55 = vand.u32 4294901760, %v2958_v9  ;;  %v4254_v9 = vld [vmem:[%s7184_s2 + $0x150] sm:$0xff] }
 0x24a   : > { %v6730_v25 = vand.u32 4294901760, %v4254_v9 }
 0x24b   : > { %2920 = vmatmul.f32.gmra.mxu0 %v2919_v60 }
 0x24d   : > { %3073 = vmatmul.f32.gmra.mxu1 %v6564_v18 }
 0x251   : > { %2766 = vmatmul.f32.gmra.mxu2 %v6230_v61  ;;  %2839 = vmatmul.f32.gmra.mxu3 %v6394_v46  ;;  %v2935_v61 = vand.u32 4294901760, %v2934_v33 }
 0x253   : > { %2928 = vmatmul.f32.gmra.mxu0 %v2927_v26 }
 0x255   : > { %3077 = vmatmul.f32.gmra.mxu1 %v6576_v0 }
 0x259   : > { %2770 = vmatmul.f32.gmra.mxu2 %v6394_v46  ;;  %2843 = vmatmul.f32.gmra.mxu3 %v6375_v51  ;;  %v2943_v46 = vand.u32 4294901760, %v2942_v39 }
 0x25b   : > { %2936 = vmatmul.f32.gmra.mxu0 %v2935_v61 }
 0x25d   : > { %3081 = vmatmul.f32.gmra.mxu1 %v6588_v7 }
 0x25e   : > { %v6643_v44 = vpop.f32.mrf.mxu0 }
 0x260   : > { %v6647_v47 = vpop.f32.mrf.mxu1 }
 0x261   : > { %2774 = vmatmul.f32.gmra.mxu2 %v6375_v51  ;;  %2847 = vmatmul.f32.gmra.mxu3 %v6473_v8  ;;  %v2950_v51 = vsub.f32 %v6619_v36, %v7258_v54 }
 0x263   : > { %2944 = vmatmul.f32.gmra.mxu0 %v2943_v46  ;;  %v6652_v50 = vpop.f32.mrf.mxu3  ;;  %v2951_v1 = vand.u32 4294901760, %v2950_v51 }
 0x265   : > { %3085 = vmatmul.f32.gmra.mxu1 %v6600_v53 }
 0x266   : > { %v2564_v6 = vpop.f32.mrf.mxu0 }
 0x268   : > { %v2644_v60 = vpop.f32.mrf.mxu1 }
 0x269   : > { %2778 = vmatmul.f32.gmra.mxu2 %v6473_v8  ;;  %2851 = vmatmul.f32.gmra.mxu3 %v6475_v38  ;;  %v6672_v8 = vand.u32 4294901760, %v4257_v28 }
 0x26a   : > { %v6662_v2 = vpop.f32.mrf.mxu2 }
 0x26b   : > { %2952 = vmatmul.f32.gmra.mxu0 %v2951_v1  ;;  %3479 = vmatpush.msrb.mxu2 %v6672_v8  ;;  %v6686_v31 = vsub.f32 %v4257_v28, %v6672_v8  ;;  %v2477_v26 = vpop.f32.mrf.mxu3  ;;  %v3601_v28 = vand.u32 4294901760, %v3600_v41 }
 0x26c   : > { %3811 = vmatpush.msra.mxu1 %v6672_v8 }
 0x26d   : > { %3089 = vmatmul.f32.gmra.mxu1 %v6612_v11  ;;  %v7263_v42 = vand.u32 4294901760, %v6686_v31  ;;  %3481 = vmatpush.msrb.mxu2 %v6691_v14 }
 0x26e   : > { %3813 = vmatpush.msra.mxu1 %v6691_v14  ;;  %3720 = vmatpush.msra.mxu0 %v6686_v31 }
 0x26f   : > { %v3594_v39 = vsub.f32 %v6686_v31, %v7263_v42 }
 0x270   : > { %3723 = vmatpush.msra.mxu0 %v6698_v34 }
 0x271   : > { %2782 = vmatmul.f32.gmra.mxu2 %v6475_v38  ;;  %2855 = vmatmul.f32.gmra.mxu3 %v6512_v45  ;;  %v4255_v38 = vld [vmem:[%s7184_s2 + $0x158] sm:$0xff]  ;;  %v3595_v51 = vand.u32 4294901760, %v3594_v39 }
 0x272   : > { %v2316_v33 = vpop.f32.mrf.mxu2  ;;  %v6708_v46 = vand.u32 4294901760, %v4255_v38 }
 0x273   : > { %2960 = vmatmul.f32.gmra.mxu0 %v2959_v55  ;;  %v2478_v61 = vadd.f32 %v2477_v26, %v2316_v33  ;;  %3596 = vmatpush.msrb.mxu3 %v3595_v51  ;;  %v4253_v33 = vld [vmem:[%s7184_s2 + $0x148] sm:$0xff] }
 0x274   : > { %3483 = vmatpush.msrb.mxu2 %v6708_v46  ;;  %v6718_v48 = vsub.f32 %v4255_v38, %v6708_v46  ;;  %3815 = vmatpush.msra.mxu1 %v6708_v46  ;;  %v6751_v39 = vand.u32 4294901760, %v4253_v33  ;;  %v4252_v38 = vld [vmem:[%s7184_s2 + $0x140] sm:$0xff] }
 0x275   : > { %3093 = vmatmul.f32.gmra.mxu1 %v6624_v29  ;;  %v2565_v12 = vadd.f32 %v2564_v6, %v2478_v61  ;;  %3602 = vmatpush.msrb.mxu3 %v3601_v28  ;;  %v6763_v41 = vand.u32 4294901760, %v4252_v38 }
 0x276   : > { %v7257_v10 = vand.u32 4294901760, %v6718_v48  ;;  %3726 = vmatpush.msra.mxu0 %v6718_v48  ;;  %3485 = vmatpush.msrb.mxu2 %v6730_v25  ;;  %v6761_v51 = vsub.f32 %v4253_v33, %v6751_v39 }
 0x277   : > { %v6721_v1 = vadd.f32 %v2644_v60, %v2565_v12  ;;  %3817 = vmatpush.msra.mxu1 %v6730_v25 }
 0x278   : > { %v2569_v5 = vpop.f32.mrf.mxu0  ;;  %v3606_v32 = vsub.f32 %v6718_v48, %v7257_v10  ;;  %3487 = vmatpush.msrb.mxu2 %v6751_v39  ;;  %v7253_v28 = vand.u32 4294901760, %v6761_v51 }
 0x279   : > { %2786 = vmatmul.f32.gmra.mxu2 %v6512_v45  ;;  %3226 = vmatmul.f32.vlgmr.msra.gmra.mxu3 %v2893_v17  ;;  %v6739_v45 = vsub.f32 %v4254_v9, %v6730_v25  ;;  %v6770_v9 = vsub.f32 %v4252_v38, %v6763_v41 }
 0x27a   : > { %v2650_v6 = vpop.f32.mrf.mxu1  ;;  %v3607_v60 = vand.u32 4294901760, %v3606_v32  ;;  %3819 = vmatpush.msra.mxu1 %v6751_v39  ;;  %3489 = vmatpush.msrb.mxu2 %v6763_v41 }
 0x27b   : > { %3343 = vmatmul.f32.vlgmr.msrb.gmra.mxu0 %v6503_v19  ;;  %v7254_v55 = vand.u32 4294901760, %v6739_v45 }
 0x27c   : > { %v2481_v17 = vpop.f32.mrf.mxu3  ;;  %3729 = vmatpush.msra.mxu0 %v6739_v45  ;;  %3608 = vmatpush.msrb.mxu3 %v3607_v60  ;;  %v3618_v60 = vsub.f32 %v6761_v51, %v7253_v28 }
 0x27d   : > { %3412 = vmatmul.f32.vlgmr.msrb.gmra.mxu1 %v6503_v19  ;;  %v3612_v26 = vsub.f32 %v6739_v45, %v7254_v55 }
 0x27e   : > { %3732 = vmatpush.msra.mxu0 %v6761_v51  ;;  %3821 = vmatpush.msra.mxu1 %v6763_v41  ;;  %v3619_v4 = vand.u32 4294901760, %v3618_v60 }
 0x27f   : > { %v3613_v19 = vand.u32 4294901760, %v3612_v26  ;;  %v7252_v26 = vand.u32 4294901760, %v6770_v9 }
 0x280   : > { %v2574_v61 = vpop.f32.mrf.mxu0  ;;  %3735 = vmatpush.msra.mxu0 %v6770_v9 }
 0x281   : > { %3147 = vmatmul.f32.vlgmr.msra.gmra.mxu2 %v6515_v27  ;;  %3232 = vmatmul.f32.gmra.mxu3 %v2901_v59 }
 0x282   : > { %v2656_v12 = vpop.f32.mrf.mxu1  ;;  %3614 = vmatpush.msrb.mxu3 %v3613_v19  ;;  %v4251_v19 = vld [vmem:[%s7184_s2 + $0x138] sm:$0xff] }
 0x283   : > { %3347 = vmatmul.f32.gmra.mxu0 %v6527_v20 }
 0x284   : > { %v2324_v27 = vpop.f32.mrf.mxu2  ;;  %v2485_v59 = vpop.f32.mrf.mxu3  ;;  %3620 = vmatpush.msrb.mxu3 %v3619_v4 }
 0x285   : > { %v2482_v32 = vadd.f32 %v2481_v17, %v2324_v27  ;;  %3416 = vmatmul.f32.gmra.mxu1 %v6527_v20  ;;  %v3624_v20 = vsub.f32 %v6770_v9, %v7252_v26  ;;  %v6786_v17 = vand.u32 4294901760, %v4251_v19  ;;  %v4250_v26 = vld [vmem:[%s7184_s2 + $0x130] sm:$0xff] }
 0x287   : > { %v2570_v33 = vadd.f32 %v2569_v5, %v2482_v32  ;;  %v3625_v32 = vand.u32 4294901760, %v3624_v20  ;;  %3491 = vmatpush.msrb.mxu2 %v6786_v17  ;;  %v6795_v60 = vsub.f32 %v4251_v19, %v6786_v17  ;;  %3823 = vmatpush.msra.mxu1 %v6786_v17 }
 0x288   : > { %v2579_v38 = vpop.f32.mrf.mxu0 }
 0x289   : > { %3152 = vmatmul.f32.gmra.mxu2 %v6539_v21  ;;  %3238 = vmatmul.f32.gmra.mxu3 %v2909_v43  ;;  %v6791_v27 = vadd.f32 %v2650_v6, %v2570_v33  ;;  %v6801_v21 = vand.u32 4294901760, %v4250_v26  ;;  %v7255_v4 = vand.u32 4294901760, %v6795_v60 }
 0x28a   : > { %v2662_v5 = vpop.f32.mrf.mxu1  ;;  %3626 = vmatpush.msrb.mxu3 %v3625_v32  ;;  %3738 = vmatpush.msra.mxu0 %v6795_v60  ;;  %v4249_v32 = vld [vmem:[%s7184_s2 + $0x128] sm:$0xff] }
 0x28b   : > { %3351 = vmatmul.f32.gmra.mxu0 %v6549_v30  ;;  %3493 = vmatpush.msrb.mxu2 %v6801_v21  ;;  %v3630_v19 = vsub.f32 %v6795_v60, %v7255_v4  ;;  %v6813_v28 = vsub.f32 %v4250_v26, %v6801_v21 }
 0x28c   : > { %v2332_v43 = vpop.f32.mrf.mxu2  ;;  %v2489_v6 = vpop.f32.mrf.mxu3  ;;  %3825 = vmatpush.msra.mxu1 %v6801_v21 }
 0x28d   : > { %v2486_v33 = vadd.f32 %v2485_v59, %v2332_v43  ;;  %3420 = vmatmul.f32.gmra.mxu1 %v6549_v30  ;;  %v3631_v59 = vand.u32 4294901760, %v3630_v19  ;;  %v6818_v43 = vand.u32 4294901760, %v4249_v32  ;;  %v7256_v30 = vand.u32 4294901760, %v6813_v28  ;;  %3741 = vmatpush.msra.mxu0 %v6813_v28 }
 0x28f   : > { %v2575_v20 = vadd.f32 %v2574_v61, %v2486_v33  ;;  %3632 = vmatpush.msrb.mxu3 %v3631_v59  ;;  %3495 = vmatpush.msrb.mxu2 %v6818_v43  ;;  %v6828_v26 = vsub.f32 %v4249_v32, %v6818_v43 }
 0x290   : > { %v2584_v55 = vpop.f32.mrf.mxu0  ;;  %3827 = vmatpush.msra.mxu1 %v6818_v43 }
 0x291   : > { %3157 = vmatmul.f32.gmra.mxu2 %v6558_v56  ;;  %3244 = vmatmul.f32.gmra.mxu3 %v2917_v62  ;;  %v6824_v4 = vadd.f32 %v2656_v12, %v2575_v20  ;;  %v3636_v56 = vsub.f32 %v6813_v28, %v7256_v30  ;;  %v4248_v62 = vld [vmem:[%s7184_s2 + $0x120] sm:$0xff]  ;;  %v7259_v19 = vand.u32 4294901760, %v6828_v26 }
 0x292   : > { %v2668_v61 = vpop.f32.mrf.mxu1  ;;  %v6839_v20 = vand.u32 4294901760, %v4248_v62  ;;  %3744 = vmatpush.msra.mxu0 %v6828_v26 }
 0x293   : > { %3355 = vmatmul.f32.gmra.mxu0 %v6564_v18  ;;  %v3637_v59 = vand.u32 4294901760, %v3636_v56  ;;  %v3642_v30 = vsub.f32 %v6828_v26, %v7259_v19 }
 0x294   : > { %v2340_v12 = vpop.f32.mrf.mxu2  ;;  %v2493_v33 = vpop.f32.mrf.mxu3  ;;  %3497 = vmatpush.msrb.mxu2 %v6839_v20  ;;  %v6849_v54 = vsub.f32 %v4248_v62, %v6839_v20  ;;  %3829 = vmatpush.msra.mxu1 %v6839_v20 }
 0x295   : > { %v2490_v32 = vadd.f32 %v2489_v6, %v2340_v12  ;;  %3424 = vmatmul.f32.gmra.mxu1 %v6564_v18  ;;  %3638 = vmatpush.msrb.mxu3 %v3637_v59  ;;  %v4247_v6 = vld [vmem:[%s7184_s2 + $0x118] sm:$0xff]  ;;  %v3643_v56 = vand.u32 4294901760, %v3642_v30 }
 0x296   : > { %v6855_v12 = vand.u32 4294901760, %v4247_v6  ;;  %3747 = vmatpush.msra.mxu0 %v6849_v54 }
 0x297   : > { %v2580_v10 = vadd.f32 %v2579_v38, %v2490_v32  ;;  %v7260_v38 = vand.u32 4294901760, %v6849_v54  ;;  %3644 = vmatpush.msrb.mxu3 %v3643_v56 }
 0x298   : > { %v2589_v18 = vpop.f32.mrf.mxu0  ;;  %3499 = vmatpush.msrb.mxu2 %v6855_v12  ;;  %v6865_v59 = vsub.f32 %v4247_v6, %v6855_v12  ;;  %3831 = vmatpush.msra.mxu1 %v6855_v12 }
 0x299   : > { %3162 = vmatmul.f32.gmra.mxu2 %v6571_v52  ;;  %3250 = vmatmul.f32.gmra.mxu3 %v2925_v22  ;;  %v6861_v32 = vadd.f32 %v2662_v5, %v2580_v10  ;;  %v3648_v52 = vsub.f32 %v6849_v54, %v7260_v38  ;;  %v4246_v38 = vld [vmem:[%s7184_s2 + $0x110] sm:$0xff] }
 0x29a   : > { %v2674_v62 = vpop.f32.mrf.mxu1  ;;  %v7262_v10 = vand.u32 4294901760, %v6865_v59  ;;  %3750 = vmatpush.msra.mxu0 %v6865_v59 }
 0x29b   : > { %3359 = vmatmul.f32.gmra.mxu0 %v6576_v0  ;;  %v3649_v56 = vand.u32 4294901760, %v3648_v52  ;;  %v6887_v52 = vand.u32 4294901760, %v4245_v49 }
 0x29c   : > { %v2348_v22 = vpop.f32.mrf.mxu2  ;;  %v2497_v30 = vpop.f32.mrf.mxu3  ;;  %v3654_v6 = vsub.f32 %v6865_v59, %v7262_v10  ;;  %v4244_v10 = vld [vmem:[%s7184_s2 + $0x100] sm:$0xff] }
 0x29d   : > { %v2494_v5 = vadd.f32 %v2493_v33, %v2348_v22  ;;  %3428 = vmatmul.f32.gmra.mxu1 %v6576_v0  ;;  %3650 = vmatpush.msrb.mxu3 %v3649_v56  ;;  %v6885_v0 = vand.u32 4294901760, %v4246_v38  ;;  %v6904_v42 = vsub.f32 %v4245_v49, %v6887_v52 }
 0x29e   : > { %v3655_v22 = vand.u32 4294901760, %v3654_v6 }
 0x29f   : > { %v2585_v19 = vadd.f32 %v2584_v55, %v2494_v5  ;;  %v6895_v55 = vand.u32 4294901760, %v4244_v10  ;;  %3501 = vmatpush.msrb.mxu2 %v6885_v0  ;;  %v6901_v6 = vsub.f32 %v4246_v38, %v6885_v0  ;;  %3833 = vmatpush.msra.mxu1 %v6885_v0 }
 0x2a0   : > { %v2594_v33 = vpop.f32.mrf.mxu0  ;;  %3656 = vmatpush.msrb.mxu3 %v3655_v22  ;;  %v7267_v22 = vand.u32 4294901760, %v6904_v42 }
 0x2a1   : > { %3167 = vmatmul.f32.gmra.mxu2 %v6583_v63  ;;  %3256 = vmatmul.f32.gmra.mxu3 %v2933_v15  ;;  %v6897_v5 = vadd.f32 %v2668_v61, %v2585_v19  ;;  %v6908_v63 = vsub.f32 %v4244_v10, %v6895_v55  ;;  %v7268_v19 = vand.u32 4294901760, %v6901_v6 }
 0x2a2   : > { %v2680_v56 = vpop.f32.mrf.mxu1  ;;  %3753 = vmatpush.msra.mxu0 %v6901_v6  ;;  %3503 = vmatpush.msrb.mxu2 %v6887_v52  ;;  %v3666_v24 = vsub.f32 %v6904_v42, %v7267_v22  ;;  %v7462_v22 = vand.u32 4294901760, %v6607_v57 }
 0x2a3   : > { %7461 = vst [vmem:[#allocation27_spill] sm:$0xff] %v6897_v5  ;;  %3363 = vmatmul.f32.gmra.mxu0 %v6588_v7  ;;  %v7269_v49 = vand.u32 4294901760, %v6908_v63  ;;  %v3660_v10 = vsub.f32 %v6901_v6, %v7268_v19  ;;  %3835 = vmatpush.msra.mxu1 %v6887_v52  ;;  %v7464_v5 = vand.u32 4294901760, %v6666_v13 }
 0x2a4   : > { %v2356_v15 = vpop.f32.mrf.mxu2  ;;  %v2501_v61 = vpop.f32.mrf.mxu3  ;;  %3756 = vmatpush.msra.mxu0 %v6904_v42  ;;  %3505 = vmatpush.msrb.mxu2 %v6895_v55  ;;  %v3667_v37 = vand.u32 4294901760, %v3666_v24 }
 0x2a5   : > { %v2498_v38 = vadd.f32 %v2497_v30, %v2356_v15  ;;  %3432 = vmatmul.f32.gmra.mxu1 %v6588_v7  ;;  %v3672_v30 = vsub.f32 %v6908_v63, %v7269_v49  ;;  %v3661_v15 = vand.u32 4294901760, %v3660_v10  ;;  %v7463_v49 = vand.u32 4294901760, %v6633_v35 }
 0x2a6   : > { %3759 = vmatpush.msra.mxu0 %v6908_v63  ;;  %3837 = vmatpush.msra.mxu1 %v6895_v55 }
 0x2a7   : > { %v2590_v23 = vadd.f32 %v2589_v18, %v2498_v38  ;;  %3662 = vmatpush.msrb.mxu3 %v3661_v15  ;;  %v3673_v38 = vand.u32 4294901760, %v3672_v30  ;;  %3896 = vmatpush.msra.mxu2 %v7463_v49  ;;  %v7474_v30 = vand.u32 4294901760, %v6813_v28 }
 0x2a8   : > { %v2599_v7 = vpop.f32.mrf.mxu0 }
 0x2a9   : > { %3172 = vmatmul.f32.gmra.mxu2 %v6595_v16  ;;  %3262 = vmatmul.f32.gmra.mxu3 %v7462_v22  ;;  %v6934_v19 = vadd.f32 %v2674_v62, %v2590_v23  ;;  %v7465_v23 = vand.u32 4294901760, %v6686_v31  ;;  %v7466_v22 = vand.u32 4294901760, %v6698_v34 }
 0x2aa   : > { %v2686_v18 = vpop.f32.mrf.mxu1  ;;  %3668 = vmatpush.msrb.mxu3 %v3667_v37  ;;  %3900 = vmatpush.msra.mxu2 %v7464_v5  ;;  %v7467_v37 = vand.u32 4294901760, %v6619_v36 }
 0x2ab   : > { %3367 = vmatmul.f32.gmra.mxu0 %v6600_v53 }
 0x2ac   : > { %v2364_v24 = vpop.f32.mrf.mxu2  ;;  %v2505_v10 = vpop.f32.mrf.mxu3  ;;  %3674 = vmatpush.msrb.mxu3 %v3673_v38  ;;  %3904 = vmatpush.msra.mxu2 %v7465_v23 }
 0x2ad   : > { %v2502_v16 = vadd.f32 %v2501_v61, %v2364_v24  ;;  %3436 = vmatmul.f32.gmra.mxu1 %v6600_v53  ;;  %v7468_v53 = vand.u32 4294901760, %v6718_v48 }
 0x2ae   : > { %3995 = vmatpush.msra.mxu3 %v6629_v40  ;;  %3908 = vmatpush.msra.mxu2 %v7466_v22  ;;  %v2474_v40 = vadd.f32 %v6652_v50, %v6662_v2 }
 0x2af   : > { %v2595_v62 = vadd.f32 %v2594_v33, %v2502_v16  ;;  %v3448_v33 = vld [vmem:[#allocation3 + $0x2] sm:$0xff] }
 0x2b0   : > { %v2897_v35 = vpop.f32.mrf.mxu0  ;;  %3997 = vmatpush.msra.mxu3 %v6657_v3  ;;  %3912 = vmatpush.msra.mxu2 %v7468_v53  ;;  %v7470_v3 = vand.u32 4294901760, %v6761_v51  ;;  %v2560_v50 = vadd.f32 %v6643_v44, %v2474_v40  ;;  %v6966_v48 = vand.u32 4294901760, %v3448_v33  ;;  %v7473_v44 = vand.u32 4294901760, %v6795_v60  ;;  %v3451_v40 = vld [vmem:[#allocation3 + $0x1a] sm:$0xff] }
 0x2b1   : > { %3177 = vmatmul.f32.gmra.mxu2 %v6607_v57  ;;  %3268 = vmatmul.f32.gmra.mxu3 %v7467_v37  ;;  %v6950_v13 = vadd.f32 %v2680_v56, %v2595_v62  ;;  %v7469_v57 = vand.u32 4294901760, %v6739_v45 }
 0x2b2   : > { %v3062_v5 = vpop.f32.mrf.mxu1  ;;  %3999 = vmatpush.msra.mxu3 %v6672_v8  ;;  %v7471_v8 = vand.u32 4294901760, %v6770_v9  ;;  %v3507_v51 = vsub.f32 %v3448_v33, %v6966_v48 }
 0x2b3   : > { %3371 = vmatmul.f32.gmra.mxu0 %v6612_v11  ;;  %3916 = vmatpush.msra.mxu2 %v7469_v57 }
 0x2b4   : > { %v2372_v31 = vpop.f32.mrf.mxu2  ;;  %v2824_v34 = vpop.f32.mrf.mxu3  ;;  %4001 = vmatpush.msra.mxu3 %v6691_v14 }
 0x2b5   : > { %v2506_v56 = vadd.f32 %v2505_v10, %v2372_v31  ;;  %3440 = vmatmul.f32.gmra.mxu1 %v6612_v11  ;;  %3920 = vmatpush.msra.mxu2 %v7470_v3  ;;  %v7472_v11 = vand.u32 4294901760, %v6641_v58  ;;  %v3450_v10 = vld [vmem:[#allocation3 + $0x12] sm:$0xff] }
 0x2b6   : > { %4003 = vmatpush.msra.mxu3 %v6708_v46  ;;  %v2639_v46 = vadd.f32 %v6647_v47, %v2560_v50  ;;  %v3508_v47 = vand.u32 4294901760, %v3507_v51 }
 0x2b7   : > { %v2600_v2 = vadd.f32 %v2599_v7, %v2506_v56  ;;  %3924 = vmatpush.msra.mxu2 %v7471_v8 }
 0x2b8   : > { %v2905_v61 = vpop.f32.mrf.mxu0  ;;  %4005 = vmatpush.msra.mxu3 %v6730_v25  ;;  %v7475_v25 = vand.u32 4294901760, %v6828_v26  ;;  %v3509_v26 = vsub.f32 %v3507_v51, %v3508_v47 }
 0x2b9   : > { %3182 = vmatmul.f32.gmra.mxu2 %v6619_v36  ;;  %3274 = vmatmul.f32.gmra.mxu3 %v7472_v11  ;;  %v6974_v14 = vadd.f32 %v2686_v18, %v2600_v2  ;;  %v3449_v36 = vld [vmem:[#allocation3 + $0xa] sm:$0xff] }
 0x2ba   : > { %v3066_v45 = vpop.f32.mrf.mxu1  ;;  %3928 = vmatpush.msra.mxu2 %v7473_v44  ;;  %4007 = vmatpush.msra.mxu3 %v6751_v39  ;;  %v6989_v15 = vand.u32 4294901760, %v3449_v36  ;;  %v7476_v39 = vand.u32 4294901760, %v6849_v54  ;;  %v3510_v23 = vand.u32 4294901760, %v3509_v26 }
 0x2bb   : > { %3375 = vmatmul.f32.gmra.mxu0 %v6624_v29 }
 0x2bc   : > { %v2755_v9 = vpop.f32.mrf.mxu2  ;;  %v2828_v49 = vpop.f32.mrf.mxu3  ;;  %3932 = vmatpush.msra.mxu2 %v7474_v30  ;;  %4009 = vmatpush.msra.mxu3 %v6763_v41  ;;  %v7477_v41 = vand.u32 4294901760, %v6865_v59  ;;  %v3515_v38 = vsub.f32 %v3449_v36, %v6989_v15 }
 0x2bd   : > { %v2756_v7 = vadd.f32 %v2755_v9, %v2639_v46  ;;  %3444 = vmatmul.f32.gmra.mxu1 %v6624_v29 }
 0x2be   : > { %3936 = vmatpush.msra.mxu2 %v7475_v25  ;;  %4011 = vmatpush.msra.mxu3 %v6786_v17  ;;  %v3516_v62 = vand.u32 4294901760, %v3515_v38  ;;  %v3453_v25 = vld [vmem:[#allocation3 + $0x2a] sm:$0xff] }
 0x2bf   : > { %v2825_v60 = vadd.f32 %v2824_v34, %v2756_v7 }
 0x2c0   : > { %v2913_v18 = vpop.f32.mrf.mxu0  ;;  %3940 = vmatpush.msra.mxu2 %v7476_v39  ;;  %4013 = vmatpush.msra.mxu3 %v6801_v21  ;;  %v7479_v21 = vand.u32 4294901760, %v6904_v42  ;;  %v3517_v42 = vsub.f32 %v3515_v38, %v3516_v62 }
 0x2c1   : > { %3187 = vmatmul.f32.gmra.mxu2 %v6641_v58  ;;  %3676 = vmatmul.f32.vlgmr.msrb.gmra.mxu3 %v6966_v48  ;;  %v2898_v29 = vadd.f32 %v2897_v35, %v2825_v60  ;;  %v7478_v58 = vand.u32 4294901760, %v6901_v6  ;;  %v7009_v35 = vand.u32 4294901760, %v3450_v10 }
 0x2c2   : > { %v3070_v28 = vpop.f32.mrf.mxu1  ;;  %3944 = vmatpush.msra.mxu2 %v7477_v41  ;;  %4015 = vmatpush.msra.mxu3 %v6818_v43  ;;  %v7480_v43 = vand.u32 4294901760, %v6908_v63  ;;  %v3518_v31 = vand.u32 4294901760, %v3517_v42 }
 0x2c3   : > { %3762 = vmatmul.f32.vlgmr.msra.gmra.mxu0 %v3507_v51  ;;  %v7000_v24 = vadd.f32 %v3062_v5, %v2898_v29  ;;  %v7036_v29 = vand.u32 4294901760, %v3453_v25 }
 0x2c4   : > { %v2759_v17 = vpop.f32.mrf.mxu2  ;;  %v2832_v54 = vpop.f32.mrf.mxu3  ;;  %3948 = vmatpush.msra.mxu2 %v7478_v58  ;;  %4017 = vmatpush.msra.mxu3 %v6839_v20  ;;  %v3523_v20 = vsub.f32 %v3450_v10, %v7009_v35  ;;  %v3454_v58 = vld [vmem:[#allocation3 + $0x32] sm:$0xff] }
 0x2c5   : > { %v2760_v16 = vadd.f32 %v2759_v17, %v6721_v1  ;;  %3841 = vmatmul.f32.vlgmr.msra.gmra.mxu1 %v3508_v47  ;;  %v3547_v17 = vsub.f32 %v3453_v25, %v7036_v29 }
 0x2c6   : > { %3952 = vmatpush.msra.mxu2 %v7479_v21  ;;  %4019 = vmatpush.msra.mxu3 %v6855_v12  ;;  %v3524_v34 = vand.u32 4294901760, %v3523_v20 }
 0x2c7   : > { %v2829_v59 = vadd.f32 %v2828_v49, %v2760_v16  ;;  %v7481_v16 = vld [vmem:[#allocation27_spill] sm:$0xff] }
 0x2c8   : > { %v2921_v22 = vpop.f32.mrf.mxu0  ;;  %3956 = vmatpush.msra.mxu2 %v7480_v43  ;;  %4021 = vmatpush.msra.mxu3 %v6885_v0  ;;  %v7022_v0 = vand.u32 4294901760, %v3451_v40  ;;  %v3525_v3 = vsub.f32 %v3523_v20, %v3524_v34 }
 0x2c9   : > { %3511 = vmatmul.f32.vlgmr.msrb.gmra.mxu2 %v3510_v23  ;;  %3680 = vmatmul.f32.gmra.mxu3 %v6989_v15  ;;  %v2906_v1 = vadd.f32 %v2905_v61, %v2829_v59 }
 0x2ca   : > { %v3074_v6 = vpop.f32.mrf.mxu1  ;;  %4023 = vmatpush.msra.mxu3 %v6887_v52  ;;  %v3531_v52 = vsub.f32 %v3451_v40, %v7022_v0  ;;  %v3526_v11 = vand.u32 4294901760, %v3525_v3 }
 0x2cb   : > { %3767 = vmatmul.f32.gmra.mxu0 %v3515_v38  ;;  %v7017_v37 = vadd.f32 %v3066_v45, %v2906_v1 }
 0x2cc   : > { %v2763_v5 = vpop.f32.mrf.mxu2  ;;  %v2836_v53 = vpop.f32.mrf.mxu3  ;;  %4025 = vmatpush.msra.mxu3 %v6895_v55  ;;  %v3452_v55 = vld [vmem:[#allocation3 + $0x22] sm:$0xff]  ;;  %v3532_v45 = vand.u32 4294901760, %v3531_v52 }
 0x2cd   : > { %v2764_v12 = vadd.f32 %v2763_v5, %v6791_v27  ;;  %3847 = vmatmul.f32.gmra.mxu1 %v3516_v62  ;;  %v7029_v44 = vand.u32 4294901760, %v3452_v55  ;;  %v3548_v62 = vand.u32 4294901760, %v3547_v17 }
 0x2ce   : > { %v3533_v49 = vsub.f32 %v3531_v52, %v3532_v45 }
 0x2cf   : > { %v2833_v63 = vadd.f32 %v2832_v54, %v2764_v12  ;;  %v3539_v36 = vsub.f32 %v3452_v55, %v7029_v44  ;;  %v3549_v42 = vsub.f32 %v3547_v17, %v3548_v62  ;;  %v3455_v12 = vld [vmem:[#allocation3 + $0x3a] sm:$0xff] }
 0x2d0   : > { %v2929_v33 = vpop.f32.mrf.mxu0 }
 0x2d1   : > { %3519 = vmatmul.f32.gmra.mxu2 %v3518_v31  ;;  %3684 = vmatmul.f32.gmra.mxu3 %v7009_v35  ;;  %v2914_v57 = vadd.f32 %v2913_v18, %v2833_v63  ;;  %v3534_v18 = vand.u32 4294901760, %v3533_v49  ;;  %v3540_v39 = vand.u32 4294901760, %v3539_v36 }
 0x2d2   : > { %v3078_v56 = vpop.f32.mrf.mxu1 }
 0x2d3   : > { %3772 = vmatmul.f32.gmra.mxu0 %v3523_v20  ;;  %v7026_v50 = vadd.f32 %v3070_v28, %v2914_v57  ;;  %v3541_v38 = vsub.f32 %v3539_v36, %v3540_v39  ;;  %v7050_v57 = vand.u32 4294901760, %v3455_v12 }
 0x2d4   : > { %v2767_v27 = vpop.f32.mrf.mxu2  ;;  %v2840_v2 = vpop.f32.mrf.mxu3 }
 0x2d5   : > { %v2768_v61 = vadd.f32 %v2767_v27, %v6824_v4  ;;  %3853 = vmatmul.f32.gmra.mxu1 %v3524_v34  ;;  %v3542_v23 = vand.u32 4294901760, %v3541_v38  ;;  %v3550_v34 = vand.u32 4294901760, %v3549_v42 }
 0x2d7   : > { %v2837_v8 = vadd.f32 %v2836_v53, %v2768_v61 }
 0x2d8   : > { %v2937_v46 = vpop.f32.mrf.mxu0 }
 0x2d9   : > { %3527 = vmatmul.f32.gmra.mxu2 %v3526_v11  ;;  %3688 = vmatmul.f32.gmra.mxu3 %v7022_v0  ;;  %v2922_v51 = vadd.f32 %v2921_v22, %v2837_v8  ;;  %v7043_v22 = vand.u32 4294901760, %v3454_v58  ;;  %v3456_v8 = vld [vmem:[#allocation3 + $0x42] sm:$0x3f] }
 0x2da   : > { %v3082_v9 = vpop.f32.mrf.mxu1 }
 0x2db   : > { %3777 = vmatmul.f32.gmra.mxu0 %v3531_v52  ;;  %v7033_v30 = vadd.f32 %v3074_v6, %v2922_v51  ;;  %v3555_v20 = vsub.f32 %v3454_v58, %v7043_v22 }
 0x2dc   : > { %v2771_v7 = vpop.f32.mrf.mxu2  ;;  %v2844_v4 = vpop.f32.mrf.mxu3 }
 0x2dd   : > { %v2772_v60 = vadd.f32 %v2771_v7, %v6861_v32  ;;  %3859 = vmatmul.f32.gmra.mxu1 %v3532_v45 }
 0x2df   : > { %v2841_v47 = vadd.f32 %v2840_v2, %v2772_v60  ;;  %v3563_v2 = vsub.f32 %v3455_v12, %v7050_v57 }
 0x2e0   : > { %v2945_v28 = vpop.f32.mrf.mxu0 }
 0x2e1   : > { %3535 = vmatmul.f32.gmra.mxu2 %v3534_v18  ;;  %3692 = vmatmul.f32.gmra.mxu3 %v7029_v44  ;;  %v2930_v41 = vadd.f32 %v2929_v33, %v2841_v47  ;;  %v3556_v33 = vand.u32 4294901760, %v3555_v20  ;;  %v3564_v51 = vand.u32 4294901760, %v3563_v2 }
 0x2e2   : > { %v3086_v26 = vpop.f32.mrf.mxu1 }
 0x2e3   : > { %3782 = vmatmul.f32.gmra.mxu0 %v3539_v36  ;;  %v7040_v54 = vadd.f32 %v3078_v56, %v2930_v41  ;;  %v3557_v27 = vsub.f32 %v3555_v20, %v3556_v33 }
 0x2e4   : > { %v2775_v10 = vpop.f32.mrf.mxu2  ;;  %v2848_v32 = vpop.f32.mrf.mxu3 }
 0x2e5   : > { %v2776_v21 = vadd.f32 %v2775_v10, %v7481_v16  ;;  %3865 = vmatmul.f32.gmra.mxu1 %v3540_v39 }
 0x2e7   : > { %v2845_v59 = vadd.f32 %v2844_v4, %v2776_v21  ;;  %v3565_v4 = vsub.f32 %v3563_v2, %v3564_v51 }
 0x2e8   : > { %v2953_v43 = vpop.f32.mrf.mxu0 }
 0x2e9   : > { %3543 = vmatmul.f32.gmra.mxu2 %v3542_v23  ;;  %3696 = vmatmul.f32.gmra.mxu3 %v7036_v29  ;;  %v2938_v1 = vadd.f32 %v2937_v46, %v2845_v59  ;;  %v3558_v46 = vand.u32 4294901760, %v3557_v27 }
 0x2ea   : > { %v3090_v6 = vpop.f32.mrf.mxu1 }
 0x2eb   : > { %3787 = vmatmul.f32.gmra.mxu0 %v3547_v17  ;;  %v7047_v5 = vadd.f32 %v3082_v9, %v2938_v1  ;;  %v7057_v9 = vand.u32 4294901760, %v3456_v8 }
 0x2ec   : > { %v2779_v53 = vpop.f32.mrf.mxu2  ;;  %v2852_v40 = vpop.f32.mrf.mxu3 }
 0x2ed   : > { %v2780_v63 = vadd.f32 %v2779_v53, %v6934_v19  ;;  %3871 = vmatmul.f32.gmra.mxu1 %v3548_v62  ;;  %v3571_v25 = vsub.f32 %v3456_v8, %v7057_v9 }
 0x2ef   : > { %v2849_v31 = vadd.f32 %v2848_v32, %v2780_v63  ;;  %v3572_v41 = vand.u32 4294901760, %v3571_v25 }
 0x2f0   : > { %v2961_v56 = vpop.f32.mrf.mxu0 }
 0x2f1   : > { %3551 = vmatmul.f32.gmra.mxu2 %v3550_v34  ;;  %3700 = vmatmul.f32.gmra.mxu3 %v7043_v22  ;;  %v2946_v3 = vadd.f32 %v2945_v28, %v2849_v31  ;;  %v3566_v28 = vand.u32 4294901760, %v3565_v4  ;;  %v3573_v10 = vsub.f32 %v3571_v25, %v3572_v41 }
 0x2f2   : > { %v3094_v52 = vpop.f32.mrf.mxu1 }
 0x2f3   : > { %3792 = vmatmul.f32.gmra.mxu0 %v3555_v20  ;;  %v7054_v55 = vadd.f32 %v3086_v26, %v2946_v3  ;;  %v3574_v59 = vand.u32 4294901760, %v3573_v10 }
 0x2f4   : > { %v2783_v61 = vpop.f32.mrf.mxu2  ;;  %v2856_v19 = vpop.f32.mrf.mxu3 }
 0x2f5   : > { %v2784_v11 = vadd.f32 %v2783_v61, %v6950_v13  ;;  %3877 = vmatmul.f32.gmra.mxu1 %v3556_v33 }
 0x2f7   : > { %v2853_v45 = vadd.f32 %v2852_v40, %v2784_v11 }
 0x2f8   : > { %v3344_v49 = vpop.f32.mrf.mxu0 }
 0x2f9   : > { %3559 = vmatmul.f32.gmra.mxu2 %v3558_v46  ;;  %3704 = vmatmul.f32.gmra.mxu3 %v7050_v57  ;;  %v2954_v36 = vadd.f32 %v2953_v43, %v2853_v45 }
 0x2fa   : > { %v3413_v7 = vpop.f32.mrf.mxu1 }
 0x2fb   : > { %3797 = vmatmul.f32.gmra.mxu0 %v3563_v2  ;;  %v7061_v60 = vadd.f32 %v3090_v6, %v2954_v36 }
 0x2fc   : > { %v2787_v47 = vpop.f32.mrf.mxu2  ;;  %v3227_v13 = vpop.f32.mrf.mxu3 }
 0x2fd   : > { %v2788_v18 = vadd.f32 %v2787_v47, %v6974_v14  ;;  %3883 = vmatmul.f32.gmra.mxu1 %v3564_v51 }
 0x2ff   : > { %v2857_v39 = vadd.f32 %v2856_v19, %v2788_v18 }
 0x300   : > { %v3348_v26 = vpop.f32.mrf.mxu0 }
 0x301   : > { %3567 = vmatmul.f32.gmra.mxu2 %v3566_v28  ;;  %3708 = vmatmul.f32.gmra.mxu3 %v7057_v9  ;;  %v2962_v38 = vadd.f32 %v2961_v56, %v2857_v39 }
 0x302   : > { %v3417_v17 = vpop.f32.mrf.mxu1 }
 0x303   : > { %3802 = vmatmul.f32.gmra.mxu0 %v3571_v25  ;;  %v7065_v32 = vadd.f32 %v3094_v52, %v2962_v38 }
 0x304   : > { %v3148_v58 = vpop.f32.mrf.mxu2  ;;  %v3233_v16 = vpop.f32.mrf.mxu3 }
 0x305   : > { %v3149_v21 = vadd.f32 %v3148_v58, %v7000_v24  ;;  %3889 = vmatmul.f32.gmra.mxu1 %v3572_v41 }
 0x307   : > { %v3228_v14 = vadd.f32 %v3227_v13, %v3149_v21 }
 0x308   : > { %v3352_v62 = vpop.f32.mrf.mxu0 }
 0x309   : > { %v3345_v23 = vadd.f32 %v3344_v49, %v3228_v14  ;;  %3575 = vmatmul.f32.gmra.mxu2 %v3574_v59  ;;  %4027 = vmatmul.f32.vlgmr.msra.gmra.mxu3 %v6966_v48 }
 0x30a   : > { %v3421_v42 = vpop.f32.mrf.mxu1 }
 0x30b   : > { %v7069_v43 = vadd.f32 %v3413_v7, %v3345_v23 }
 0x30c   : > { %v3153_v1 = vpop.f32.mrf.mxu2  ;;  %v3239_v6 = vpop.f32.mrf.mxu3 }
 0x30d   : > { %v3154_v20 = vadd.f32 %v3153_v1, %v7017_v37 }
 0x30f   : > { %v3234_v53 = vadd.f32 %v3233_v16, %v3154_v20 }
 0x310   : > { %v3356_v31 = vpop.f32.mrf.mxu0 }
 0x311   : > { %v3349_v40 = vadd.f32 %v3348_v26, %v3234_v53  ;;  %3958 = vmatmul.f32.vlgmr.msra.gmra.mxu2 %v6966_v48  ;;  %4031 = vmatmul.f32.gmra.mxu3 %v6989_v15 }
 0x312   : > { %v3425_v33 = vpop.f32.mrf.mxu1 }
 0x313   : > { %v7074_v24 = vadd.f32 %v3417_v17, %v3349_v40 }
 0x314   : > { %v3158_v12 = vpop.f32.mrf.mxu2  ;;  %v3245_v63 = vpop.f32.mrf.mxu3 }
 0x315   : > { %v3159_v34 = vadd.f32 %v3158_v12, %v7026_v50 }
 0x317   : > { %v3240_v56 = vadd.f32 %v3239_v6, %v3159_v34 }
 0x318   : > { %v3360_v2 = vpop.f32.mrf.mxu0 }
 0x319   : > { %v3353_v3 = vadd.f32 %v3352_v62, %v3240_v56  ;;  %3962 = vmatmul.f32.gmra.mxu2 %v6989_v15  ;;  %4035 = vmatmul.f32.gmra.mxu3 %v7009_v35 }
 0x31a   : > { %v3429_v19 = vpop.f32.mrf.mxu1 }
 0x31b   : > { %v7079_v37 = vadd.f32 %v3421_v42, %v3353_v3 }
 0x31c   : > { %v3163_v52 = vpop.f32.mrf.mxu2  ;;  %v3251_v48 = vpop.f32.mrf.mxu3 }
 0x31d   : > { %v3164_v27 = vadd.f32 %v3163_v52, %v7033_v30 }
 0x31f   : > { %v3246_v61 = vadd.f32 %v3245_v63, %v3164_v27 }
 0x320   : > { %v3364_v51 = vpop.f32.mrf.mxu0 }
 0x321   : > { %v3357_v8 = vadd.f32 %v3356_v31, %v3246_v61  ;;  %3966 = vmatmul.f32.gmra.mxu2 %v7009_v35  ;;  %4039 = vmatmul.f32.gmra.mxu3 %v7022_v0 }
 0x322   : > { %v3433_v30 = vpop.f32.mrf.mxu1 }
 0x323   : > { %v7084_v50 = vadd.f32 %v3425_v33, %v3357_v8 }
 0x324   : > { %v3168_v11 = vpop.f32.mrf.mxu2  ;;  %v3257_v15 = vpop.f32.mrf.mxu3 }
 0x325   : > { %v3169_v45 = vadd.f32 %v3168_v11, %v7040_v54 }
 0x327   : > { %v3252_v46 = vadd.f32 %v3251_v48, %v3169_v45 }
 0x328   : > { %v3368_v54 = vpop.f32.mrf.mxu0 }
 0x329   : > { %v3361_v49 = vadd.f32 %v3360_v2, %v3252_v46  ;;  %3970 = vmatmul.f32.gmra.mxu2 %v7022_v0  ;;  %4043 = vmatmul.f32.gmra.mxu3 %v7029_v44 }
 0x32a   : > { %v3437_v28 = vpop.f32.mrf.mxu1 }
 0x32b   : > { %v7089_v36 = vadd.f32 %v3429_v19, %v3361_v49 }
 0x32c   : > { %v3173_v7 = vpop.f32.mrf.mxu2  ;;  %v3263_v35 = vpop.f32.mrf.mxu3 }
 0x32d   : > { %v3174_v4 = vadd.f32 %v3173_v7, %v7047_v5 }
 0x32f   : > { %v3258_v25 = vadd.f32 %v3257_v15, %v3174_v4 }
 0x330   : > { %v3372_v10 = vpop.f32.mrf.mxu0 }
 0x331   : > { %v3365_v47 = vadd.f32 %v3364_v51, %v3258_v25  ;;  %3974 = vmatmul.f32.gmra.mxu2 %v7029_v44  ;;  %4047 = vmatmul.f32.gmra.mxu3 %v7036_v29 }
 0x332   : > { %v3441_v16 = vpop.f32.mrf.mxu1 }
 0x333   : > { %v7094_v13 = vadd.f32 %v3433_v30, %v3365_v47 }
 0x334   : > { %v3178_v18 = vpop.f32.mrf.mxu2  ;;  %v3269_v0 = vpop.f32.mrf.mxu3 }
 0x335   : > { %v3179_v39 = vadd.f32 %v3178_v18, %v7054_v55 }
 0x337   : > { %v3264_v41 = vadd.f32 %v3263_v35, %v3179_v39 }
 0x338   : > { %v3376_v62 = vpop.f32.mrf.mxu0 }
 0x339   : > { %v3369_v26 = vadd.f32 %v3368_v54, %v3264_v41  ;;  %3978 = vmatmul.f32.gmra.mxu2 %v7036_v29  ;;  %4051 = vmatmul.f32.gmra.mxu3 %v7043_v22 }
 0x33b   : > { %v7099_v5 = vadd.f32 %v3437_v28, %v3369_v26  ;;  %v7123_v26 = vld [vmem:[%s7187_s5] ss:$0 sm:$0xff] }
 0x33c   : > { %v3183_v38 = vpop.f32.mrf.mxu2  ;;  %v3275_v44 = vpop.f32.mrf.mxu3 }
 0x33d   : > { %v3184_v17 = vadd.f32 %v3183_v38, %v7061_v60  ;;  %v3445_v60 = vpop.f32.mrf.mxu1 }
 0x33f   : > { %v3270_v58 = vadd.f32 %v3269_v0, %v3184_v17 }
 0x340   : > { %v3763_v8 = vpop.f32.mrf.mxu0 }
 0x341   : > { %v3373_v21 = vadd.f32 %v3372_v10, %v3270_v58  ;;  %3982 = vmatmul.f32.gmra.mxu2 %v7043_v22  ;;  %4055 = vmatmul.f32.gmra.mxu3 %v7050_v57 }
 0x343   : > { %v7104_v55 = vadd.f32 %v3441_v16, %v3373_v21 }
 0x344   : > { %v3188_v14 = vpop.f32.mrf.mxu2  ;;  %v3677_v29 = vpop.f32.mrf.mxu3 }
 0x345   : > { %v3189_v59 = vadd.f32 %v3188_v14, %v7065_v32  ;;  %v3842_v11 = vpop.f32.mrf.mxu1 }
 0x347   : > { %v3276_v23 = vadd.f32 %v3275_v44, %v3189_v59  ;;  %v7129_v44 = vld [vmem:[%s7188_s6] ss:$0 sm:$0xff] }
 0x348   : > { %v3768_v51 = vpop.f32.mrf.mxu0 }
 0x349   : > { %v3377_v1 = vadd.f32 %v3376_v62, %v3276_v23  ;;  %3986 = vmatmul.f32.gmra.mxu2 %v7050_v57  ;;  %4059 = vmatmul.f32.gmra.mxu3 %v7057_v9 }
 0x34b   : > { %v7109_v6 = vadd.f32 %v3445_v60, %v3377_v1 }
 0x34c   : > { %v3512_v42 = vpop.f32.mrf.mxu2  ;;  %v3681_v22 = vpop.f32.mrf.mxu3 }
 0x34d   : > { %v3678_v20 = vadd.f32 %v3677_v29, %v3512_v42  ;;  %v3848_v49 = vpop.f32.mrf.mxu1 }
 0x34f   : > { %v3764_v4 = vadd.f32 %v3763_v8, %v3678_v20 }
 0x350   : > { %v3773_v25 = vpop.f32.mrf.mxu0 }
 0x351   : > { %3990 = vmatmul.f32.gmra.mxu2 %v7057_v9  ;;  %v3843_v47 = vadd.f32 %v3842_v11, %v3764_v4 }
 0x354   : > { %v3520_v53 = vpop.f32.mrf.mxu2  ;;  %v3685_v40 = vpop.f32.mrf.mxu3 }
 0x355   : > { %v3682_v12 = vadd.f32 %v3681_v22, %v3520_v53  ;;  %v3854_v39 = vpop.f32.mrf.mxu1 }
 0x357   : > { %v3769_v28 = vadd.f32 %v3768_v51, %v3682_v12 }
 0x358   : > { %v3778_v17 = vpop.f32.mrf.mxu0 }
 0x359   : > { %v3849_v58 = vadd.f32 %v3848_v49, %v3769_v28 }
 0x35c   : > { %v3528_v63 = vpop.f32.mrf.mxu2  ;;  %v3689_v32 = vpop.f32.mrf.mxu3 }
 0x35d   : > { %v3686_v31 = vadd.f32 %v3685_v40, %v3528_v63  ;;  %v3860_v62 = vpop.f32.mrf.mxu1 }
 0x360   : > { %v3783_v12 = vpop.f32.mrf.mxu0 }
 0x364   : > { %v3536_v34 = vpop.f32.mrf.mxu2  ;;  %v3693_v33 = vpop.f32.mrf.mxu3 }
 0x365   : > { %v3690_v56 = vadd.f32 %v3689_v32, %v3536_v34 }
 0x367   : > { %v3779_v63 = vadd.f32 %v3778_v17, %v3690_v56 }
 0x368   : > { %v3788_v56 = vpop.f32.mrf.mxu0 }
 0x36c   : > { %v3544_v57 = vpop.f32.mrf.mxu2  ;;  %v3697_v3 = vpop.f32.mrf.mxu3 }
 0x36d   : > { %v3694_v52 = vadd.f32 %v3693_v33, %v3544_v57  ;;  %v3866_v33 = vpop.f32.mrf.mxu1 }
 0x374   : > { %v3552_v48 = vpop.f32.mrf.mxu2  ;;  %v3701_v27 = vpop.f32.mrf.mxu3 }
 0x375   : > { %v7112_v2 = vadd.f32 %v3697_v3, %v3552_v48  ;;  %v3872_v51 = vpop.f32.mrf.mxu1 }
 0x377   : > { %v3789_v4 = vadd.f32 %v3788_v56, %v7112_v2 }
 0x37c   : > { %v3560_v61 = vpop.f32.mrf.mxu2  ;;  %v3705_v19 = vpop.f32.mrf.mxu3 }
 0x37d   : > { %v7114_v9 = vadd.f32 %v3701_v27, %v3560_v61 }
 0x384   : > { %v3568_v15 = vpop.f32.mrf.mxu2  ;;  %v3709_v45 = vpop.f32.mrf.mxu3 }
 0x385   : > { %v7116_v46 = vadd.f32 %v3705_v19, %v3568_v15  ;;  %v3784_v19 = vadd.f32 %v3783_v12, %v3694_v52 }
 0x38c   : > { %v3576_v30 = vpop.f32.mrf.mxu2  ;;  %v4028_v7 = vpop.f32.mrf.mxu3 }
 0x38d   : > { %v7118_v35 = vadd.f32 %v3709_v45, %v3576_v30 }
 0x394   : > { %v3959_v54 = vpop.f32.mrf.mxu2  ;;  %v4032_v18 = vpop.f32.mrf.mxu3 }
 0x395   : > { %v3960_v0 = vadd.f32 %v3959_v54, %v3843_v47 }
 0x397   : > { %v4029_v41 = vadd.f32 %v4028_v7, %v3960_v0  ;;  %v3873_v0 = vadd.f32 %v3872_v51, %v3789_v4 }
 0x399   : > { %v4063_v38 = vadd.f32 %v4029_v41, %v7069_v43  ;;  %v3774_v43 = vadd.f32 %v3773_v25, %v3686_v31 }
 0x39b   : > { %v4076_v10 = vmul.f32 %v7123_v26, %v4063_v38  ;;  %v3855_v42 = vadd.f32 %v3854_v39, %v3774_v43  ;;  %v3878_v38 = vpop.f32.mrf.mxu1 }
 0x39c   : > { %v3963_v16 = vpop.f32.mrf.mxu2  ;;  %v4036_v21 = vpop.f32.mrf.mxu3 }
 0x39d   : > { %v4089_v14 = vadd.f32 %v7129_v44, %v4076_v10  ;;  %v3964_v29 = vadd.f32 %v3963_v16, %v3849_v58 }
 0x39f   : > { %v4098_v59 = vmax.f32 %v4089_v14, 0.0  ;;  %v4033_v23 = vadd.f32 %v4032_v18, %v3964_v29  ;;  %v3793_v18 = vpop.f32.mrf.mxu0 }
 0x3a0   : > { %v3794_v17 = vadd.f32 %v3793_v18, %v7114_v9 }
 0x3a1   : > { %4107 = vst [vmem:[%s7138_s8] sm:$0xff] %v4098_v59  ;;  %v4064_v1 = vadd.f32 %v4033_v23, %v7074_v24  ;;  %v3861_v24 = vadd.f32 %v3860_v62, %v3779_v63 }
 0x3a3   : > { %v4077_v60 = vmul.f32 %v7123_v26, %v4064_v1  ;;  %v3884_v1 = vpop.f32.mrf.mxu1 }
 0x3a4   : > { %v3967_v22 = vpop.f32.mrf.mxu2  ;;  %v4040_v20 = vpop.f32.mrf.mxu3 }
 0x3a5   : > { %v4090_v53 = vadd.f32 %v7129_v44, %v4077_v60  ;;  %v3968_v40 = vadd.f32 %v3967_v22, %v3855_v42 }
 0x3a7   : > { %v4099_v32 = vmax.f32 %v4090_v53, 0.0  ;;  %v4037_v31 = vadd.f32 %v4036_v21, %v3968_v40  ;;  %v3879_v21 = vadd.f32 %v3878_v38, %v3794_v17  ;;  %v3798_v14 = vpop.f32.mrf.mxu0 }
 0x3a8   : > { %v3799_v23 = vadd.f32 %v3798_v14, %v7116_v46 }
 0x3a9   : > { %4108 = vst [vmem:[%s7138_s8 + $0x8] sm:$0xff] %v4099_v32  ;;  %v4065_v34 = vadd.f32 %v4037_v31, %v7079_v37  ;;  %v3867_v37 = vadd.f32 %v3866_v33, %v3784_v19 }
 0x3aa   : > { %v3885_v42 = vadd.f32 %v3884_v1, %v3799_v23 }
 0x3ab   : > { %v4078_v57 = vmul.f32 %v7123_v26, %v4065_v34  ;;  %v3890_v34 = vpop.f32.mrf.mxu1 }
 0x3ac   : > { %v3971_v3 = vpop.f32.mrf.mxu2  ;;  %v4044_v61 = vpop.f32.mrf.mxu3 }
 0x3ad   : > { %v4091_v48 = vadd.f32 %v7129_v44, %v4078_v57  ;;  %v3972_v27 = vadd.f32 %v3971_v3, %v3861_v24 }
 0x3af   : > { %v4100_v8 = vmax.f32 %v4091_v48, 0.0  ;;  %v4041_v11 = vadd.f32 %v4040_v20, %v3972_v27  ;;  %v3803_v12 = vpop.f32.mrf.mxu0 }
 0x3b0   : > { %v3804_v46 = vadd.f32 %v3803_v12, %v7118_v35 }
 0x3b1   : > { %4260 = vst [vmem:[%s7138_s8 + $0xe] sm:$0xfc] %v4100_v8  ;;  %v4066_v15 = vadd.f32 %v4041_v11, %v7084_v50 }
 0x3b2   : > { %v3891_v33 = vadd.f32 %v3890_v34, %v3804_v46 }
 0x3b3   : > { %v4079_v45 = vmul.f32 %v7123_v26, %v4066_v15 }
 0x3b4   : > { %v3975_v49 = vpop.f32.mrf.mxu2  ;;  %v4048_v47 = vpop.f32.mrf.mxu3 }
 0x3b5   : > { %v4092_v30 = vadd.f32 %v7129_v44, %v4079_v45  ;;  %v3976_v7 = vadd.f32 %v3975_v49, %v3867_v37 }
 0x3b7   : > { %v4101_v25 = vmax.f32 %v4092_v30, 0.0  ;;  %v4045_v52 = vadd.f32 %v4044_v61, %v3976_v7 }
 0x3b9   : > { %4261 = vst [vmem:[%s7138_s8 + $0x16] sm:$0xff] %v4101_v25  ;;  %v4067_v54 = vadd.f32 %v4045_v52, %v7089_v36 }
 0x3bb   : > { %v4080_v50 = vmul.f32 %v7123_v26, %v4067_v54 }
 0x3bc   : > { %v3979_v39 = vpop.f32.mrf.mxu2  ;;  %v4052_v16 = vpop.f32.mrf.mxu3 }
 0x3bd   : > { %v4093_v28 = vadd.f32 %v7129_v44, %v4080_v50  ;;  %v3980_v41 = vadd.f32 %v3979_v39, %v3873_v0 }
 0x3bf   : > { %v4102_v2 = vmax.f32 %v4093_v28, 0.0  ;;  %v4049_v10 = vadd.f32 %v4048_v47, %v3980_v41 }
 0x3c1   : > { %4262 = vst [vmem:[%s7138_s8 + $0x1e] sm:$0x3] %v4102_v2  ;;  %v4068_v58 = vadd.f32 %v4049_v10, %v7094_v13 }
 0x3c2   : > { %4263 = vst [vmem:[%s7138_s8 + $0x1c] sm:$0xf0] %v4102_v2 }
 0x3c3   : > { %v4081_v36 = vmul.f32 %v7123_v26, %v4068_v58 }
 0x3c4   : > { %v3983_v29 = vpop.f32.mrf.mxu2  ;;  %v4056_v22 = vpop.f32.mrf.mxu3 }
 0x3c5   : > { %v4094_v43 = vadd.f32 %v7129_v44, %v4081_v36  ;;  %v3984_v59 = vadd.f32 %v3983_v29, %v3879_v21 }
 0x3c7   : > { %v4103_v9 = vmax.f32 %v4094_v43, 0.0  ;;  %v4053_v62 = vadd.f32 %v4052_v16, %v3984_v59 }
 0x3c9   : > { %4264 = vst [vmem:[%s7138_s8 + $0x24] sm:$0xff] %v4103_v9  ;;  %v4069_v13 = vadd.f32 %v4053_v62, %v7099_v5 }
 0x3cb   : > { %v4082_v60 = vmul.f32 %v7123_v26, %v4069_v13 }
 0x3cc   : > { %v3987_v20 = vpop.f32.mrf.mxu2  ;;  %v4060_v48 = vpop.f32.mrf.mxu3 }
 0x3cd   : > { %v4095_v53 = vadd.f32 %v7129_v44, %v4082_v60  ;;  %v3988_v40 = vadd.f32 %v3987_v20, %v3885_v42 }
 0x3cf   : > { %v4104_v63 = vmax.f32 %v4095_v53, 0.0  ;;  %v4057_v32 = vadd.f32 %v4056_v22, %v3988_v40 }
 0x3d1   : > { %4265 = vst [vmem:[%s7138_s8 + $0x2c] sm:$0xf] %v4104_v63  ;;  %v4070_v31 = vadd.f32 %v4057_v32, %v7104_v55 }
 0x3d2   : > { %4266 = vst [vmem:[%s7138_s8 + $0x2a] sm:$0xc0] %v4104_v63 }
 0x3d3   : > { %v4083_v5 = vmul.f32 %v7123_v26, %v4070_v31 }
 0x3d4   : > { %v3991_v57 = vpop.f32.mrf.mxu2 }
 0x3d5   : > { %v4096_v24 = vadd.f32 %v7129_v44, %v4083_v5  ;;  %v3992_v3 = vadd.f32 %v3991_v57, %v3891_v33 }
 0x3d7   : > { %v4105_v27 = vmax.f32 %v4096_v24, 0.0  ;;  %v4061_v61 = vadd.f32 %v4060_v48, %v3992_v3 }
 0x3d9   : > { %4267 = vst [vmem:[%s7138_s8 + $0x32] sm:$0xff] %v4105_v27  ;;  %v4071_v35 = vadd.f32 %v4061_v61, %v7109_v6 }
 0x3db   : > { %v4084_v19 = vmul.f32 %v7123_v26, %v4071_v35 }
 0x3dd   : > { %v4097_v55 = vadd.f32 %v7129_v44, %v4084_v19 }
 0x3df   : > { %v4106_v8 = vmax.f32 %v4097_v55, 0.0 }
 0x3e1   : > { %4268 = vst [vmem:[%s7138_s8 + $0x3a] sm:$0x3f] %v4106_v8 }
 0x3e2 PF: > { %s17_s24 = sadd.s32 1, %s4292_s24  }
 0x3e3   : > { %p14_p4 = scmp.ge.s32.totalorder %s17_s24, 4  }
 0x3e5   :  { %16 = sbr.rel (!%p14_p4) target bundleno = 1 (0x1), region = 88 }

</bundles_post_ra>
